<compile_context>
chip_gen: v7x
topology: tpu7x:2x2x1
jax: 0.10.0
libtpu: 0.0.40
codegen_flags: <defaults>
</compile_context>

<pallas_src>
import functools

import jax
import jax.numpy as jnp
from jax import lax
from jax.experimental import pallas as pl
from jax.experimental.pallas import tpu as pltpu


def _vmem_budget_bytes(default_phys=64 * 1024 * 1024):
    """Generation-aware scoped-VMEM budget: ~3/4 of physical VMEM.
    v7x (64 MiB phys) -> 48 MiB, v5e/v6e (128 MiB phys) -> 96 MiB."""
    try:
        info = pltpu.get_tpu_info()
        phys = int(getattr(info, "vmem_capacity_bytes", default_phys))
    except Exception:
        phys = default_phys
    return max(16 * 1024 * 1024, (phys * 3) // 4)


def _choose_windows_per_block(B_, N, C, out_bytes, vmem_budget,
                              target_m=256, min_steps=4):
    """Pick windows-per-grid-step so M = Bw*N is MXU-friendly (~>=256 rows,
    multiple of 8), fits the VMEM budget, and still leaves several grid steps
    (>= 4 preferred, so each v7x TensorCore gets a pipelined sequence)."""
    # Rough per-row VMEM bytes: double-buffered bf16 x block + out block plus
    # in-kernel f32/bf16 temporaries (qkv, q/k/v, ctx, y) ~ 11 f32-widths of C.
    per_row = C * (2 * 2 + 2 * out_bytes + 11 * 4)
    fixed = 2 * (C * 3 * C + C * C) * 2 + 64 * C          # double-buffered weights
    max_rows = max(N, (vmem_budget // 2 - fixed) // per_row)

    cands = [bw for bw in range(1, B_ + 1)
             if B_ % bw == 0 and bw * N <= max_rows
             and ((bw * N) % 8 == 0 or bw == B_)]          # (8,128) sublane rule
    if not cands:
        return B_                                          # full extent is always legal

    def score(bw):
        m, steps = bw * N, B_ // bw
        return (m >= target_m,            # reach an MXU-friendly M if we can
                steps >= min_steps,       # keep multiple steps per core (v7x)
                -abs(m - target_m),       # otherwise as close to target as possible
                steps)
    return max(cands, key=score)


def window_attention_kernel(x_ref, wqkv_ref, bqkv_ref, wp_ref, bp_ref, o_ref, *,
                            num_heads, head_dim, tokens, windows_per_block):
    """One grid step processes `windows_per_block` windows (M = Bw*N rows)."""
    N, H, hd, Bw = tokens, num_heads, head_dim, windows_per_block
    C = H * hd
    M = Bw * N

    xf = x_ref[...]                      # (M, C), bf16 compute dtype
    cdt = xf.dtype

    # Fused QKV projection: one (M, C) @ (C, 3C) MXU pass.  The attention
    # scale (and q bias) are folded into the Q columns host-side, so no
    # per-step VPU rescale is needed.
    qkv = jnp.dot(xf, wqkv_ref[...],
                  preferred_element_type=jnp.float32) + bqkv_ref[...]   # (M, 3C) f32

    # Head split: (M, C) columns -> (H*Bw, N, hd) with batch g = h*Bw + b.
    # TODO(synk): a single reshape+transpose / pltpu.einshape relayout would
    # replace the per-head lane slices + concat, but major-dim transposes are
    # not reliably lowerable in-kernel, so the verified slice+concat is kept.
    def split_heads(base):
        parts = [qkv[:, base + h * hd: base + (h + 1) * hd].reshape(Bw, N, hd)
                 for h in range(H)]
        return jnp.concatenate(parts, axis=0).astype(cdt)   # (H*Bw, N, hd)

    q = split_heads(0 * C)
    k = split_heads(1 * C)
    v = split_heads(2 * C)

    # The reference forward() has no softmax / bias / mask, so reassociate:
    #     (q @ k^T) @ v  ==  q @ (k^T @ v)
    # which removes the (H*Bw, N, N) score slab and cuts FLOPs.
    # TODO(synk): relative_position_bias_table, mask and softmax exist in
    # __init__ but are never applied by the given forward(); not applied here.
    kv = lax.dot_general(k, v, (((1,), (1,)), ((0,), (0,))),
                         preferred_element_type=jnp.float32)            # (G, hd, hd)
    ctx = lax.dot_general(q, kv.astype(cdt), (((2,), (1,)), ((0,), (0,))),
                          preferred_element_type=jnp.float32)           # (G, N, hd)

    # Merge heads back with one lane concat (major slices are cheap), then a
    # single fused (M, C) @ (C, C) output projection — no per-head K=hd
    # accumulation loop, no repeated VMEM round-trips of a big f32 accumulator.
    ctx_mc = jnp.concatenate(
        [ctx[h * Bw:(h + 1) * Bw].reshape(M, hd) for h in range(H)],
        axis=1)                                                          # (M, C) f32
    y = jnp.dot(ctx_mc.astype(cdt), wp_ref[...],
                preferred_element_type=jnp.float32) + bp_ref[...]
    o_ref[...] = y.astype(o_ref.dtype)


def window_attention(x, w_qkv, b_qkv, w_proj, b_proj, *, num_heads, scale,
                     windows_per_block=None, compute_dtype=jnp.bfloat16,
                     out_dtype=None):
    B_, N, C = x.shape
    head_dim = C // num_heads
    out_dtype = x.dtype if out_dtype is None else out_dtype

    vmem_budget = _vmem_budget_bytes()
    if windows_per_block is None:
        windows_per_block = _choose_windows_per_block(
            B_, N, C, jnp.dtype(out_dtype).itemsize, vmem_budget)
    Bw = windows_per_block
    assert B_ % Bw == 0, "windows_per_block must divide num_windows*batch"
    M = Bw * N

    # ---- host-side (traced, outside the kernel) weight preparation ---------
    # Fused right-multiply QKV weight with the attention scale folded into the
    # Q columns; bf16 MXU inputs, f32 biases.
    wq = w_qkv[0 * C:1 * C, :].T * scale
    wk = w_qkv[1 * C:2 * C, :].T
    wv = w_qkv[2 * C:3 * C, :].T
    wqkv = jnp.concatenate([wq, wk, wv], axis=1).astype(compute_dtype)   # (C, 3C)
    bqkv = jnp.concatenate(
        [b_qkv[:, 0:C] * scale, b_qkv[:, C:2 * C], b_qkv[:, 2 * C:3 * C]],
        axis=1).astype(jnp.float32)                                      # (1, 3C)
    wp = w_proj.T.astype(compute_dtype)                                  # (C, C)
    bp = b_proj.astype(jnp.float32)                                      # (1, C)

    # Fold (B_, N) into one sublane-dense row axis; each grid step handles
    # `windows_per_block` windows worth of rows.
    xf = x.reshape(B_ * N, C).astype(compute_dtype)

    kernel = functools.partial(window_attention_kernel,
                               num_heads=num_heads, head_dim=head_dim,
                               tokens=N, windows_per_block=Bw)

    # TODO(synk): for large C, mark the grid-invariant weight specs with
    # pipeline_mode=pl.Buffered(1) to drop their redundant double buffer.
    yf = pl.pallas_call(
        kernel,
        out_shape=jax.ShapeDtypeStruct((B_ * N, C), out_dtype),
        grid_spec=pltpu.PrefetchScalarGridSpec(
            num_scalar_prefetch=0,
            grid=(B_ // Bw,),
            in_specs=[
                pl.BlockSpec((M, C), lambda b: (b, 0)),          # x rows
                pl.BlockSpec((C, 3 * C), lambda b: (0, 0)),      # fused W_qkv^T (Q scaled)
                pl.BlockSpec((1, 3 * C), lambda b: (0, 0)),      # fused b_qkv (Q scaled)
                pl.BlockSpec((C, C), lambda b: (0, 0)),          # W_proj^T
                pl.BlockSpec((1, C), lambda b: (0, 0)),          # b_proj
            ],
            out_specs=pl.BlockSpec((M, C), lambda b: (b, 0)),
        ),
        compiler_params=pltpu.CompilerParams(
            # Independent windows -> parallel steps (megacore / v7x 2-TC).
            dimension_semantics=("parallel",),
            # Generation-aware scoped VMEM limit (~48 MiB v7x, ~96 MiB v5e/v6e).
            vmem_limit_bytes=int(vmem_budget),
        ),
    )(xf, wqkv, bqkv, wp, bp)
    return yf.reshape(B_, N, C)


def reference_forward(x, w_qkv, b_qkv, w_proj, b_proj, *, num_heads, scale):
    """Pure-JAX f32 transcription of the PyTorch forward (typo read as transpose)."""
    B_, N, C = x.shape
    hd = C // num_heads
    qkv = x @ w_qkv.T + b_qkv[0]
    qkv = qkv.reshape(B_, N, 3, num_heads, hd).transpose(2, 0, 3, 1, 4)
    q, k, v = qkv[0], qkv[1], qkv[2]
    q = q * scale
    attn = q @ jnp.swapaxes(k, -2, -1)
    out = jnp.swapaxes(attn @ v, 1, 2).reshape(B_, N, C)
    return out @ w_proj.T + b_proj[0]


if __name__ == "__main__":
    # Module config (small, TPU-friendly): dim=32, window 4x4 -> N=16, 4 heads.
    dim = 32
    window_size = (4, 4)
    num_heads = 4
    head_dim = dim // num_heads
    scale = head_dim ** (-0.5)            # qk_scale=None -> head_dim**-0.5
    N = window_size[0] * window_size[1]
    B_ = 64                               # num_windows * batch -> Bw=16, M=256, 4 steps

    key = jax.random.PRNGKey(0)
    kx, k1, k2, k3, k4, k5 = jax.random.split(key, 6)

    x = jax.random.normal(kx, (B_, N, dim), dtype=jnp.float32)

    # Deterministic parameter init (synthetic, not a checkpoint).
    w_qkv = 0.05 * jax.random.normal(k1, (3 * dim, dim), dtype=jnp.float32)
    b_qkv = 0.05 * jax.random.normal(k2, (1, 3 * dim), dtype=jnp.float32)
    w_proj = 0.05 * jax.random.normal(k3, (dim, dim), dtype=jnp.float32)
    b_proj = 0.05 * jax.random.normal(k4, (1, dim), dtype=jnp.float32)

    # Relative position bias table: part of __init__ but unused by forward().
    num_rel = (2 * window_size[0] - 1) * (2 * window_size[1] - 1)
    _rel_pos_bias_table = 0.02 * jax.random.normal(
        k5, (num_rel, num_heads), dtype=jnp.float32)

    y = window_attention(x, w_qkv, b_qkv, w_proj, b_proj,
                         num_heads=num_heads, scale=scale)
    y = jax.block_until_ready(y)

    y_ref = reference_forward(x, w_qkv, b_qkv, w_proj, b_proj,
                              num_heads=num_heads, scale=scale)
    assert y.shape == (B_, N, dim)
    # bf16 MXU inputs with f32 accumulation -> loosened tolerance vs pure f32.
    assert jnp.allclose(y, y_ref, atol=2e-2, rtol=2e-2), (
        float(jnp.max(jnp.abs(y - y_ref))))

    print("KERNEL_OK")
</pallas_src>

<mosaic_0001>
module attributes {stable_mosaic.version = 11 : i64} {
  func.func @window_attention_kernel(%arg0: i32, %arg1: memref<256x32xbf16, #tpu.memory_space<vmem>>, %arg2: memref<32x96xbf16, #tpu.memory_space<vmem>>, %arg3: memref<1x96xf32, #tpu.memory_space<vmem>>, %arg4: memref<32x32xbf16, #tpu.memory_space<vmem>>, %arg5: memref<1x32xf32, #tpu.memory_space<vmem>>, %arg6: memref<256x32xf32, #tpu.memory_space<vmem>>) attributes {dimension_semantics = [#tpu.dimension_semantics<parallel>], iteration_bounds = array<i64: 4>, scalar_prefetch = 0 : i64, scratch_operands = 0 : i64, tpu.core_type = #tpu.core_type<tc>, window_params = [{transform_indices = @transform_0, window_bounds = array<i64: 256, 32>}, {pipeline_mode = #tpu.pipeline_mode<synchronous>, transform_indices = @transform_1, window_bounds = array<i64: 32, 96>}, {pipeline_mode = #tpu.pipeline_mode<synchronous>, transform_indices = @transform_2, window_bounds = array<i64: 1, 96>}, {pipeline_mode = #tpu.pipeline_mode<synchronous>, transform_indices = @transform_3, window_bounds = array<i64: 32, 32>}, {pipeline_mode = #tpu.pipeline_mode<synchronous>, transform_indices = @transform_4, window_bounds = array<i64: 1, 32>}, {transform_indices = @transform_5, window_bounds = array<i64: 256, 32>}]} {
    %c0 = arith.constant 0 : index
    %c0_0 = arith.constant 0 : index
    %0 = vector.load %arg1[%c0, %c0_0] : memref<256x32xbf16, #tpu.memory_space<vmem>>, vector<256x32xbf16>
    %c0_1 = arith.constant 0 : index
    %c0_2 = arith.constant 0 : index
    %1 = vector.load %arg2[%c0_1, %c0_2] : memref<32x96xbf16, #tpu.memory_space<vmem>>, vector<32x96xbf16>
    %cst = arith.constant dense<0.000000e+00> : vector<256x96xf32>
    %2 = tpu.matmul %0, %1, %cst {dimension_numbers = #tpu.dot_dimension_numbers<[1], [0], [0], [1], [0, 0, 1, 1], [], []>} : vector<256x32xbf16>, vector<32x96xbf16>, vector<256x96xf32> -> vector<256x96xf32>
    %c0_3 = arith.constant 0 : index
    %c0_4 = arith.constant 0 : index
    %3 = vector.load %arg3[%c0_3, %c0_4] : memref<1x96xf32, #tpu.memory_space<vmem>>, vector<1x96xf32>
    %4 = vector.broadcast %3 : vector<1x96xf32> to vector<256x96xf32>
    %5 = arith.addf %2, %4 : vector<256x96xf32>
    %6 = vector.extract_strided_slice %5 {offsets = [0, 0], sizes = [256, 8], strides = [1, 1]} : vector<256x96xf32> to vector<256x8xf32>
    %7 = vector.shape_cast %6 : vector<256x8xf32> to vector<16x16x8xf32>
    %8 = vector.extract_strided_slice %5 {offsets = [0, 8], sizes = [256, 8], strides = [1, 1]} : vector<256x96xf32> to vector<256x8xf32>
    %9 = vector.shape_cast %8 : vector<256x8xf32> to vector<16x16x8xf32>
    %10 = vector.extract_strided_slice %5 {offsets = [0, 16], sizes = [256, 8], strides = [1, 1]} : vector<256x96xf32> to vector<256x8xf32>
    %11 = vector.shape_cast %10 : vector<256x8xf32> to vector<16x16x8xf32>
    %12 = vector.extract_strided_slice %5 {offsets = [0, 24], sizes = [256, 8], strides = [1, 1]} : vector<256x96xf32> to vector<256x8xf32>
    %13 = vector.shape_cast %12 : vector<256x8xf32> to vector<16x16x8xf32>
    %14 = tpu.concatenate %7, %9, %11, %13 in 0 : vector<16x16x8xf32>, vector<16x16x8xf32>, vector<16x16x8xf32>, vector<16x16x8xf32> -> vector<64x16x8xf32>
    %15 = arith.truncf %14 : vector<64x16x8xf32> to vector<64x16x8xbf16>
    %16 = vector.extract_strided_slice %5 {offsets = [0, 32], sizes = [256, 8], strides = [1, 1]} : vector<256x96xf32> to vector<256x8xf32>
    %17 = vector.shape_cast %16 : vector<256x8xf32> to vector<16x16x8xf32>
    %18 = vector.extract_strided_slice %5 {offsets = [0, 40], sizes = [256, 8], strides = [1, 1]} : vector<256x96xf32> to vector<256x8xf32>
    %19 = vector.shape_cast %18 : vector<256x8xf32> to vector<16x16x8xf32>
    %20 = vector.extract_strided_slice %5 {offsets = [0, 48], sizes = [256, 8], strides = [1, 1]} : vector<256x96xf32> to vector<256x8xf32>
    %21 = vector.shape_cast %20 : vector<256x8xf32> to vector<16x16x8xf32>
    %22 = vector.extract_strided_slice %5 {offsets = [0, 56], sizes = [256, 8], strides = [1, 1]} : vector<256x96xf32> to vector<256x8xf32>
    %23 = vector.shape_cast %22 : vector<256x8xf32> to vector<16x16x8xf32>
    %24 = tpu.concatenate %17, %19, %21, %23 in 0 : vector<16x16x8xf32>, vector<16x16x8xf32>, vector<16x16x8xf32>, vector<16x16x8xf32> -> vector<64x16x8xf32>
    %25 = arith.truncf %24 : vector<64x16x8xf32> to vector<64x16x8xbf16>
    %26 = vector.extract_strided_slice %5 {offsets = [0, 64], sizes = [256, 8], strides = [1, 1]} : vector<256x96xf32> to vector<256x8xf32>
    %27 = vector.shape_cast %26 : vector<256x8xf32> to vector<16x16x8xf32>
    %28 = vector.extract_strided_slice %5 {offsets = [0, 72], sizes = [256, 8], strides = [1, 1]} : vector<256x96xf32> to vector<256x8xf32>
    %29 = vector.shape_cast %28 : vector<256x8xf32> to vector<16x16x8xf32>
    %30 = vector.extract_strided_slice %5 {offsets = [0, 80], sizes = [256, 8], strides = [1, 1]} : vector<256x96xf32> to vector<256x8xf32>
    %31 = vector.shape_cast %30 : vector<256x8xf32> to vector<16x16x8xf32>
    %32 = vector.extract_strided_slice %5 {offsets = [0, 88], sizes = [256, 8], strides = [1, 1]} : vector<256x96xf32> to vector<256x8xf32>
    %33 = vector.shape_cast %32 : vector<256x8xf32> to vector<16x16x8xf32>
    %34 = tpu.concatenate %27, %29, %31, %33 in 0 : vector<16x16x8xf32>, vector<16x16x8xf32>, vector<16x16x8xf32>, vector<16x16x8xf32> -> vector<64x16x8xf32>
    %35 = arith.truncf %34 : vector<64x16x8xf32> to vector<64x16x8xbf16>
    %cst_5 = arith.constant dense<0.000000e+00> : vector<64x8x8xf32>
    %36 = tpu.matmul %25, %35, %cst_5 {dimension_numbers = #tpu.dot_dimension_numbers<[1], [1], [2], [2], [0, 0, 0, 2, 1, 2], [0], [0]>} : vector<64x16x8xbf16>, vector<64x16x8xbf16>, vector<64x8x8xf32> -> vector<64x8x8xf32>
    %37 = arith.truncf %36 : vector<64x8x8xf32> to vector<64x8x8xbf16>
    %cst_6 = arith.constant dense<0.000000e+00> : vector<64x16x8xf32>
    %38 = tpu.matmul %15, %37, %cst_6 {dimension_numbers = #tpu.dot_dimension_numbers<[2], [1], [1], [2], [0, 0, 0, 1, 1, 2], [0], [0]>} : vector<64x16x8xbf16>, vector<64x8x8xbf16>, vector<64x16x8xf32> -> vector<64x16x8xf32>
    %39 = vector.extract_strided_slice %38 {offsets = [0, 0, 0], sizes = [16, 16, 8], strides = [1, 1, 1]} : vector<64x16x8xf32> to vector<16x16x8xf32>
    %40 = vector.shape_cast %39 : vector<16x16x8xf32> to vector<256x8xf32>
    %41 = vector.extract_strided_slice %38 {offsets = [16, 0, 0], sizes = [16, 16, 8], strides = [1, 1, 1]} : vector<64x16x8xf32> to vector<16x16x8xf32>
    %42 = vector.shape_cast %41 : vector<16x16x8xf32> to vector<256x8xf32>
    %43 = vector.extract_strided_slice %38 {offsets = [32, 0, 0], sizes = [16, 16, 8], strides = [1, 1, 1]} : vector<64x16x8xf32> to vector<16x16x8xf32>
    %44 = vector.shape_cast %43 : vector<16x16x8xf32> to vector<256x8xf32>
    %45 = vector.extract_strided_slice %38 {offsets = [48, 0, 0], sizes = [16, 16, 8], strides = [1, 1, 1]} : vector<64x16x8xf32> to vector<16x16x8xf32>
    %46 = vector.shape_cast %45 : vector<16x16x8xf32> to vector<256x8xf32>
    %47 = tpu.concatenate %40, %42, %44, %46 in 1 : vector<256x8xf32>, vector<256x8xf32>, vector<256x8xf32>, vector<256x8xf32> -> vector<256x32xf32>
    %48 = arith.truncf %47 : vector<256x32xf32> to vector<256x32xbf16>
    %c0_7 = arith.constant 0 : index
    %c0_8 = arith.constant 0 : index
    %49 = vector.load %arg4[%c0_7, %c0_8] : memref<32x32xbf16, #tpu.memory_space<vmem>>, vector<32x32xbf16>
    %cst_9 = arith.constant dense<0.000000e+00> : vector<256x32xf32>
    %50 = tpu.matmul %48, %49, %cst_9 {dimension_numbers = #tpu.dot_dimension_numbers<[1], [0], [0], [1], [0, 0, 1, 1], [], []>} : vector<256x32xbf16>, vector<32x32xbf16>, vector<256x32xf32> -> vector<256x32xf32>
    %c0_10 = arith.constant 0 : index
    %c0_11 = arith.constant 0 : index
    %51 = vector.load %arg5[%c0_10, %c0_11] : memref<1x32xf32, #tpu.memory_space<vmem>>, vector<1x32xf32>
    %52 = vector.broadcast %51 : vector<1x32xf32> to vector<256x32xf32>
    %53 = arith.addf %50, %52 : vector<256x32xf32>
    %c0_12 = arith.constant 0 : index
    %c0_13 = arith.constant 0 : index
    %54 = vector.load %arg6[%c0_12, %c0_13] : memref<256x32xf32, #tpu.memory_space<vmem>>, vector<256x32xf32>
    tpu.vector_store %arg6[%c0_12, %c0_13], %53 {strides = array<i32>} : memref<256x32xf32, #tpu.memory_space<vmem>>, vector<256x32xf32>,
    return
  }
  func.func @transform_0(%arg0: i32) -> (i32, i32) {
    %c0_i32 = arith.constant 0 : i32
    %c0_i32_0 = arith.constant 0 : i32
    return %arg0, %c0_i32 : i32, i32
  }
  func.func @transform_1(%arg0: i32) -> (i32, i32) {
    %c0_i32 = arith.constant 0 : i32
    %c0_i32_0 = arith.constant 0 : i32
    %c0_i32_1 = arith.constant 0 : i32
    return %c0_i32, %c0_i32_0 : i32, i32
  }
  func.func @transform_2(%arg0: i32) -> (i32, i32) {
    %c0_i32 = arith.constant 0 : i32
    %c0_i32_0 = arith.constant 0 : i32
    %c0_i32_1 = arith.constant 0 : i32
    return %c0_i32, %c0_i32_0 : i32, i32
  }
  func.func @transform_3(%arg0: i32) -> (i32, i32) {
    %c0_i32 = arith.constant 0 : i32
    %c0_i32_0 = arith.constant 0 : i32
    %c0_i32_1 = arith.constant 0 : i32
    return %c0_i32, %c0_i32_0 : i32, i32
  }
  func.func @transform_4(%arg0: i32) -> (i32, i32) {
    %c0_i32 = arith.constant 0 : i32
    %c0_i32_0 = arith.constant 0 : i32
    %c0_i32_1 = arith.constant 0 : i32
    return %c0_i32, %c0_i32_0 : i32, i32
  }
  func.func @transform_5(%arg0: i32) -> (i32, i32) {
    %c0_i32 = arith.constant 0 : i32
    %c0_i32_0 = arith.constant 0 : i32
    return %arg0, %c0_i32 : i32, i32
  }
}

</mosaic_0001>

<bundles_post_ra>
// kernel: tpu_custom_call.1
= control target key start
LH: loop header
LB: loop body
LE: loop exit
PB: predicated region body
PF: predicated region fallthrough
CT: control target
= control target key end

     0   :  { %s10970_s18 = smov 0   ;;  %s13293_s0 = inlined_call_operand.vmem [shape: bf16[1024,32], index: 0, kind: input, shape index: {}]   ;;  %s13294_s1 = inlined_call_operand.vmem [shape: bf16[32,96], index: 1, kind: input, shape index: {}]   ;;  %s13295_s2 = inlined_call_operand.vmem [shape: f32[1,96], index: 2, kind: input, shape index: {}]   ;;  %s13296_s3 = inlined_call_operand.vmem [shape: bf16[32,32], index: 3, kind: input, shape index: {}]   ;;  %s13297_s4 = inlined_call_operand.vmem [shape: f32[1,32], index: 4, kind: input, shape index: {}]   ;;  %s13298_s5 = inlined_call_operand.vmem [shape: f32[1024,32], index: 5, kind: output, shape index: {}]  }
   0x1 LB: > { %s9074_s19 = sadd.s32 4294967295, %s10928_s18   ;;  %p9078_p0 = scmp.ge.s32.totalorder %s10928_s18, 1  ;;  %s10928_s18 = sphi %s10970_s18, %s15_s18  }
   0x2   : > { %p188_p1 = scmp.lt.s32.totalorder %s10928_s18, 5 }
   0x4   : > { %p189_p2 = pnand %p9078_p0, %p188_p1 }
   0x6   : > { %192 = sbr.rel (%p189_p2) target bundleno = 2730 (0xaaa), region = 40 }
   0xd   : > { %v10902_v0 = vld [vmem:[%s13294_s1] sm:$0xff]   ;;  %s9079_s22 = sshll.u32 %s9074_s19, 5  ;;  %v10903_v1 = vld [vmem:[%s13294_s1 + $0x8] sm:$0xff]   ;;  %vm364_vm0 = vcmask 261120   ;;  %v13299_v21 = vmov 0.0   ;;  %s10931_s6 = smov 112  }
   0xe   : > { %p217_p3 = scmp.lt.s32.totalorder %s9079_s22, 127  ;;  %9559 = vmatprep.subr.bf16.mxu0 %v10902_v0  ;;  %v11027_v19 = vld [vmem:[%s13295_s2] ss:$0 sm:$0xff]  ;;  %9601 = vmatprep.subr.bf16.mxu1 %v13299_v21  ;;  %s10932_s7 = smov 120   ;;  %vm10936_vm1 = vmmov 0   ;;  %vm981_vm2 = vcmask 130048  }
   0xf   : > { %9560 = vmatpush3.bf16.msra.mxu0 %v10902_v0  ;;  %s10933_s8 = smov 104   ;;  %s10934_s9 = smov 64   ;;  %9603 = vmatprep.mubr.msk.bf16.mxu1 %vm10936_vm1, %v13299_v21  ;;  %vm5251_vm3 = vcmask 1043456   ;;  %vm5247_vm4 = vcmask 64512   ;;  %vm8705_vm5 = vcmask 195584  }
  0x10   : > { %s13490_s22 = smov (!%p217_p3, %s9079_s22), 127  ;;  %9561 = vmatprep.subr.bf16.mxu0 %v10903_v1  ;;  %s10935_s10 = smov 96  }
  0x11   : > { %s9080_s25 = sshll.u32 %s13490_s22, 2  ;;  %s10937_s11 = smov 8  }
  0x12   : > { %s10990_s28 = scalar_lea.vmem %s13293_s0, %s9080_s25  ;;  %s10938_s12 = smov 16  }
  0x13   : > { %9562 = vmatpush3.bf16.msra.mxu0 %v10903_v1  ;;  %v10904_v2 = vld [vmem:[%s10990_s28] sm:$0xff]   ;;  %v10905_v3 = vld [vmem:[%s10990_s28 + $0x8] sm:$0xff]   ;;  %v10906_v4 = vld [vmem:[%s10990_s28 + $0x10] sm:$0xff]   ;;  %s10939_s17 = smov 24   ;;  %s9082_s19 = sshll.u32 %s13490_s22, 3 }
  0x14   : > { %9563 = vmatprep.mubr.msk.bf16.mxu0 %vm364_vm0, %v10904_v2  ;;  %v10907_v5 = vld [vmem:[%s10990_s28 + $0x18] sm:$0xff]   ;;  %v10908_v6 = vld [vmem:[%s10990_s28 + $0x20] sm:$0xff]   ;;  %v10909_v7 = vld [vmem:[%s10990_s28 + $0x28] sm:$0xff]   ;;  %9595 = vmatprep.subr.bf16.mxu0 %v13299_v21  ;;  %s13192_s25 = scalar_lea.vmem %s13298_s5, %s9082_s19 }
  0x15   : > { %v10910_v8 = vld [vmem:[%s10990_s28 + $0x30] sm:$0xff]   ;;  %v10911_v9 = vld [vmem:[%s10990_s28 + $0x38] sm:$0xff]   ;;  %v10912_v10 = vld [vmem:[%s10990_s28 + $0x40] sm:$0xff]  }
  0x16   : > { %9564 = vmatmul.mubr.msk.bf16.vlgmr.msra.gmra.mrb[0].mxu0 %vm364_vm0, %v10905_v3  ;;  %v10913_v11 = vld [vmem:[%s10990_s28 + $0x48] sm:$0xff]   ;;  %v10914_v12 = vld [vmem:[%s10990_s28 + $0x50] sm:$0xff]   ;;  %v10915_v13 = vld [vmem:[%s10990_s28 + $0x58] sm:$0xff]  }
  0x17   : > { %9567 = vmatprep.mubr.msk.bf16.mxu0 %vm364_vm0, %v10906_v4  ;;  %v10916_v14 = vld [vmem:[%s10990_s28 + $0x60] sm:$0xff]   ;;  %v10917_v15 = vld [vmem:[%s10990_s28 + $0x68] sm:$0xff]   ;;  %v10918_v16 = vld [vmem:[%s10990_s28 + $0x70] sm:$0xff]  }
  0x18   : > { %v10919_v17 = vld [vmem:[%s10990_s28 + $0x78] sm:$0xff]  }
  0x1e   : > { %9568 = vmatmul.mubr.msk.bf16.gmra.mrb[4].mxu0 %vm364_vm0, %v10907_v5 }
  0x1f   : > { %9571 = vmatprep.mubr.msk.bf16.mxu0 %vm364_vm0, %v10908_v6 }
  0x26   : > { %9572 = vmatmul.mubr.msk.bf16.gmra.mrb[8].mxu0 %vm364_vm0, %v10909_v7 }
  0x27   : > { %9575 = vmatprep.mubr.msk.bf16.mxu0 %vm364_vm0, %v10910_v8 }
  0x2e   : > { %9576 = vmatmul.mubr.msk.bf16.gmra.mrb[12].mxu0 %vm364_vm0, %v10911_v9 }
  0x2f   : > { %9579 = vmatprep.mubr.msk.bf16.mxu0 %vm364_vm0, %v10912_v10 }
  0x36   : > { %9580 = vmatmul.mubr.msk.bf16.gmra.mrb[16].mxu0 %vm364_vm0, %v10913_v11 }
  0x37   : > { %9583 = vmatprep.mubr.msk.bf16.mxu0 %vm364_vm0, %v10914_v12 }
  0x3e   : > { %9584 = vmatmul.mubr.msk.bf16.gmra.mrb[20].mxu0 %vm364_vm0, %v10915_v13 }
  0x3f   : > { %9587 = vmatprep.mubr.msk.bf16.mxu0 %vm364_vm0, %v10916_v14 }
  0x46   : > { %9588 = vmatmul.mubr.msk.bf16.gmra.mrb[24].mxu0 %vm364_vm0, %v10917_v15 }
  0x47   : > { %9591 = vmatprep.mubr.msk.bf16.mxu0 %vm364_vm0, %v10918_v16 }
  0x4e   : > { %9592 = vmatmul.mubr.msk.bf16.gmra.mrb[28].mxu0 %vm364_vm0, %v10919_v17 }
  0x4f   : > { %9597 = vmatprep.mubr.msk.bf16.mxu0 %vm10936_vm1, %v13299_v21 }
  0xe9   : > { %v9565_v18 = vpop.f32.mrb[0].mxu0 }
  0xea   : > { %v447_v20 = vpop.f32.mrb[1].mxu0  ;;  %v456_v23 = vadd.f32 %v9565_v18, %v11027_v19 }
  0xeb   : > { %v9566_v22 = vpop.f32.mrb[2].mxu0  ;;  %v448_v26 = vadd.f32 %v11027_v19, %v447_v20 }
  0xec   : > { %v459_v24 = vadd.f32 %v9566_v22, %v11027_v19  ;;  %v450_v25 = vpop.f32.mrb[3].mxu0 }
  0xed   : > { %v451_v27 = vadd.f32 %v11027_v19, %v450_v25 }
  0xee   : > { %v10427_v28 = vpack.i.bf16 %v459_v24, %v456_v23  ;;  %v11035_v29 = vpack.c.bf16 %v459_v24, %v456_v23 }
  0xef   : > { %v10437_v30 = vpack.i.bf16 %v451_v27, %v448_v26  ;;  %v11037_v31 = vpack.c.bf16 %v451_v27, %v448_v26 }
  0xf0   : > { %13356 = vst [vmem:[#allocation2_spill] sm:$0xff] %v11035_v29  ;;  %10428 = vrot.lane.b32.xlu1 %v10427_v28, %s10931_s6  ;;  %10423 = vrot.lane.b32.xlu0 %v10427_v28, %s10932_s7 }
  0xf1   : > { %13357 = vst [vmem:[#allocation3_spill] sm:$0xff] %v11037_v31  ;;  %v9569_v32 = vpop.f32.mrb[4].mxu0 }
  0xf2   : > { %v472_v33 = vadd.f32 %v9569_v32, %v11027_v19  ;;  %v463_v34 = vpop.f32.mrb[5].mxu0 }
  0xf3   : > { %v464_v35 = vadd.f32 %v11027_v19, %v463_v34  ;;  %v9570_v36 = vpop.f32.mrb[6].mxu0 }
  0xf4   : > { %10433 = vrot.lane.b32.xlu1 %v10427_v28, %s10933_s8  ;;  %v475_v37 = vadd.f32 %v9570_v36, %v11027_v19  ;;  %10438 = vrot.lane.b32.xlu0 %v10437_v30, %s10932_s7  ;;  %v466_v38 = vpop.f32.mrb[7].mxu0 }
  0xf5   : > { %v467_v39 = vadd.f32 %v11027_v19, %v466_v38 }
  0xf6   : > { %v10452_v40 = vpack.i.bf16 %v475_v37, %v472_v33  ;;  %v11047_v41 = vpack.c.bf16 %v475_v37, %v472_v33 }
  0xf7   : > { %v10467_v42 = vpack.i.bf16 %v467_v39, %v464_v35  ;;  %v11049_v43 = vpack.c.bf16 %v467_v39, %v464_v35 }
  0xf8   : > { %13358 = vst [vmem:[#allocation4_spill] sm:$0xff] %v11047_v41  ;;  %1045 = vrot.lane.b32.xlu1 %v11035_v29, %s10934_s9  ;;  %10443 = vrot.lane.b32.xlu0 %v10437_v30, %s10931_s6 }
  0xf9   : > { %13359 = vst [vmem:[#allocation5_spill] sm:$0xff] %v11049_v43  ;;  %v9573_v44 = vpop.f32.mrb[8].mxu0 }
  0xfa   : > { %v488_v45 = vadd.f32 %v9573_v44, %v11027_v19  ;;  %v479_v46 = vpop.f32.mrb[9].mxu0 }
  0xfb   : > { %v480_v47 = vadd.f32 %v11027_v19, %v479_v46  ;;  %v9574_v48 = vpop.f32.mrb[10].mxu0 }
  0xfc   : > { %10453 = vrot.lane.b32.xlu1 %v10452_v40, %s10932_s7  ;;  %10448 = vrot.lane.b32.xlu0 %v10437_v30, %s10933_s8  ;;  %v491_v49 = vadd.f32 %v9574_v48, %v11027_v19  ;;  %v482_v50 = vpop.f32.mrb[11].mxu0 }
  0xfd   : > { %v483_v51 = vadd.f32 %v11027_v19, %v482_v50 }
  0xfe   : > { %v10482_v52 = vpack.i.bf16 %v491_v49, %v488_v45  ;;  %v11060_v53 = vpack.c.bf16 %v491_v49, %v488_v45 }
  0xff   : > { %v11062_v54 = vpack.i.bf16 %v483_v51, %v480_v47  ;;  %v11064_v55 = vpack.c.bf16 %v483_v51, %v480_v47 }
 0x100   : > { %13360 = vst [vmem:[#allocation6_spill] sm:$0xff] %v11060_v53  ;;  %10458 = vrot.lane.b32.xlu1 %v10452_v40, %s10931_s6  ;;  %1026 = vrot.lane.b32.xlu0 %v11035_v29, %s10935_s10 }
 0x101   : > { %13361 = vst [vmem:[#allocation7_spill] sm:$0xff] %v11064_v55  ;;  %v9577_v56 = vpop.f32.mrb[12].mxu0 }
 0x102   : > { %v504_v57 = vadd.f32 %v9577_v56, %v11027_v19  ;;  %v495_v58 = vpop.f32.mrb[13].mxu0 }
 0x103   : > { %v496_v59 = vadd.f32 %v11027_v19, %v495_v58  ;;  %v9578_v60 = vpop.f32.mrb[14].mxu0 }
 0x104   : > { %10463 = vrot.lane.b32.xlu1 %v10452_v40, %s10933_s8  ;;  %959 = vrot.lane.b32.xlu0 %v11037_v31, %s10935_s10  ;;  %v507_v61 = vadd.f32 %v9578_v60, %v11027_v19  ;;  %v498_v62 = vpop.f32.mrb[15].mxu0 }
 0x105   : > { %v499_v63 = vadd.f32 %v11027_v19, %v498_v62 }
 0x106   : > { %v11076_v0 = vpack.i.bf16 %v507_v61, %v504_v57  ;;  %v11078_v1 = vpack.c.bf16 %v507_v61, %v504_v57 }
 0x107   : > { %v11080_v2 = vpack.i.bf16 %v499_v63, %v496_v59  ;;  %v11082_v3 = vpack.c.bf16 %v499_v63, %v496_v59 }
 0x108   : > { %13362 = vst [vmem:[#allocation8_spill] sm:$0xff] %v11078_v1  ;;  %10468 = vrot.lane.b32.xlu1 %v10467_v42, %s10932_s7  ;;  %978 = vrot.lane.b32.xlu0 %v11037_v31, %s10934_s9 }
 0x109   : > { %13363 = vst [vmem:[#allocation9_spill] sm:$0xff] %v11082_v3  ;;  %v9581_v4 = vpop.f32.mrb[16].mxu0 }
 0x10a   : > { %v520_v5 = vadd.f32 %v9581_v4, %v11027_v19  ;;  %v511_v6 = vpop.f32.mrb[17].mxu0 }
 0x10b   : > { %v512_v7 = vadd.f32 %v11027_v19, %v511_v6  ;;  %v9582_v8 = vpop.f32.mrb[18].mxu0 }
 0x10c   : > { %1092 = vrot.lane.b32.xlu1 %v11049_v43, %s10935_s10  ;;  %10473 = vrot.lane.b32.xlu0 %v10467_v42, %s10931_s6  ;;  %v523_v9 = vadd.f32 %v9582_v8, %v11027_v19  ;;  %v514_v10 = vpop.f32.mrb[19].mxu0 }
 0x10d   : > { %v515_v11 = vadd.f32 %v11027_v19, %v514_v10 }
 0x10e   : > { %v11094_v12 = vpack.i.bf16 %v523_v9, %v520_v5  ;;  %v11096_v13 = vpack.c.bf16 %v523_v9, %v520_v5 }
 0x10f   : > { %v11098_v14 = vpack.i.bf16 %v515_v11, %v512_v7  ;;  %v11100_v15 = vpack.c.bf16 %v515_v11, %v512_v7 }
 0x110   : > { %13364 = vst [vmem:[#allocation10_spill] sm:$0xff] %v11096_v13  ;;  %1111 = vrot.lane.b32.xlu1 %v11049_v43, %s10934_s9  ;;  %10478 = vrot.lane.b32.xlu0 %v10467_v42, %s10933_s8 }
 0x111   : > { %13365 = vst [vmem:[#allocation11_spill] sm:$0xff] %v11100_v15  ;;  %v9585_v16 = vpop.f32.mrb[20].mxu0 }
 0x112   : > { %v536_v17 = vadd.f32 %v9585_v16, %v11027_v19  ;;  %v527_v18 = vpop.f32.mrb[21].mxu0 }
 0x113   : > { %v528_v20 = vadd.f32 %v11027_v19, %v527_v18  ;;  %v9586_v22 = vpop.f32.mrb[22].mxu0 }
 0x114   : > { %10483 = vrot.lane.b32.xlu1 %v10482_v52, %s10932_s7  ;;  %1158 = vrot.lane.b32.xlu0 %v11047_v41, %s10935_s10  ;;  %v539_v23 = vadd.f32 %v9586_v22, %v11027_v19  ;;  %v530_v24 = vpop.f32.mrb[23].mxu0 }
 0x115   : > { %v531_v25 = vadd.f32 %v11027_v19, %v530_v24 }
 0x116   : > { %v10572_v26 = vpack.i.bf16 %v539_v23, %v536_v17  ;;  %v11112_v27 = vpack.c.bf16 %v539_v23, %v536_v17 }
 0x117   : > { %v10587_v28 = vpack.i.bf16 %v531_v25, %v528_v20  ;;  %v11114_v30 = vpack.c.bf16 %v531_v25, %v528_v20 }
 0x118   : > { %13366 = vst [vmem:[#allocation12_spill] sm:$0xff] %v11112_v27  ;;  %10488 = vrot.lane.b32.xlu1 %v10482_v52, %s10931_s6  ;;  %1177 = vrot.lane.b32.xlu0 %v11047_v41, %s10934_s9 }
 0x119   : > { %13367 = vst [vmem:[#allocation13_spill] sm:$0xff] %v11114_v30  ;;  %v9589_v32 = vpop.f32.mrb[24].mxu0 }
 0x11a   : > { %v552_v33 = vadd.f32 %v9589_v32, %v11027_v19  ;;  %v543_v34 = vpop.f32.mrb[25].mxu0 }
 0x11b   : > { %v544_v35 = vadd.f32 %v11027_v19, %v543_v34  ;;  %v9590_v36 = vpop.f32.mrb[26].mxu0 }
 0x11c   : > { %10493 = vrot.lane.b32.xlu1 %v10482_v52, %s10933_s8  ;;  %10498 = vrot.lane.b32.xlu0 %v11062_v54, %s10932_s7  ;;  %v555_v37 = vadd.f32 %v9590_v36, %v11027_v19  ;;  %v546_v38 = vpop.f32.mrb[27].mxu0 }
 0x11d   : > { %v547_v39 = vadd.f32 %v11027_v19, %v546_v38 }
 0x11e   : > { %v10602_v40 = vpack.i.bf16 %v555_v37, %v552_v33  ;;  %v11126_v42 = vpack.c.bf16 %v555_v37, %v552_v33 }
 0x11f   : > { %v11128_v44 = vpack.i.bf16 %v547_v39, %v544_v35  ;;  %v11130_v45 = vpack.c.bf16 %v547_v39, %v544_v35 }
 0x120   : > { %13368 = vst [vmem:[#allocation14_spill] sm:$0xff] %v11126_v42  ;;  %1290 = vrot.lane.b32.xlu1 %v11060_v53, %s10935_s10  ;;  %10503 = vrot.lane.b32.xlu0 %v11062_v54, %s10931_s6 }
 0x121   : > { %13369 = vst [vmem:[#allocation15_spill] sm:$0xff] %v11130_v45  ;;  %v9593_v46 = vpop.f32.mrb[28].mxu0 }
 0x122   : > { %v568_v47 = vadd.f32 %v9593_v46, %v11027_v19  ;;  %v559_v48 = vpop.f32.mrb[29].mxu0 }
 0x123   : > { %v560_v49 = vadd.f32 %v11027_v19, %v559_v48  ;;  %v9594_v50 = vpop.f32.mrb[30].mxu0 }
 0x124   : > { %1243 = vrot.lane.b32.xlu1 %v11064_v55, %s10934_s9  ;;  %10508 = vrot.lane.b32.xlu0 %v11062_v54, %s10933_s8  ;;  %v571_v51 = vadd.f32 %v9594_v50, %v11027_v19  ;;  %v562_v52 = vpop.f32.mrb[31].mxu0 }
 0x125   : > { %v563_v56 = vadd.f32 %v11027_v19, %v562_v52 }
 0x126   : > { %v11144_v57 = vpack.i.bf16 %v571_v51, %v568_v47  ;;  %v11146_v58 = vpack.c.bf16 %v571_v51, %v568_v47 }
 0x127   : > { %v11148_v59 = vpack.i.bf16 %v563_v56, %v560_v49  ;;  %v11150_v60 = vpack.c.bf16 %v563_v56, %v560_v49 }
 0x128   : > { %13370 = vst [vmem:[#allocation16_spill] sm:$0xff] %v11146_v58  ;;  %10513 = vrot.lane.b32.xlu1 %v11076_v0, %s10932_s7  ;;  %1309 = vrot.lane.b32.xlu0 %v11060_v53, %s10934_s9 }
 0x129   : > { %13371 = vst [vmem:[#allocation17_spill] sm:$0xff] %v11150_v60 }
 0x12c   : > { %10518 = vrot.lane.b32.xlu1 %v11076_v0, %s10931_s6  ;;  %1224 = vrot.lane.b32.xlu0 %v11064_v55, %s10935_s10 }
 0x130   : > { %10523 = vrot.lane.b32.xlu1 %v11076_v0, %s10933_s8  ;;  %10528 = vrot.lane.b32.xlu0 %v11080_v2, %s10932_s7 }
 0x134   : > { %1422 = vrot.lane.b32.xlu1 %v11078_v1, %s10935_s10  ;;  %10533 = vrot.lane.b32.xlu0 %v11080_v2, %s10931_s6 }
 0x138   : > { %1375 = vrot.lane.b32.xlu1 %v11082_v3, %s10934_s9  ;;  %10538 = vrot.lane.b32.xlu0 %v11080_v2, %s10933_s8 }
 0x13c   : > { %10543 = vrot.lane.b32.xlu1 %v11094_v12, %s10932_s7  ;;  %1441 = vrot.lane.b32.xlu0 %v11078_v1, %s10934_s9 }
 0x140   : > { %10548 = vrot.lane.b32.xlu1 %v11094_v12, %s10931_s6  ;;  %1356 = vrot.lane.b32.xlu0 %v11082_v3, %s10935_s10 }
 0x144   : > { %10553 = vrot.lane.b32.xlu1 %v11094_v12, %s10933_s8  ;;  %10558 = vrot.lane.b32.xlu0 %v11098_v14, %s10932_s7 }
 0x148   : > { %1554 = vrot.lane.b32.xlu1 %v11096_v13, %s10935_s10  ;;  %10563 = vrot.lane.b32.xlu0 %v11098_v14, %s10931_s6 }
 0x14c   : > { %1507 = vrot.lane.b32.xlu1 %v11100_v15, %s10934_s9  ;;  %10568 = vrot.lane.b32.xlu0 %v11098_v14, %s10933_s8 }
 0x150   : > { %10573 = vrot.lane.b32.xlu1 %v10572_v26, %s10932_s7  ;;  %1573 = vrot.lane.b32.xlu0 %v11096_v13, %s10934_s9 }
 0x154   : > { %10578 = vrot.lane.b32.xlu1 %v10572_v26, %s10931_s6  ;;  %1488 = vrot.lane.b32.xlu0 %v11100_v15, %s10935_s10 }
 0x158   : > { %10583 = vrot.lane.b32.xlu1 %v10572_v26, %s10933_s8  ;;  %10588 = vrot.lane.b32.xlu0 %v10587_v28, %s10932_s7 }
 0x15c   : > { %1686 = vrot.lane.b32.xlu1 %v11112_v27, %s10935_s10  ;;  %10593 = vrot.lane.b32.xlu0 %v10587_v28, %s10931_s6 }
 0x160   : > { %1639 = vrot.lane.b32.xlu1 %v11114_v30, %s10934_s9  ;;  %10598 = vrot.lane.b32.xlu0 %v10587_v28, %s10933_s8 }
 0x162   : > { %v11206_v19 = vpop.permute.xlu1 %10428  ;;  %v11208_v54 = vpop.permute.xlu0 %10423 }
 0x163   : > { %v10426_v28 = vunpack.i.h.bf16 %v11208_v54  ;;  %v10425_v32 = vunpack.i.l.bf16 %v11208_v54 }
 0x164   : > { %10603 = vrot.lane.b32.xlu1 %v10602_v40, %s10932_s7  ;;  %1705 = vrot.lane.b32.xlu0 %v11112_v27, %s10934_s9 }
 0x166   : > { %v11213_v61 = vpop.permute.xlu1 %10433  ;;  %v10439_v62 = vpop.permute.xlu0 %10438 }
 0x167   : > { %v10441_v23 = vunpack.i.h.bf16 %v10439_v62  ;;  %v10440_v24 = vunpack.i.l.bf16 %v10439_v62 }
 0x168   : > { %10608 = vrot.lane.b32.xlu1 %v10602_v40, %s10931_s6  ;;  %1620 = vrot.lane.b32.xlu0 %v11114_v30, %s10935_s10 }
 0x169   : > { %v11285_v35 = vpack.c.bf16 %v10441_v23, %v10440_v24 }
 0x16a   : > { %v1046_v63 = vpop.permute.xlu1 %1045  ;;  %v11218_v0 = vpop.permute.xlu0 %10443 }
 0x16b   : > { %9602 = vmatpush3.bf16.msra.mxu1 %v1046_v63  ;;  %13374 = vst [vmem:[#allocation20_spill] sm:$0xff] %v11285_v35 }
 0x16c   : > { %10613 = vrot.lane.b32.xlu1 %v10602_v40, %s10933_s8  ;;  %10618 = vrot.lane.b32.xlu0 %v11128_v44, %s10932_s7  ;;  %v11293_v40 = vpack.c.bf16 %v10426_v28, %v10425_v32 }
 0x16d   : > { %9607 = vmatprep.subr.bf16.mxu1 %v13299_v21 }
 0x16e   : > { %v10454_v2 = vpop.permute.xlu1 %10453  ;;  %v11224_v4 = vpop.permute.xlu0 %10448  ;;  %13376 = vst [vmem:[#allocation22_spill] sm:$0xff] %v11293_v40 }
 0x16f   : > { %13372 = vst [vmem:[#allocation18_spill] sm:$0xff] %v11224_v4  ;;  %v10455_v46 = vunpack.i.l.bf16 %v10454_v2 }
 0x170   : > { %1818 = vrot.lane.b32.xlu1 %v11126_v42, %s10935_s10  ;;  %10623 = vrot.lane.b32.xlu0 %v11128_v44, %s10931_s6 }
 0x172   : > { %v11230_v5 = vpop.permute.xlu1 %10458  ;;  %v11232_v6 = vpop.permute.xlu0 %1026 }
 0x174   : > { %1771 = vrot.lane.b32.xlu1 %v11130_v45, %s10934_s9  ;;  %10628 = vrot.lane.b32.xlu0 %v11128_v44, %s10933_s8  ;;  %v10456_v44 = vunpack.i.h.bf16 %v10454_v2 }
 0x176   : > { %v11238_v7 = vpop.permute.xlu1 %10463  ;;  %v960_v8 = vpop.permute.xlu0 %959 }
 0x178   : > { %10633 = vrot.lane.b32.xlu1 %v11144_v57, %s10932_s7  ;;  %1837 = vrot.lane.b32.xlu0 %v11126_v42, %s10934_s9 }
 0x17a   : > { %v10469_v9 = vpop.permute.xlu1 %10468  ;;  %v979_v10 = vpop.permute.xlu0 %978 }
 0x17b   : > { %9596 = vmatpush3.bf16.msra.mxu0 %v979_v10  ;;  %v10471_v36 = vunpack.i.h.bf16 %v10469_v9  ;;  %v10470_v37 = vunpack.i.l.bf16 %v10469_v9 }
 0x17c   : > { %10638 = vrot.lane.b32.xlu1 %v11144_v57, %s10931_s6  ;;  %1752 = vrot.lane.b32.xlu0 %v11130_v45, %s10935_s10 }
 0x17d   : > { %9649 = vmatprep.subr.bf16.mxu0 %v13299_v21  ;;  %v11301_v49 = vpack.c.bf16 %v10471_v36, %v10470_v37 }
 0x17e   : > { %v11249_v11 = vpop.permute.xlu1 %1092  ;;  %v11251_v12 = vpop.permute.xlu0 %10473 }
 0x17f   : > { %13377 = vst [vmem:[#allocation23_spill] sm:$0xff] %v11301_v49 }
 0x180   : > { %10643 = vrot.lane.b32.xlu1 %v11144_v57, %s10933_s8  ;;  %10648 = vrot.lane.b32.xlu0 %v11148_v59, %s10932_s7  ;;  %v11307_v57 = vpack.c.bf16 %v10456_v44, %v10455_v46 }
 0x182   : > { %v11257_v14 = vpop.permute.xlu1 %1111  ;;  %v11259_v16 = vpop.permute.xlu0 %10478  ;;  %13378 = vst [vmem:[#allocation24_spill] sm:$0xff] %v11307_v57 }
 0x183   : > { %13373 = vst [vmem:[#allocation19_spill] sm:$0xff] %v11259_v16 }
 0x184   : > { %10653 = vrot.lane.b32.xlu0 %v11148_v59, %s10931_s6 }
 0x186   : > { %v11263_v17 = vpop.permute.xlu1 %10483  ;;  %v1159_v18 = vpop.permute.xlu0 %1158 }
 0x188   : > { %10658 = vrot.lane.b32.xlu0 %v11148_v59, %s10933_s8 }
 0x18a   : > { %v11271_v20 = vpop.permute.xlu1 %10488  ;;  %v11273_v22 = vpop.permute.xlu0 %1177 }
 0x18c   : > { %1884 = vrot.lane.b32.xlu0 %v11150_v60, %s10935_s10 }
 0x18e   : > { %v11277_v25 = vpop.permute.xlu1 %10493  ;;  %v10499_v26 = vpop.permute.xlu0 %10498 }
 0x18f   : > { %v10501_v50 = vunpack.i.h.bf16 %v10499_v26  ;;  %v10500_v51 = vunpack.i.l.bf16 %v10499_v26 }
 0x190   : > { %1969 = vrot.lane.b32.xlu0 %v11146_v58, %s10934_s9 }
 0x191   : > { %v11315_v62 = vpack.c.bf16 %v10501_v50, %v10500_v51 }
 0x192   : > { %v1291_v33 = vpop.permute.xlu1 %1290  ;;  %v11283_v34 = vpop.permute.xlu0 %10503 }
 0x193   : > { %13379 = vst [vmem:[#allocation25_spill] sm:$0xff] %v11315_v62 }
 0x194   : > { %2016 = vrot.lane.b32.xlu0 %v11285_v35, %s10935_s10 }
 0x196   : > { %v11289_v38 = vpop.permute.xlu1 %1243  ;;  %v11291_v39 = vpop.permute.xlu0 %10508 }
 0x197   : > { %13375 = vst [vmem:[#allocation21_spill] sm:$0xff] %v11291_v39 }
 0x198   : > { %2101 = vrot.lane.b32.xlu0 %v11293_v40, %s10934_s9 }
 0x19a   : > { %v11297_v47 = vpop.permute.xlu1 %10513  ;;  %v11299_v48 = vpop.permute.xlu0 %1309 }
 0x19b   : > { %v10516_v16 = vunpack.i.h.bf16 %v11297_v47 }
 0x19c   : > { %2148 = vrot.lane.b32.xlu0 %v11301_v49, %s10935_s10 }
 0x19e   : > { %v11305_v52 = vpop.permute.xlu1 %10518  ;;  %v1225_v56 = vpop.permute.xlu0 %1224 }
 0x1a0   : > { %2233 = vrot.lane.b32.xlu0 %v11307_v57, %s10934_s9 }
 0x1a2   : > { %v11311_v59 = vpop.permute.xlu1 %10523  ;;  %v11313_v54 = vpop.permute.xlu0 %10528 }
 0x1a3   : > { %962 = vxpose.xlu1.c.b16.start.end [1/1] (short) (narrow) %v960_v8, 16  ;;  %v10530_v39 = vunpack.i.l.bf16 %v11313_v54 }
 0x1a4   : > { %2280 = vrot.lane.b32.xlu0 %v11315_v62, %s10935_s10 }
 0x1a6   : > { %v1423_v63 = vpop.permute.xlu1 %1422  ;;  %v11319_v2 = vpop.permute.xlu0 %10533 }
 0x1a7   : > { %1161 = vxpose.xlu1.c.b16.start.end [1/1] (short) (narrow) %v1159_v18, 16 }
 0x1aa   : > { %v11321_v9 = vpop.permute.xlu1 %1375  ;;  %v11323_v10 = vpop.permute.xlu0 %10538 }
 0x1ab   : > { %13380 = vst [vmem:[#allocation26_spill] sm:$0xff] %v11323_v10  ;;  %1293 = vxpose.xlu1.c.b16.start.end [1/1] (short) (narrow) %v1291_v33, 16  ;;  %v10531_v10 = vunpack.i.h.bf16 %v11313_v54 }
 0x1ad   : > { %v11413_v4 = vpack.c.bf16 %v10531_v10, %v10530_v39 }
 0x1ae   : > { %v11325_v23 = vpop.permute.xlu1 %10543  ;;  %v11327_v24 = vpop.permute.xlu0 %1441 }
 0x1af   : > { %1425 = vxpose.xlu1.c.b16.start.end [1/1] (short) (narrow) %v1423_v63, 16  ;;  %13390 = vst [vmem:[#allocation35_spill] sm:$0xff] %v11413_v4 }
 0x1b2   : > { %v11329_v26 = vpop.permute.xlu1 %10548  ;;  %v1357_v8 = vpop.permute.xlu0 %1356 }
 0x1b6   : > { %v11331_v28 = vpop.permute.xlu1 %10553  ;;  %v11333_v32 = vpop.permute.xlu0 %10558 }
 0x1b7   : > { %v10561_v54 = vunpack.i.h.bf16 %v11333_v32 }
 0x1ba   : > { %v1555_v36 = vpop.permute.xlu1 %1554  ;;  %v11335_v37 = vpop.permute.xlu0 %10563 }
 0x1bb   : > { %1557 = vxpose.xlu1.c.b16.start.end [1/1] (short) (narrow) %v1555_v36, 16 }
 0x1be   : > { %v11337_v18 = vpop.permute.xlu1 %1507  ;;  %v11339_v44 = vpop.permute.xlu0 %10568 }
 0x1bf   : > { %13381 = vst [vmem:[#allocation27_spill] sm:$0xff] %v11339_v44 }
 0x1c2   : > { %v11341_v33 = vpop.permute.xlu1 %10573  ;;  %v1574_v46 = vpop.permute.xlu0 %1573  ;;  %1029 = vxpose.xlu0.c.b16.start.end [1/1] (short) (narrow) %v11232_v6, 16 }
 0x1c6   : > { %v11344_v50 = vpop.permute.xlu1 %10578  ;;  %v1489_v51 = vpop.permute.xlu0 %1488  ;;  %1095 = vxpose.xlu0.c.b16.start.end [1/1] (short) (narrow) %v11249_v11, 16 }
 0x1ca   : > { %v11347_v63 = vpop.permute.xlu1 %10583  ;;  %v11349_v21 = vpop.permute.xlu0 %10588  ;;  %1227 = vxpose.xlu0.c.b16.start.end [1/1] (short) (narrow) %v1225_v56, 16 }
 0x1cb   : > { %13382 = vst [vmem:[#allocation28_spill] sm:$0xff] %v11347_v63  ;;  %v10486_v63 = vunpack.i.h.bf16 %v11263_v17 }
 0x1ce   : > { %v1687_v36 = vpop.permute.xlu1 %1686  ;;  %v11351_v42 = vpop.permute.xlu0 %10593  ;;  %1359 = vxpose.xlu0.c.b16.start.end [1/1] (short) (narrow) %v1357_v8, 16 }
 0x1cf   : > { %1689 = vxpose.xlu1.c.b16.start.end [1/1] (short) (narrow) %v1687_v36, 16 }
 0x1d2   : > { %v11353_v45 = vpop.permute.xlu1 %1639  ;;  %v11355_v27 = vpop.permute.xlu0 %10598  ;;  %1491 = vxpose.xlu0.c.b16.start.end [1/1] (short) (narrow) %v1489_v51, 16 }
 0x1d3   : > { %13383 = vst [vmem:[#allocation29_spill] sm:$0xff] %v11355_v27  ;;  %v13388_v27 = vmov 0.0  }
 0x1d6   : > { %v11357_v6 = vpop.permute.xlu1 %10603  ;;  %v1706_v30 = vpop.permute.xlu0 %1705 }
 0x1da   : > { %v11359_v13 = vpop.permute.xlu1 %10608  ;;  %v1621_v11 = vpop.permute.xlu0 %1620 }
 0x1db   : > { %1623 = vxpose.xlu0.c.b16.start.end [1/1] (short) (narrow) %v1621_v11, 16 }
 0x1de   : > { %v11361_v15 = vpop.permute.xlu1 %10613  ;;  %v11363_v56 = vpop.permute.xlu0 %10618 }
 0x1df   : > { %13384 = vst [vmem:[#allocation30_spill] sm:$0xff] %v11361_v15 }
 0x1e2   : > { %v1819_v1 = vpop.permute.xlu1 %1818  ;;  %v11365_v3 = vpop.permute.xlu0 %10623 }
 0x1e3   : > { %1821 = vxpose.xlu1.c.b16.start.end [1/1] (short) (narrow) %v1819_v1, 16 }
 0x1e6   : > { %v11367_v8 = vpop.permute.xlu0 %10628  ;;  %v11377_v53 = vpop.permute.xlu1 %1771 }
 0x1e7   : > { %13385 = vst [vmem:[#allocation31_spill] sm:$0xff] %v11367_v8  ;;  %1903 = vrot.lane.b32.xlu1 %v11150_v60, %s10934_s9 }
 0x1ea   : > { %v11371_v51 = vpop.permute.xlu0 %1837  ;;  %v11381_v41 = vpop.permute.xlu1 %10633 }
 0x1eb   : > { %1950 = vrot.lane.b32.xlu1 %v11146_v58, %s10935_s10 }
 0x1ee   : > { %v1753_v36 = vpop.permute.xlu0 %1752  ;;  %v11385_v43 = vpop.permute.xlu1 %10638 }
 0x1ef   : > { %1755 = vxpose.xlu0.c.b16.start.end [1/1] (short) (narrow) %v1753_v36, 16 }
 0x1f2   : > { %v11375_v11 = vpop.permute.xlu0 %10648  ;;  %v11389_v31 = vpop.permute.xlu1 %10643 }
 0x1f3   : > { %13387 = vst [vmem:[#allocation33_spill] sm:$0xff] %v11389_v31 }
 0x1f6   : > { %v11379_v55 = vpop.permute.xlu0 %10653 }
 0x1fa   : > { %v11383_v1 = vpop.permute.xlu0 %10658 }
 0x1fb   : > { %13386 = vst [vmem:[#allocation32_spill] sm:$0xff] %v11383_v1 }
 0x1fe   : > { %v1885_v60 = vpop.permute.xlu0 %1884 }
 0x1ff   : > { %1887 = vxpose.xlu0.c.b16.start.end [1/1] (short) (narrow) %v1885_v60, 16 }
 0x202   : > { %v11387_v29 = vpop.permute.xlu0 %1969 }
 0x206   : > { %v2017_v58 = vpop.permute.xlu0 %2016 }
 0x207   : > { %2019 = vxpose.xlu0.c.b16.start.end [1/1] (short) (narrow) %v2017_v58, 16 }
 0x209   : > { %v970_v36 = vpop.trf.xlu1 }
 0x20a   : > { %9598 = vmatmul.mubr.msk.bf16.vlgmr.msra.gmra.mrb[32].mxu0 %vm981_vm2, %v970_v36  ;;  %v11392_v8 = vpop.permute.xlu0 %2101  ;;  %v10485_v36 = vunpack.i.l.bf16 %v11263_v17 }
 0x20b   : > { %9650 = vmatpush3.bf16.msra.mxu0 %v1574_v46  ;;  %9651 = vmatprep.mubr.msk.bf16.mxu0 %vm10936_vm1, %v13388_v27 }
 0x20c   : > { %9661 = vmatprep.subr.bf16.mxu0 %v13388_v27  ;;  %v11405_v46 = vpack.c.bf16 %v10486_v63, %v10485_v36  ;;  %v10560_v63 = vunpack.i.l.bf16 %v11333_v32  ;;  %v10591_v32 = vunpack.i.h.bf16 %v11349_v21  ;;  %v10590_v36 = vunpack.i.l.bf16 %v11349_v21 }
 0x20d   : > { %v1169_v60 = vpop.trf.xlu1 }
 0x20e   : > { %v2149_v1 = vpop.permute.xlu0 %2148  ;;  %13389 = vst [vmem:[#allocation34_spill] sm:$0xff] %v11405_v46  ;;  %v11430_v10 = vpack.c.bf16 %v10561_v54, %v10560_v63  ;;  %v10621_v63 = vunpack.i.h.bf16 %v11363_v56 }
 0x20f   : > { %2151 = vxpose.xlu0.c.b16.start.end [1/1] (short) (narrow) %v2149_v1, 16 }
 0x211   : > { %v11399_v31 = vpop.trf.xlu1 }
 0x212   : > { %v11397_v15 = vpop.permute.xlu0 %2233 }
 0x215   : > { %v11403_v44 = vpop.trf.xlu1 }
 0x216   : > { %v2281_v58 = vpop.permute.xlu0 %2280 }
 0x217   : > { %2283 = vxpose.xlu0.c.b16.start.end [1/1] (short) (narrow) %v2281_v58, 16  ;;  %v10515_v58 = vunpack.i.l.bf16 %v11297_v47  ;;  %v10545_v47 = vunpack.i.l.bf16 %v11325_v23 }
 0x219   : > { %v11421_v17 = vpack.c.bf16 %v10516_v16, %v10515_v58  ;;  %v11447_v58 = vpack.c.bf16 %v10591_v32, %v10590_v36  ;;  %v10505_v32 = vunpack.i.l.bf16 %v11283_v34  ;;  %v10606_v36 = vunpack.i.h.bf16 %v11357_v6 }
 0x21b   : > { %13391 = vst [vmem:[#allocation36_spill] sm:$0xff] %v11421_v17 }
 0x220   : > { %2365 = vrot.lane.b32.xlu0 %v11405_v46, %s10934_s9 }
 0x221   : > { %v1565_v1 = vpop.trf.xlu1 }
 0x222   : > { %9652 = vmatmul.mubr.msk.bf16.vlgmr.msra.gmra.mrb[36].mxu0 %vm981_vm2, %v1565_v1 }
 0x223   : > { %9662 = vmatpush3.bf16.msra.mxu0 %v1706_v30  ;;  %9663 = vmatprep.mubr.msk.bf16.mxu0 %vm10936_vm1, %v13388_v27  ;;  %v10546_v30 = vunpack.i.h.bf16 %v11325_v23  ;;  %v10575_v23 = vunpack.i.l.bf16 %v11341_v33 }
 0x224   : > { %2412 = vrot.lane.b32.xlu0 %v11413_v4, %s10935_s10  ;;  %9673 = vmatprep.subr.bf16.mxu0 %v13388_v27 }
 0x225   : > { %v11438_v16 = vpack.c.bf16 %v10546_v30, %v10545_v47 }
 0x227   : > { %13392 = vst [vmem:[#allocation37_spill] sm:$0xff] %v11438_v16 }
 0x228   : > { %2497 = vrot.lane.b32.xlu0 %v11421_v17, %s10934_s9  ;;  %v1037_v39 = vpop.trf.xlu0 }
 0x229   : > { %9604 = vmatmul.mubr.msk.bf16.vlgmr.msra.gmra.mrb[0].mxu1 %vm981_vm2, %v1037_v39  ;;  %v10620_v39 = vunpack.i.l.bf16 %v11363_v56 }
 0x22a   : > { %9608 = vmatpush3.bf16.msra.mxu1 %v11257_v14  ;;  %9609 = vmatprep.mubr.msk.bf16.mxu1 %vm10936_vm1, %v13388_v27  ;;  %v10576_v14 = vunpack.i.h.bf16 %v11341_v33  ;;  %v10445_v33 = vunpack.i.l.bf16 %v11218_v0 }
 0x22b   : > { %9613 = vmatprep.subr.bf16.mxu1 %v13388_v27  ;;  %v11469_v30 = vpack.c.bf16 %v10621_v63, %v10620_v39  ;;  %v10650_v63 = vunpack.i.l.bf16 %v11375_v11  ;;  %v10636_v39 = vunpack.i.h.bf16 %v11381_v41 }
 0x22c   : > { %2544 = vrot.lane.b32.xlu0 %v11430_v10, %s10935_s10  ;;  %v1103_v1 = vpop.trf.xlu0  ;;  %v11455_v54 = vpack.c.bf16 %v10576_v14, %v10575_v23  ;;  %v10535_v14 = vunpack.i.l.bf16 %v11319_v2 }
 0x230   : > { %2629 = vrot.lane.b32.xlu0 %v11438_v16, %s10934_s9  ;;  %v1235_v47 = vpop.trf.xlu0 }
 0x231   : > { %9610 = vmatmul.mubr.msk.bf16.vlgmr.msra.gmra.mrb[4].mxu1 %vm981_vm2, %v1103_v1  ;;  %v10605_v1 = vunpack.i.l.bf16 %v11357_v6 }
 0x232   : > { %9614 = vmatpush3.bf16.msra.mxu1 %v11273_v22  ;;  %9615 = vmatprep.mubr.msk.bf16.mxu1 %vm10936_vm1, %v13388_v27  ;;  %v10446_v22 = vunpack.i.h.bf16 %v11218_v0 }
 0x233   : > { %9619 = vmatprep.subr.bf16.mxu1 %v13388_v27  ;;  %v11504_v23 = vpack.c.bf16 %v10606_v36, %v10605_v1  ;;  %v10581_v36 = vunpack.i.h.bf16 %v11344_v50  ;;  %v10580_v1 = vunpack.i.l.bf16 %v11344_v50  ;;  %v10611_v50 = vunpack.i.h.bf16 %v11359_v13 }
 0x234   : > { %2676 = vrot.lane.b32.xlu0 %v11447_v58, %s10935_s10  ;;  %v11477_v56 = vpack.c.bf16 %v10446_v22, %v10445_v33  ;;  %v10635_v22 = vunpack.i.l.bf16 %v11381_v41  ;;  %v10565_v33 = vunpack.i.l.bf16 %v11335_v37 }
 0x235   : > { %v1697_v21 = vpop.trf.xlu1  ;;  %13396 = vst [vmem:[#allocation41_spill] sm:$0xff] %v11504_v23 }
 0x236   : > { %9664 = vmatmul.mubr.msk.bf16.vlgmr.msra.gmra.mrb[40].mxu0 %vm981_vm2, %v1697_v21  ;;  %13393 = vst [vmem:[#allocation38_spill] sm:$0xff] %v11477_v56  ;;  %v10651_v21 = vunpack.i.h.bf16 %v11375_v11 }
 0x237   : > { %9674 = vmatpush3.bf16.msra.mxu0 %v11371_v51  ;;  %9675 = vmatprep.mubr.msk.bf16.mxu0 %vm10936_vm1, %v13388_v27  ;;  %v10461_v51 = vunpack.i.h.bf16 %v11230_v5 }
 0x238   : > { %2761 = vrot.lane.b32.xlu0 %v11455_v54, %s10934_s9  ;;  %9685 = vmatprep.subr.bf16.mxu0 %v13388_v27 }
 0x239   : > { %9616 = vmatmul.mubr.msk.bf16.vlgmr.msra.gmra.mrb[8].mxu1 %vm981_vm2, %v1169_v60  ;;  %v10460_v60 = vunpack.i.l.bf16 %v11230_v5 }
 0x23a   : > { %9620 = vmatpush3.bf16.msra.mxu1 %v11289_v38  ;;  %9621 = vmatprep.mubr.msk.bf16.mxu1 %vm10936_vm1, %v13388_v27  ;;  %v10506_v38 = vunpack.i.h.bf16 %v11283_v34 }
 0x23b   : > { %9625 = vmatprep.subr.bf16.mxu1 %v13388_v27  ;;  %v11484_v0 = vpack.c.bf16 %v10461_v51, %v10460_v60  ;;  %v11544_v51 = vpack.c.bf16 %v10636_v39, %v10635_v22  ;;  %v10551_v60 = vunpack.i.h.bf16 %v11329_v26  ;;  %v10465_v39 = vunpack.i.l.bf16 %v11238_v7 }
 0x23c   : > { %2808 = vrot.lane.b32.xlu0 %v11469_v30, %s10935_s10  ;;  %v11494_v5 = vpack.c.bf16 %v10506_v38, %v10505_v32  ;;  %v10430_v38 = vunpack.i.l.bf16 %v11206_v19 }
 0x23d   : > { %13394 = vst [vmem:[#allocation39_spill] sm:$0xff] %v11484_v0  ;;  %13399 = vst [vmem:[#allocation44_spill] sm:$0xff] %v11544_v51 }
 0x23e   : > { %13395 = vst [vmem:[#allocation40_spill] sm:$0xff] %v11494_v5 }
 0x240   : > { %3072 = vrot.lane.b32.xlu0 %v11477_v56, %s10935_s10 }
 0x241   : > { %9622 = vmatmul.mubr.msk.bf16.vlgmr.msra.gmra.mrb[12].mxu1 %vm981_vm2, %v1235_v47 }
 0x242   : > { %9626 = vmatpush3.bf16.msra.mxu1 %v11299_v48  ;;  %9627 = vmatprep.mubr.msk.bf16.mxu1 %vm10936_vm1, %v13388_v27  ;;  %v10536_v48 = vunpack.i.h.bf16 %v11319_v2  ;;  %v10520_v2 = vunpack.i.l.bf16 %v11305_v52 }
 0x243   : > { %9631 = vmatprep.subr.bf16.mxu1 %v13388_v27 }
 0x244   : > { %3270 = vrot.lane.b32.xlu0 %v11484_v0, %s10935_s10 }
 0x248   : > { %3336 = vrot.lane.b32.xlu0 %v11494_v5, %s10935_s10 }
 0x249   : > { %v1829_v34 = vpop.trf.xlu1  ;;  %9628 = vmatmul.mubr.msk.bf16.vlgmr.msra.gmra.mrb[16].mxu1 %vm981_vm2, %v11399_v31  ;;  %v10521_v31 = vunpack.i.h.bf16 %v11305_v52  ;;  %v11534_v52 = vpack.c.bf16 %v10651_v21, %v10650_v63  ;;  %v10435_v21 = vunpack.i.l.bf16 %v11213_v61 }
 0x24a   : > { %9632 = vmatpush3.bf16.msra.mxu1 %v11321_v9  ;;  %9676 = vmatmul.mubr.msk.bf16.vlgmr.msra.gmra.mrb[44].mxu0 %vm981_vm2, %v1829_v34  ;;  %v11519_v9 = vpack.c.bf16 %v10536_v48, %v10535_v14 }
 0x24b   : > { %9686 = vmatpush3.bf16.msra.mxu0 %v11387_v29  ;;  %9633 = vmatprep.mubr.msk.bf16.mxu1 %vm10936_vm1, %v13388_v27  ;;  %v1367_v29 = vpop.trf.xlu0  ;;  %v11524_v6 = vpack.c.bf16 %v10521_v31, %v10520_v2  ;;  %13398 = vst [vmem:[#allocation43_spill] sm:$0xff] %v11534_v52  ;;  %v10641_v31 = vunpack.i.h.bf16 %v11385_v43 }
 0x24c   : > { %2893 = vrot.lane.b32.xlu0 %v11504_v23, %s10934_s9  ;;  %9637 = vmatprep.subr.bf16.mxu1 %v13388_v27  ;;  %13397 = vst [vmem:[#allocation42_spill] sm:$0xff] %v11519_v9 }
 0x24d   : > { %9687 = vmatprep.mubr.msk.bf16.mxu0 %vm10936_vm1, %v13388_v27  ;;  %9697 = vmatprep.subr.bf16.mxu0 %v13388_v27 }
 0x250   : > { %3468 = vrot.lane.b32.xlu0 %v11519_v9, %s10935_s10 }
 0x251   : > { %9634 = vmatmul.mubr.msk.bf16.vlgmr.msra.gmra.mrb[20].mxu1 %vm981_vm2, %v1367_v29  ;;  %v10436_v29 = vunpack.i.h.bf16 %v11213_v61  ;;  %v10595_v61 = vunpack.i.l.bf16 %v11351_v42 }
 0x252   : > { %9638 = vmatpush3.bf16.msra.mxu1 %v11327_v24  ;;  %9639 = vmatprep.mubr.msk.bf16.mxu1 %vm10936_vm1, %v13388_v27  ;;  %v10566_v24 = vunpack.i.h.bf16 %v11335_v37  ;;  %v1499_v37 = vpop.trf.xlu0 }
 0x253   : > { %9643 = vmatprep.subr.bf16.mxu1 %v13388_v27  ;;  %v11617_v63 = vpack.c.bf16 %v10436_v29, %v10435_v21 }
 0x254   : > { %3534 = vrot.lane.b32.xlu0 %v11524_v6, %s10935_s10  ;;  %v11554_v47 = vpack.c.bf16 %v10566_v24, %v10565_v33  ;;  %v10496_v24 = vunpack.i.h.bf16 %v11277_v25  ;;  %v10495_v33 = vunpack.i.l.bf16 %v11277_v25 }
 0x256   : > { %13400 = vst [vmem:[#allocation45_spill] sm:$0xff] %v11554_v47  ;;  %v1631_v32 = vpop.trf.xlu0 }
 0x258   : > { %2959 = vrot.lane.b32.xlu0 %v11534_v52, %s10934_s9 }
 0x259   : > { %v1904_v11 = vpop.permute.xlu1 %1903  ;;  %9640 = vmatmul.mubr.msk.bf16.vlgmr.msra.gmra.mrb[24].mxu1 %vm981_vm2, %v11403_v44  ;;  %v10550_v44 = vunpack.i.l.bf16 %v11329_v26  ;;  %v10431_v26 = vunpack.i.h.bf16 %v11206_v19  ;;  %v11586_v19 = vpack.c.bf16 %v10581_v36, %v10580_v1  ;;  %v10656_v36 = vunpack.i.h.bf16 %v11379_v55 }
 0x25a   : > { %9644 = vmatpush3.bf16.msra.mxu1 %v11337_v18  ;;  %9645 = vmatprep.mubr.msk.bf16.mxu1 %vm10936_vm1, %v13388_v27  ;;  %v1763_v34 = vpop.trf.xlu0 }
 0x25b   : > { %9655 = vmatprep.subr.bf16.mxu1 %v13388_v27  ;;  %v11559_v18 = vpack.c.bf16 %v10551_v60, %v10550_v44  ;;  %v11637_v60 = vpack.c.bf16 %v10496_v24, %v10495_v33  ;;  %v10626_v44 = vunpack.i.h.bf16 %v11365_v3 }
 0x25c   : > { %3025 = vrot.lane.b32.xlu0 %v11544_v51, %s10934_s9 }
 0x25d   : > { %v1951_v41 = vpop.permute.xlu1 %1950 }
 0x25e   : > { %1953 = vxpose.xlu1.c.b16.start.end [1/1] (short) (narrow) %v1951_v41, 16 }
 0x260   : > { %3600 = vrot.lane.b32.xlu0 %v11554_v47, %s10935_s10 }
 0x261   : > { %9646 = vmatmul.mubr.msk.bf16.vlgmr.msra.gmra.mrb[28].mxu1 %vm981_vm2, %v1499_v37  ;;  %v10625_v37 = vunpack.i.l.bf16 %v11365_v3  ;;  %v10655_v3 = vunpack.i.l.bf16 %v11379_v55 }
 0x262   : > { %9656 = vmatpush3.bf16.msra.mxu1 %v11353_v45  ;;  %2035 = vrot.lane.b32.xlu1 %v11285_v35, %s10934_s9  ;;  %v11576_v45 = vpack.c.bf16 %v10431_v26, %v10430_v38  ;;  %v10525_v26 = vunpack.i.l.bf16 %v11311_v59 }
 0x263   : > { %9657 = vmatprep.mubr.msk.bf16.mxu1 %vm10936_vm1, %v13388_v27  ;;  %9667 = vmatprep.subr.bf16.mxu1 %v13388_v27  ;;  %v11645_v25 = vpack.c.bf16 %v10626_v44, %v10625_v37 }
 0x264   : > { %3666 = vrot.lane.b32.xlu0 %v11559_v18, %s10935_s10  ;;  %13401 = vst [vmem:[#allocation46_spill] sm:$0xff] %v11576_v45 }
 0x265   : > { %v1895_v14 = vpop.trf.xlu0  ;;  %13404 = vst [vmem:[#allocation49_spill] sm:$0xff] %v11645_v25 }
 0x266   : > { %2082 = vrot.lane.b32.xlu1 %v11293_v40, %s10935_s10 }
 0x268   : > { %3091 = vrot.lane.b32.xlu0 %v11477_v56, %s10934_s9 }
 0x269   : > { %9658 = vmatmul.mubr.msk.bf16.vlgmr.msra.gmra.mrb[32].mxu1 %vm981_vm2, %v1631_v32 }
 0x26a   : > { %9668 = vmatpush3.bf16.msra.mxu1 %v11377_v53  ;;  %9669 = vmatprep.mubr.msk.bf16.mxu1 %vm10936_vm1, %v13388_v27  ;;  %v10610_v53 = vunpack.i.l.bf16 %v11359_v13  ;;  %v10640_v13 = vunpack.i.l.bf16 %v11385_v43  ;;  %v10466_v43 = vunpack.i.h.bf16 %v11238_v7 }
 0x26b   : > { %9679 = vmatprep.subr.bf16.mxu1 %v13388_v27 }
 0x26c   : > { %3157 = vrot.lane.b32.xlu0 %v11576_v45, %s10934_s9  ;;  %v11598_v48 = vpack.c.bf16 %v10611_v50, %v10610_v53  ;;  %v11609_v2 = vpack.c.bf16 %v10641_v31, %v10640_v13  ;;  %v11625_v22 = vpack.c.bf16 %v10466_v43, %v10465_v39  ;;  %v11661_v50 = vpack.c.bf16 %v10656_v36, %v10655_v3 }
 0x26d   : > { %v2027_v7 = vpop.trf.xlu0 }
 0x26e   : > { %13402 = vst [vmem:[#allocation47_spill] sm:$0xff] %v11609_v2  ;;  %13405 = vst [vmem:[#allocation50_spill] sm:$0xff] %v11661_v50 }
 0x270   : > { %3798 = vrot.lane.b32.xlu0 %v11586_v19, %s10935_s10 }
 0x271   : > { %9670 = vmatmul.mubr.msk.bf16.vlgmr.msra.gmra.mrb[36].mxu1 %vm981_vm2, %v1763_v34  ;;  %v10555_v34 = vunpack.i.l.bf16 %v11331_v28 }
 0x272   : > { %9680 = vmatpush3.bf16.msra.mxu1 %v1904_v11  ;;  %9681 = vmatprep.mubr.msk.bf16.mxu1 %vm10936_vm1, %v13388_v27  ;;  %v10596_v11 = vunpack.i.h.bf16 %v11351_v42  ;;  %v10526_v42 = vunpack.i.h.bf16 %v11311_v59  ;;  %v10556_v59 = vunpack.i.h.bf16 %v11331_v28 }
 0x273   : > { %9691 = vmatprep.subr.bf16.mxu1 %v13388_v27 }
 0x274   : > { %3289 = vrot.lane.b32.xlu0 %v11484_v0, %s10934_s9  ;;  %v11633_v41 = vpack.c.bf16 %v10596_v11, %v10595_v61  ;;  %v11651_v32 = vpack.c.bf16 %v10526_v42, %v10525_v26  ;;  %v11665_v53 = vpack.c.bf16 %v10556_v59, %v10555_v34 }
 0x275   : > { %v11647_v38 = vpop.trf.xlu0 }
 0x276   : > { %13403 = vst [vmem:[#allocation48_spill] sm:$0xff] %v11633_v41 }
 0x278   : > { %3930 = vrot.lane.b32.xlu0 %v11598_v48, %s10935_s10 }
 0x279   : > { %9682 = vmatmul.mubr.msk.bf16.vlgmr.msra.gmra.mrb[40].mxu1 %vm981_vm2, %v1895_v14 }
 0x27a   : > { %9693 = vmatprep.mubr.msk.bf16.mxu1 %vm10936_vm1, %v13388_v27 }
 0x27c   : > { %3355 = vrot.lane.b32.xlu0 %v11494_v5, %s10934_s9 }
 0x27d   : > { %v11657_v1 = vpop.trf.xlu0 }
 0x280   : > { %4062 = vrot.lane.b32.xlu0 %v11609_v2, %s10935_s10 }
 0x284   : > { %3487 = vrot.lane.b32.xlu0 %v11519_v9, %s10934_s9 }
 0x288   : > { %4194 = vrot.lane.b32.xlu0 %v11617_v63, %s10935_s10 }
 0x28c   : > { %3619 = vrot.lane.b32.xlu0 %v11554_v47, %s10934_s9 }
 0x290   : > { %4326 = vrot.lane.b32.xlu0 %v11625_v22, %s10935_s10 }
 0x292   : > { %v11667_v14 = vpop.permute.xlu0 %2365 }
 0x294   : > { %3751 = vrot.lane.b32.xlu0 %v11633_v41, %s10934_s9 }
 0x296   : > { %v2413_v55 = vpop.permute.xlu0 %2412 }
 0x298   : > { %4458 = vrot.lane.b32.xlu0 %v11637_v60, %s10935_s10 }
 0x29a   : > { %v11671_v31 = vpop.permute.xlu0 %2497 }
 0x29c   : > { %3883 = vrot.lane.b32.xlu0 %v11645_v25, %s10934_s9 }
 0x29e   : > { %v2545_v13 = vpop.permute.xlu0 %2544 }
 0x2a0   : > { %4590 = vrot.lane.b32.xlu0 %v11651_v32, %s10935_s10 }
 0x2a2   : > { %v11673_v29 = vpop.permute.xlu0 %2629 }
 0x2a4   : > { %4015 = vrot.lane.b32.xlu0 %v11661_v50, %s10934_s9 }
 0x2a6   : > { %v2677_v28 = vpop.permute.xlu0 %2676 }
 0x2a8   : > { %4722 = vrot.lane.b32.xlu0 %v11665_v53, %s10935_s10 }
 0x2aa   : > { %v11680_v43 = vpop.permute.xlu0 %2761 }
 0x2ae   : > { %v2809_v39 = vpop.permute.xlu0 %2808 }
 0x2c4   : > { %v1961_v21 = vpop.trf.xlu1 }
 0x2c5   : > { %9688 = vmatmul.mubr.msk.bf16.vlgmr.msra.gmra.mrb[48].mxu0 %vm981_vm2, %v1961_v21 }
 0x2c6   : > { %9698 = vmatpush3.bf16.msra.mxu0 %v11392_v8  ;;  %2415 = vxpose.xlu0.c.b16.start.end [1/1] (short) (narrow) %v2413_v55, 16 }
 0x2c7   : > { %9699 = vmatprep.mubr.msk.bf16.mxu0 %vm10936_vm1, %v13388_v27  ;;  %9709 = vmatprep.subr.bf16.mxu0 %v13388_v27 }
 0x2ca   : > { %2547 = vxpose.xlu0.c.b16.start.end [1/1] (short) (narrow) %v2545_v13, 16 }
 0x2ce   : > { %2679 = vxpose.xlu0.c.b16.start.end [1/1] (short) (narrow) %v2677_v28, 16 }
 0x2d2   : > { %2811 = vxpose.xlu0.c.b16.start.end [1/1] (short) (narrow) %v2809_v39, 16 }
 0x2d4   : > { %v2036_v11 = vpop.permute.xlu1 %2035 }
 0x2d5   : > { %9692 = vmatpush3.bf16.msra.mxu1 %v2036_v11 }
 0x2d6   : > { %9703 = vmatprep.subr.bf16.mxu1 %v13388_v27 }
 0x2d8   : > { %v2083_v61 = vpop.permute.xlu1 %2082  ;;  %9694 = vmatmul.mubr.msk.bf16.vlgmr.msra.gmra.mrb[44].mxu1 %vm981_vm2, %v2027_v7 }
 0x2d9   : > { %2085 = vxpose.xlu1.c.b16.start.end [1/1] (short) (narrow) %v2083_v61, 16  ;;  %9705 = vmatprep.mubr.msk.bf16.mxu1 %vm10936_vm1, %v13388_v27 }
 0x2dd   : > { %2167 = vrot.lane.b32.xlu1 %v11301_v49, %s10934_s9  ;;  %v11688_v8 = vpop.f32.mrb[32].mxu0 }
 0x2de   : > { %v9599_v24 = vpop.f32.mrb[33].mxu0 }
 0x2df   : > { %v1022_v33 = vpop.f32.mrb[34].mxu0 }
 0x2e0   : > { %v9600_v44 = vpop.f32.mrb[35].mxu0 }
 0x2e1   : > { %2214 = vrot.lane.b32.xlu1 %v11307_v57, %s10935_s10 }
 0x2f5   : > { %v11692_v37 = vpop.f32.mrb[36].mxu0 }
 0x2f6   : > { %13406 = vst [vmem:[#allocation51_spill] sm:$0xff] %v11692_v37  ;;  %v9653_v42 = vpop.f32.mrb[37].mxu0 }
 0x2f7   : > { %v1616_v26 = vpop.f32.mrb[38].mxu0 }
 0x2f8   : > { %v9654_v7 = vpop.f32.mrb[39].mxu0 }
 0x2fc   : > { %v11694_v36 = vpop.f32.mrb[0].mxu1 }
 0x2fd   : > { %v9605_v3 = vpop.f32.mrb[1].mxu1 }
 0x2fe   : > { %v1088_v59 = vpop.f32.mrb[2].mxu1 }
 0x2ff   : > { %v9606_v34 = vpop.f32.mrb[3].mxu1 }
 0x304   : > { %v11696_v55 = vpop.f32.mrb[4].mxu1 }
 0x305   : > { %v9611_v13 = vpop.f32.mrb[5].mxu1 }
 0x306   : > { %v1154_v21 = vpop.f32.mrb[6].mxu1 }
 0x307   : > { %v9612_v28 = vpop.f32.mrb[7].mxu1 }
 0x309   : > { %v11698_v39 = vpop.f32.mrb[40].mxu0 }
 0x30a   : > { %13407 = vst [vmem:[#allocation52_spill] sm:$0xff] %v11698_v39  ;;  %v9665_v11 = vpop.f32.mrb[41].mxu0 }
 0x30b   : > { %v1748_v61 = vpop.f32.mrb[42].mxu0 }
 0x30c   : > { %v11700_v24 = vpop.f32.mrb[8].mxu1  ;;  %v9666_v33 = vpop.f32.mrb[43].mxu0 }
 0x30d   : > { %13408 = vst [vmem:[#allocation53_spill] sm:$0xff] %v11700_v24  ;;  %v9617_v44 = vpop.f32.mrb[9].mxu1 }
 0x30e   : > { %v1220_v42 = vpop.f32.mrb[10].mxu1 }
 0x30f   : > { %v9618_v26 = vpop.f32.mrb[11].mxu1 }
 0x314   : > { %v11702_v7 = vpop.f32.mrb[12].mxu1 }
 0x315   : > { %13409 = vst [vmem:[#allocation54_spill] sm:$0xff] %v11702_v7  ;;  %v9623_v3 = vpop.f32.mrb[13].mxu1 }
 0x316   : > { %v1286_v59 = vpop.f32.mrb[14].mxu1 }
 0x317   : > { %v9624_v34 = vpop.f32.mrb[15].mxu1 }
 0x31c   : > { %v11704_v47 = vpop.f32.mrb[16].mxu1 }
 0x31d   : > { %13410 = vst [vmem:[#allocation55_spill] sm:$0xff] %v11704_v47  ;;  %v9629_v13 = vpop.f32.mrb[17].mxu1  ;;  %v11706_v21 = vpop.f32.mrb[44].mxu0 }
 0x31e   : > { %13411 = vst [vmem:[#allocation56_spill] sm:$0xff] %v11706_v21  ;;  %v1352_v28 = vpop.f32.mrb[18].mxu1  ;;  %v9677_v9 = vpop.f32.mrb[45].mxu0 }
 0x31f   : > { %v9630_v11 = vpop.f32.mrb[19].mxu1  ;;  %v1880_v61 = vpop.f32.mrb[46].mxu0 }
 0x320   : > { %v9678_v5 = vpop.f32.mrb[47].mxu0  ;;  %v11728_v11 = vpop.permute.xlu0 %3072 }
 0x324   : > { %v11708_v0 = vpop.f32.mrb[20].mxu1  ;;  %v11730_v61 = vpop.permute.xlu0 %3270 }
 0x325   : > { %13412 = vst [vmem:[#allocation57_spill] sm:$0xff] %v11708_v0  ;;  %v9635_v33 = vpop.f32.mrb[21].mxu1 }
 0x326   : > { %v1418_v44 = vpop.f32.mrb[22].mxu1 }
 0x327   : > { %v9636_v42 = vpop.f32.mrb[23].mxu1 }
 0x32c   : > { %v11710_v26 = vpop.f32.mrb[24].mxu1 }
 0x32d   : > { %13413 = vst [vmem:[#allocation58_spill] sm:$0xff] %v11710_v26  ;;  %v9641_v3 = vpop.f32.mrb[25].mxu1 }
 0x32e   : > { %v1484_v59 = vpop.f32.mrb[26].mxu1 }
 0x32f   : > { %v9642_v34 = vpop.f32.mrb[27].mxu1 }
 0x33f   : > { %v2093_v56 = vpop.trf.xlu1 }
 0x340   : > { %9700 = vmatmul.mubr.msk.bf16.vlgmr.msra.gmra.mrb[52].mxu0 %vm981_vm2, %v2093_v56 }
 0x341   : > { %9710 = vmatpush3.bf16.msra.mxu0 %v11397_v15  ;;  %9711 = vmatprep.mubr.msk.bf16.mxu0 %vm10936_vm1, %v13388_v27 }
 0x342   : > { %9721 = vmatprep.subr.bf16.mxu0 %v13388_v27 }
 0x34f   : > { %v2168_v5 = vpop.permute.xlu1 %2167 }
 0x350   : > { %9704 = vmatpush3.bf16.msra.mxu1 %v2168_v5 }
 0x351   : > { %9715 = vmatprep.subr.bf16.mxu1 %v13388_v27 }
 0x353   : > { %v2215_v9 = vpop.permute.xlu1 %2214  ;;  %9706 = vmatmul.mubr.msk.bf16.vlgmr.msra.gmra.mrb[48].mxu1 %vm981_vm2, %v11647_v38  ;;  %v11732_v38 = vpop.permute.xlu0 %3336 }
 0x354   : > { %2217 = vxpose.xlu1.c.b16.start.end [1/1] (short) (narrow) %v2215_v9, 16  ;;  %9717 = vmatprep.mubr.msk.bf16.mxu1 %vm10936_vm1, %v13388_v27 }
 0x357   : > { %v11734_v33 = vpop.permute.xlu0 %2893 }
 0x358   : > { %2299 = vrot.lane.b32.xlu1 %v11315_v62, %s10934_s9 }
 0x35b   : > { %v11741_v42 = vpop.permute.xlu0 %3468 }
 0x35c   : > { %2346 = vrot.lane.b32.xlu1 %v11405_v46, %s10935_s10 }
 0x35f   : > { %v11743_v3 = vpop.permute.xlu0 %3534 }
 0x363   : > { %v11745_v59 = vpop.permute.xlu0 %2959 }
 0x398   : > { %v11726_v15 = vpop.f32.mrb[48].mxu0 }
 0x399   : > { %13414 = vst [vmem:[#allocation59_spill] sm:$0xff] %v11726_v15  ;;  %v9689_v56 = vpop.f32.mrb[49].mxu0 }
 0x39a   : > { %v2012_v13 = vpop.f32.mrb[50].mxu0 }
 0x39b   : > { %v9690_v28 = vpop.f32.mrb[51].mxu0 }
 0x3ba   : > { %v2225_v44 = vpop.trf.xlu1 }
 0x3bb   : > { %9712 = vmatmul.mubr.msk.bf16.vlgmr.msra.gmra.mrb[56].mxu0 %vm981_vm2, %v2225_v44 }
 0x3bc   : > { %9722 = vmatpush3.bf16.msra.mxu0 %v11667_v14  ;;  %9723 = vmatprep.mubr.msk.bf16.mxu0 %vm10936_vm1, %v13388_v27  ;;  %v11752_v14 = vpop.permute.xlu0 %3025 }
 0x3bd   : > { %9733 = vmatprep.subr.bf16.mxu0 %v13388_v27 }
 0x3c0   : > { %v11756_v9 = vpop.permute.xlu0 %3600 }
 0x3c4   : > { %v11760_v56 = vpop.permute.xlu0 %3666 }
 0x3c8   : > { %v11762_v13 = vpop.permute.xlu0 %3091 }
 0x3ca   : > { %v2300_v34 = vpop.permute.xlu1 %2299 }
 0x3cb   : > { %9716 = vmatpush3.bf16.msra.mxu1 %v2300_v34 }
 0x3cc   : > { %9727 = vmatprep.subr.bf16.mxu1 %v13388_v27  ;;  %v11764_v28 = vpop.permute.xlu0 %3157 }
 0x3ce   : > { %v2347_v5 = vpop.permute.xlu1 %2346  ;;  %9718 = vmatmul.mubr.msk.bf16.vlgmr.msra.gmra.mrb[52].mxu1 %vm981_vm2, %v11657_v1 }
 0x3cf   : > { %2349 = vxpose.xlu1.c.b16.start.end [1/1] (short) (narrow) %v2347_v5, 16  ;;  %9729 = vmatprep.mubr.msk.bf16.mxu1 %vm10936_vm1, %v13388_v27 }
 0x3d0   : > { %v11766_v1 = vpop.permute.xlu0 %3798 }
 0x3d3   : > { %2431 = vrot.lane.b32.xlu1 %v11413_v4, %s10934_s9 }
 0x3d4   : > { %v11768_v44 = vpop.permute.xlu0 %3289 }
 0x3d7   : > { %2478 = vrot.lane.b32.xlu1 %v11421_v17, %s10935_s10 }
 0x3d8   : > { %v11770_v34 = vpop.permute.xlu0 %3930 }
 0x3dc   : > { %v11772_v5 = vpop.permute.xlu0 %3355 }
 0x3e0   : > { %v11774_v4 = vpop.permute.xlu0 %4062 }
 0x3e4   : > { %v11776_v46 = vpop.permute.xlu0 %3487 }
 0x3e8   : > { %v11778_v62 = vpop.permute.xlu0 %4194 }
 0x3ec   : > { %v11782_v35 = vpop.permute.xlu0 %3619 }
 0x3f0   : > { %v11784_v15 = vpop.permute.xlu0 %4326 }
 0x3f4   : > { %v11786_v21 = vpop.permute.xlu0 %3751 }
 0x3f8   : > { %v11788_v39 = vpop.permute.xlu0 %4458 }
 0x3fc   : > { %v11790_v37 = vpop.permute.xlu0 %3883 }
 0x400   : > { %v11792_v0 = vpop.permute.xlu0 %4590 }
 0x413   : > { %v11780_v17 = vpop.f32.mrb[52].mxu0 }
 0x414   : > { %13415 = vst [vmem:[#allocation60_spill] sm:$0xff] %v11780_v17  ;;  %v9701_v57 = vpop.f32.mrb[53].mxu0 }
 0x415   : > { %v2144_v49 = vpop.f32.mrb[54].mxu0 }
 0x416   : > { %v9702_v40 = vpop.f32.mrb[55].mxu0 }
 0x417   : > { %v11799_v40 = vpop.permute.xlu0 %4015 }
 0x41b   : > { %v11801_v49 = vpop.permute.xlu0 %4722 }
 0x41f   : > { %v2423_v17 = vpop.trf.xlu0 }
 0x435   : > { %v2357_v26 = vpop.trf.xlu1 }
 0x436   : > { %9724 = vmatmul.mubr.msk.bf16.vlgmr.msra.gmra.mrb[60].mxu0 %vm981_vm2, %v2357_v26 }
 0x437   : > { %9734 = vmatpush3.bf16.msra.mxu0 %v11671_v31  ;;  %9735 = vmatprep.mubr.msk.bf16.mxu0 %vm10936_vm1, %v13388_v27 }
 0x438   : > { %9745 = vmatprep.subr.bf16.mxu0 %v13388_v27 }
 0x445   : > { %v2432_v57 = vpop.permute.xlu1 %2431 }
 0x446   : > { %9728 = vmatpush3.bf16.msra.mxu1 %v2432_v57 }
 0x447   : > { %9739 = vmatprep.subr.bf16.mxu1 %v13388_v27 }
 0x449   : > { %v2479_v47 = vpop.permute.xlu1 %2478  ;;  %9730 = vmatmul.mubr.msk.bf16.vlgmr.msra.gmra.mrb[56].mxu1 %vm981_vm2, %v2423_v17 }
 0x44a   : > { %2481 = vxpose.xlu1.c.b16.start.end [1/1] (short) (narrow) %v2479_v47, 16  ;;  %9741 = vmatprep.mubr.msk.bf16.mxu1 %vm10936_vm1, %v13388_v27  ;;  %v2555_v47 = vpop.trf.xlu0 }
 0x44e   : > { %2563 = vrot.lane.b32.xlu1 %v11430_v10, %s10934_s9 }
 0x452   : > { %2610 = vrot.lane.b32.xlu1 %v11438_v16, %s10935_s10 }
 0x48e   : > { %v11811_v31 = vpop.f32.mrb[56].mxu0 }
 0x48f   : > { %v9713_v26 = vpop.f32.mrb[57].mxu0 }
 0x490   : > { %v2276_v57 = vpop.f32.mrb[58].mxu0 }
 0x491   : > { %v9714_v7 = vpop.f32.mrb[59].mxu0 }
 0x4b0   : > { %v2489_v24 = vpop.trf.xlu1 }
 0x4b1   : > { %9736 = vmatmul.mubr.msk.bf16.vlgmr.msra.gmra.mrb[64].mxu0 %vm981_vm2, %v2489_v24 }
 0x4b2   : > { %9746 = vmatpush3.bf16.msra.mxu0 %v11673_v29  ;;  %9747 = vmatprep.mubr.msk.bf16.mxu0 %vm10936_vm1, %v13388_v27 }
 0x4b3   : > { %9757 = vmatprep.subr.bf16.mxu0 %v13388_v27 }
 0x4c0   : > { %v2564_v17 = vpop.permute.xlu1 %2563 }
 0x4c1   : > { %9740 = vmatpush3.bf16.msra.mxu1 %v2564_v17 }
 0x4c2   : > { %9751 = vmatprep.subr.bf16.mxu1 %v13388_v27 }
 0x4c4   : > { %v2611_v16 = vpop.permute.xlu1 %2610  ;;  %9742 = vmatmul.mubr.msk.bf16.vlgmr.msra.gmra.mrb[60].mxu1 %vm981_vm2, %v2555_v47  ;;  %v10475_v47 = vunpack.i.l.bf16 %v11251_v12 }
 0x4c5   : > { %2613 = vxpose.xlu1.c.b16.start.end [1/1] (short) (narrow) %v2611_v16, 16  ;;  %9753 = vmatprep.mubr.msk.bf16.mxu1 %vm10936_vm1, %v13388_v27 }
 0x4c9   : > { %2695 = vrot.lane.b32.xlu1 %v11447_v58, %s10934_s9 }
 0x4cd   : > { %2742 = vrot.lane.b32.xlu1 %v11455_v54, %s10935_s10 }
 0x509   : > { %v11826_v29 = vpop.f32.mrb[60].mxu0 }
 0x50a   : > { %v9725_v24 = vpop.f32.mrb[61].mxu0 }
 0x50b   : > { %v2408_v7 = vpop.f32.mrb[62].mxu0 }
 0x50c   : > { %v9726_v26 = vpop.f32.mrb[63].mxu0 }
 0x52b   : > { %v2621_v57 = vpop.trf.xlu1 }
 0x52c   : > { %9748 = vmatmul.mubr.msk.bf16.vlgmr.msra.gmra.mrb[68].mxu0 %vm981_vm2, %v2621_v57 }
 0x52d   : > { %9758 = vmatpush3.bf16.msra.mxu0 %v11680_v43  ;;  %9759 = vmatprep.mubr.msk.bf16.mxu0 %vm10936_vm1, %v13388_v27  ;;  %v10476_v43 = vunpack.i.h.bf16 %v11251_v12 }
 0x52e   : > { %9769 = vmatprep.subr.bf16.mxu0 %v13388_v27 }
 0x52f   : > { %v11844_v24 = vpack.c.bf16 %v10476_v43, %v10475_v47  ;;  %v11858_v47 = vpop.f32.mrb[28].mxu1 }
 0x53b   : > { %v2696_v16 = vpop.permute.xlu1 %2695 }
 0x53c   : > { %9752 = vmatpush3.bf16.msra.mxu1 %v2696_v16 }
 0x53d   : > { %9763 = vmatprep.subr.bf16.mxu1 %v13388_v27 }
 0x53f   : > { %v2743_v17 = vpop.permute.xlu1 %2742 }
 0x540   : > { %2745 = vxpose.xlu1.c.b16.start.end [1/1] (short) (narrow) %v2743_v17, 16  ;;  %v2687_v17 = vpop.trf.xlu0 }
 0x541   : > { %9754 = vmatmul.mubr.msk.bf16.vlgmr.msra.gmra.mrb[64].mxu1 %vm981_vm2, %v2687_v17 }
 0x542   : > { %9765 = vmatprep.mubr.msk.bf16.mxu1 %vm10936_vm1, %v13388_v27 }
 0x544   : > { %2874 = vrot.lane.b32.xlu1 %v11504_v23, %s10935_s10 }
 0x548   : > { %2940 = vrot.lane.b32.xlu1 %v11534_v52, %s10935_s10 }
 0x54c   : > { %3006 = vrot.lane.b32.xlu1 %v11544_v51, %s10935_s10 }
 0x550   : > { %3138 = vrot.lane.b32.xlu1 %v11576_v45, %s10935_s10 }
 0x554   : > { %3204 = vrot.lane.b32.xlu1 %v11844_v24, %s10935_s10 }
 0x584   : > { %v11848_v7 = vpop.f32.mrb[64].mxu0 }
 0x585   : > { %v9737_v26 = vpop.f32.mrb[65].mxu0 }
 0x586   : > { %v2540_v57 = vpop.f32.mrb[66].mxu0 }
 0x587   : > { %v9738_v16 = vpop.f32.mrb[67].mxu0  ;;  %v9647_v57 = vpop.f32.mrb[29].mxu1 }
 0x588   : > { %v1550_v16 = vpop.f32.mrb[30].mxu1 }
 0x589   : > { %v9648_v17 = vpop.f32.mrb[31].mxu1 }
 0x58a   : > { %v11862_v51 = vpop.f32.mrb[32].mxu1 }
 0x5a6   : > { %v2753_v12 = vpop.trf.xlu1 }
 0x5a7   : > { %9760 = vmatmul.mubr.msk.bf16.vlgmr.msra.gmra.mrb[72].mxu0 %vm981_vm2, %v2753_v12 }
 0x5a8   : > { %9770 = vmatpush3.bf16.msra.mxu0 %v11734_v33  ;;  %9771 = vmatprep.mubr.msk.bf16.mxu0 %vm10936_vm1, %v13388_v27 }
 0x5a9   : > { %9781 = vmatprep.subr.bf16.mxu0 %v13388_v27 }
 0x5b6   : > { %v2875_v43 = vpop.permute.xlu1 %2874 }
 0x5b7   : > { %2877 = vxpose.xlu1.c.b16.start.end [1/1] (short) (narrow) %v2875_v43, 16  ;;  %v9659_v43 = vpop.f32.mrb[33].mxu1 }
 0x5b8   : > { %v1682_v52 = vpop.f32.mrb[34].mxu1 }
 0x5b9   : > { %v9660_v57 = vpop.f32.mrb[35].mxu1 }
 0x5ba   : > { %v2941_v26 = vpop.permute.xlu1 %2940 }
 0x5bb   : > { %2943 = vxpose.xlu1.c.b16.start.end [1/1] (short) (narrow) %v2941_v26, 16  ;;  %v11865_v26 = vpop.f32.mrb[36].mxu1 }
 0x5be   : > { %v3007_v45 = vpop.permute.xlu1 %3006 }
 0x5bf   : > { %3009 = vxpose.xlu0.c.b16.start.end [1/1] (short) (narrow) %v3007_v45, 16  ;;  %3075 = vxpose.xlu1.c.b16.start.end [1/1] (short) (narrow) %v11728_v11, 16  ;;  %v9671_v45 = vpop.f32.mrb[37].mxu1 }
 0x5c0   : > { %v1814_v16 = vpop.f32.mrb[38].mxu1 }
 0x5c1   : > { %v9672_v11 = vpop.f32.mrb[39].mxu1 }
 0x5c2   : > { %v3139_v12 = vpop.permute.xlu1 %3138  ;;  %v11868_v17 = vpop.f32.mrb[40].mxu1 }
 0x5c3   : > { %3141 = vxpose.xlu0.c.b16.start.end [1/1] (short) (narrow) %v3139_v12, 16 }
 0x5c6   : > { %v3205_v33 = vpop.permute.xlu1 %3204 }
 0x5c7   : > { %3273 = vxpose.xlu0.c.b16.start.end [1/1] (short) (narrow) %v11730_v61, 16  ;;  %3207 = vxpose.xlu1.c.b16.start.end [1/1] (short) (narrow) %v3205_v33, 16  ;;  %v9683_v61 = vpop.f32.mrb[41].mxu1  ;;  %v10491_v33 = vunpack.i.h.bf16 %v11271_v20 }
 0x5c8   : > { %v1946_v12 = vpop.f32.mrb[42].mxu1 }
 0x5c9   : > { %v9684_v43 = vpop.f32.mrb[43].mxu1 }
 0x5ca   : > { %v11873_v52 = vpop.f32.mrb[44].mxu1 }
 0x5cb   : > { %3339 = vxpose.xlu1.c.b16.start.end [1/1] (short) (narrow) %v11732_v38, 16  ;;  %v10490_v38 = vunpack.i.l.bf16 %v11271_v20 }
 0x5cd   : > { %v11877_v45 = vpack.c.bf16 %v10491_v33, %v10490_v38  ;;  %v13416_v33 = vld [vmem:[#allocation18_spill] sm:$0xff] }
 0x5ce   : > { %v10451_v38 = vunpack.i.h.bf16 %v13416_v33 }
 0x5cf   : > { %3471 = vxpose.xlu1.c.b16.start.end [1/1] (short) (narrow) %v11741_v42, 16  ;;  %v9695_v42 = vpop.f32.mrb[45].mxu1 }
 0x5d0   : > { %v2078_v57 = vpop.f32.mrb[46].mxu1 }
 0x5d1   : > { %v9696_v16 = vpop.f32.mrb[47].mxu1  ;;  %v10450_v57 = vunpack.i.l.bf16 %v13416_v33  ;;  %v13418_v33 = vld [vmem:[#allocation21_spill] sm:$0xff] }
 0x5d2   : > { %v11879_v11 = vpop.f32.mrb[48].mxu1  ;;  %v13417_v16 = vld [vmem:[#allocation19_spill] sm:$0xff] }
 0x5d3   : > { %3603 = vxpose.xlu1.c.b16.start.end [1/1] (short) (narrow) %v11756_v9, 16  ;;  %v9707_v9 = vpop.f32.mrb[49].mxu1 }
 0x5d4   : > { %v2210_v61 = vpop.f32.mrb[50].mxu1  ;;  %v10481_v9 = vunpack.i.h.bf16 %v13417_v16 }
 0x5d5   : > { %v9708_v12 = vpop.f32.mrb[51].mxu1  ;;  %v10480_v61 = vunpack.i.l.bf16 %v13417_v16 }
 0x5d6   : > { %v11885_v20 = vpop.f32.mrb[52].mxu1 }
 0x5d7   : > { %2827 = vrot.lane.b32.xlu1 %v11469_v30, %s10934_s9  ;;  %v9719_v43 = vpop.f32.mrb[53].mxu1  ;;  %v11907_v12 = vpack.c.bf16 %v10481_v9, %v10480_v61  ;;  %v13419_v9 = vld [vmem:[#allocation26_spill] sm:$0xff] }
 0x5d8   : > { %v2342_v23 = vpop.f32.mrb[54].mxu1  ;;  %v10541_v61 = vunpack.i.h.bf16 %v13419_v9 }
 0x5d9   : > { %v9720_v42 = vpop.f32.mrb[55].mxu1  ;;  %v11899_v23 = vpack.c.bf16 %v10451_v38, %v10450_v57  ;;  %v10511_v38 = vunpack.i.h.bf16 %v13418_v33  ;;  %v10510_v57 = vunpack.i.l.bf16 %v13418_v33 }
 0x5db   : > { %3402 = vrot.lane.b32.xlu1 %v11877_v45, %s10935_s10  ;;  %v11917_v16 = vpack.c.bf16 %v10511_v38, %v10510_v57 }
 0x5df   : > { %3732 = vrot.lane.b32.xlu1 %v11633_v41, %s10935_s10  ;;  %v10540_v41 = vunpack.i.l.bf16 %v13419_v9 }
 0x5e3   : > { %3223 = vrot.lane.b32.xlu1 %v11844_v24, %s10934_s9 }
 0x5e7   : > { %3864 = vrot.lane.b32.xlu1 %v11645_v25, %s10935_s10 }
 0x5eb   : > { %3421 = vrot.lane.b32.xlu1 %v11877_v45, %s10934_s9 }
 0x5ef   : > { %3996 = vrot.lane.b32.xlu1 %v11661_v50, %s10935_s10 }
 0x5f3   : > { %3553 = vrot.lane.b32.xlu1 %v11524_v6, %s10934_s9 }
 0x5f7   : > { %4128 = vrot.lane.b32.xlu1 %v11899_v23, %s10935_s10 }
 0x5fb   : > { %3685 = vrot.lane.b32.xlu1 %v11559_v18, %s10934_s9 }
 0x5ff   : > { %4260 = vrot.lane.b32.xlu1 %v11907_v12, %s10935_s10  ;;  %v11911_v43 = vpop.f32.mrb[68].mxu0 }
 0x600   : > { %v9749_v42 = vpop.f32.mrb[69].mxu0 }
 0x601   : > { %v2672_v50 = vpop.f32.mrb[70].mxu0  ;;  %v11925_v42 = vpack.c.bf16 %v10541_v61, %v10540_v41  ;;  %v2819_v41 = vpop.trf.xlu0 }
 0x602   : > { %v9750_v25 = vpop.f32.mrb[71].mxu0 }
 0x603   : > { %3817 = vrot.lane.b32.xlu1 %v11586_v19, %s10934_s9  ;;  %v13420_v25 = vld [vmem:[#allocation27_spill] sm:$0xff] }
 0x604   : > { %v10571_v50 = vunpack.i.h.bf16 %v13420_v25  ;;  %v10570_v33 = vunpack.i.l.bf16 %v13420_v25 }
 0x606   : > { %v11933_v38 = vpack.c.bf16 %v10571_v50, %v10570_v33 }
 0x607   : > { %4392 = vrot.lane.b32.xlu1 %v11917_v16, %s10935_s10 }
 0x60b   : > { %3949 = vrot.lane.b32.xlu1 %v11598_v48, %s10934_s9 }
 0x60f   : > { %4524 = vrot.lane.b32.xlu1 %v11925_v42, %s10935_s10 }
 0x613   : > { %4081 = vrot.lane.b32.xlu1 %v11609_v2, %s10934_s9 }
 0x617   : > { %4656 = vrot.lane.b32.xlu1 %v11933_v38, %s10935_s10 }
 0x61d   : > { %v2885_v57 = vpop.trf.xlu1 }
 0x61e   : > { %9772 = vmatmul.mubr.msk.bf16.vlgmr.msra.gmra.mrb[76].mxu0 %vm981_vm2, %v2885_v57 }
 0x61f   : > { %9782 = vmatpush3.bf16.msra.mxu0 %v11752_v14  ;;  %9783 = vmatprep.mubr.msk.bf16.mxu0 %vm10936_vm1, %v13388_v27 }
 0x620   : > { %9793 = vmatprep.subr.bf16.mxu0 %v13388_v27 }
 0x621   : > { %v2951_v61 = vpop.trf.xlu1 }
 0x625   : > { %v3017_v9 = vpop.trf.xlu0  ;;  %v3083_v50 = vpop.trf.xlu1 }
 0x626   : > { %9784 = vmatmul.mubr.msk.bf16.vlgmr.msra.gmra.mrb[80].mxu0 %vm981_vm2, %v3017_v9 }
 0x627   : > { %9794 = vmatpush3.bf16.msra.mxu0 %v11764_v28  ;;  %9795 = vmatprep.mubr.msk.bf16.mxu0 %vm10936_vm1, %v13388_v27 }
 0x628   : > { %9805 = vmatprep.subr.bf16.mxu0 %v13388_v27 }
 0x629   : > { %v3149_v25 = vpop.trf.xlu0 }
 0x62d   : > { %v3215_v14 = vpop.trf.xlu1  ;;  %v3281_v33 = vpop.trf.xlu0 }
 0x62e   : > { %9796 = vmatmul.mubr.msk.bf16.vlgmr.msra.gmra.mrb[84].mxu0 %vm981_vm2, %v3149_v25 }
 0x62f   : > { %9806 = vmatpush3.bf16.msra.mxu0 %v11768_v44  ;;  %9807 = vmatprep.mubr.msk.bf16.mxu0 %vm10936_vm1, %v13388_v27 }
 0x630   : > { %9817 = vmatprep.subr.bf16.mxu0 %v13388_v27 }
 0x631   : > { %v3347_v28 = vpop.trf.xlu1 }
 0x635   : > { %v3479_v57 = vpop.trf.xlu1 }
 0x636   : > { %9808 = vmatmul.mubr.msk.bf16.vlgmr.msra.gmra.mrb[88].mxu0 %vm981_vm2, %v3281_v33  ;;  %v13423_v33 = vld [vmem:[#allocation30_spill] sm:$0xff] }
 0x637   : > { %9819 = vmatprep.mubr.msk.bf16.mxu0 %vm10936_vm1, %v13388_v27 }
 0x639   : > { %v11955_v9 = vpop.trf.xlu1 }
 0x649   : > { %v2828_v2 = vpop.permute.xlu1 %2827 }
 0x64a   : > { %9764 = vmatpush3.bf16.msra.mxu1 %v2828_v2 }
 0x64b   : > { %9775 = vmatprep.subr.bf16.mxu1 %v13388_v27 }
 0x64d   : > { %9766 = vmatmul.mubr.msk.bf16.vlgmr.msra.gmra.mrb[68].mxu1 %vm981_vm2, %v2819_v41  ;;  %v3403_v44 = vpop.permute.xlu1 %3402 }
 0x64e   : > { %9776 = vmatpush3.bf16.msra.mxu1 %v11745_v59  ;;  %3405 = vxpose.xlu0.c.b16.start.end [1/1] (short) (narrow) %v3403_v44, 16 }
 0x64f   : > { %9777 = vmatprep.mubr.msk.bf16.mxu1 %vm10936_vm1, %v13388_v27  ;;  %9787 = vmatprep.subr.bf16.mxu1 %v13388_v27 }
 0x651   : > { %v3733_v25 = vpop.permute.xlu1 %3732 }
 0x652   : > { %3537 = vxpose.xlu0.c.b16.start.end [1/1] (short) (narrow) %v11743_v3, 16  ;;  %3735 = vxpose.xlu1.c.b16.start.end [1/1] (short) (narrow) %v3733_v25, 16  ;;  %v13425_v25 = vld [vmem:[#allocation29_spill] sm:$0xff] }
 0x655   : > { %9778 = vmatmul.mubr.msk.bf16.vlgmr.msra.gmra.mrb[72].mxu1 %vm981_vm2, %v2951_v61  ;;  %v3224_v2 = vpop.permute.xlu1 %3223 }
 0x656   : > { %9788 = vmatpush3.bf16.msra.mxu1 %v11762_v13  ;;  %3669 = vxpose.xlu0.c.b16.start.end [1/1] (short) (narrow) %v11760_v56, 16 }
 0x657   : > { %9789 = vmatprep.mubr.msk.bf16.mxu1 %vm10936_vm1, %v13388_v27  ;;  %9799 = vmatprep.subr.bf16.mxu1 %v13388_v27 }
 0x659   : > { %v3865_v59 = vpop.permute.xlu1 %3864 }
 0x65a   : > { %3801 = vxpose.xlu0.c.b16.start.end [1/1] (short) (narrow) %v11766_v1, 16  ;;  %3867 = vxpose.xlu1.c.b16.start.end [1/1] (short) (narrow) %v3865_v59, 16  ;;  %v10600_v59 = vunpack.i.l.bf16 %v13425_v25 }
 0x65d   : > { %9790 = vmatmul.mubr.msk.bf16.vlgmr.msra.gmra.mrb[76].mxu1 %vm981_vm2, %v3083_v50  ;;  %v3422_v3 = vpop.permute.xlu1 %3421 }
 0x65e   : > { %9800 = vmatpush3.bf16.msra.mxu1 %v3224_v2  ;;  %3933 = vxpose.xlu0.c.b16.start.end [1/1] (short) (narrow) %v11770_v34, 16  ;;  %v10601_v2 = vunpack.i.h.bf16 %v13425_v25 }
 0x65f   : > { %9818 = vmatpush3.bf16.msra.mxu0 %v3422_v3  ;;  %9801 = vmatprep.mubr.msk.bf16.mxu1 %vm10936_vm1, %v13388_v27  ;;  %v13426_v3 = vld [vmem:[#allocation33_spill] sm:$0xff] }
 0x660   : > { %9811 = vmatprep.subr.bf16.mxu1 %v13388_v27  ;;  %9829 = vmatprep.subr.bf16.mxu0 %v13388_v27 }
 0x661   : > { %v3997_v56 = vpop.permute.xlu1 %3996 }
 0x662   : > { %4065 = vxpose.xlu0.c.b16.start.end [1/1] (short) (narrow) %v11774_v4, 16  ;;  %3999 = vxpose.xlu1.c.b16.start.end [1/1] (short) (narrow) %v3997_v56, 16  ;;  %v10646_v56 = vunpack.i.h.bf16 %v13426_v3 }
 0x665   : > { %9802 = vmatmul.mubr.msk.bf16.vlgmr.msra.gmra.mrb[80].mxu1 %vm981_vm2, %v3215_v14  ;;  %v11979_v13 = vpop.permute.xlu1 %3553 }
 0x666   : > { %9812 = vmatpush3.bf16.msra.mxu1 %v11772_v5  ;;  %4197 = vxpose.xlu0.c.b16.start.end [1/1] (short) (narrow) %v11778_v62, 16  ;;  %v13421_v5 = vld [vmem:[#allocation28_spill] sm:$0xff] }
 0x667   : > { %9813 = vmatprep.mubr.msk.bf16.mxu1 %vm10936_vm1, %v13388_v27  ;;  %9823 = vmatprep.subr.bf16.mxu1 %v13388_v27  ;;  %v10586_v41 = vunpack.i.h.bf16 %v13421_v5  ;;  %v10585_v61 = vunpack.i.l.bf16 %v13421_v5 }
 0x669   : > { %v4129_v1 = vpop.permute.xlu1 %4128  ;;  %v12018_v50 = vpack.c.bf16 %v10586_v41, %v10585_v61  ;;  %v12052_v41 = vpop.f32.mrb[56].mxu1 }
 0x66a   : > { %4329 = vxpose.xlu0.c.b16.start.end [1/1] (short) (narrow) %v11784_v15, 16  ;;  %4131 = vxpose.xlu1.c.b16.start.end [1/1] (short) (narrow) %v4129_v1, 16  ;;  %v10645_v1 = vunpack.i.l.bf16 %v13426_v3  ;;  %v9731_v61 = vpop.f32.mrb[57].mxu1 }
 0x66b   : > { %13422 = vst [vmem:[#allocation18_spill] sm:$0xff] %v12018_v50 }
 0x66d   : > { %9814 = vmatmul.mubr.msk.bf16.vlgmr.msra.gmra.mrb[84].mxu1 %vm981_vm2, %v3347_v28  ;;  %v11988_v4 = vpop.permute.xlu1 %3685  ;;  %v10616_v28 = vunpack.i.h.bf16 %v13423_v33 }
 0x66e   : > { %9824 = vmatpush3.bf16.msra.mxu1 %v11776_v46  ;;  %4461 = vxpose.xlu0.c.b16.start.end [1/1] (short) (narrow) %v11788_v39, 16 }
 0x66f   : > { %9825 = vmatprep.mubr.msk.bf16.mxu1 %vm10936_vm1, %v13388_v27  ;;  %9835 = vmatprep.subr.bf16.mxu1 %v13388_v27 }
 0x671   : > { %v4261_v62 = vpop.permute.xlu1 %4260 }
 0x672   : > { %4593 = vxpose.xlu0.c.b16.start.end [1/1] (short) (narrow) %v11792_v0, 16  ;;  %4263 = vxpose.xlu1.c.b16.start.end [1/1] (short) (narrow) %v4261_v62, 16  ;;  %v12040_v62 = vpack.c.bf16 %v10601_v2, %v10600_v59 }
 0x674   : > { %13427 = vst [vmem:[#allocation21_spill] sm:$0xff] %v12040_v62 }
 0x675   : > { %9826 = vmatmul.mubr.msk.bf16.vlgmr.msra.gmra.mrb[88].mxu1 %vm981_vm2, %v3479_v57  ;;  %v11997_v15 = vpop.permute.xlu1 %3817  ;;  %v10615_v57 = vunpack.i.l.bf16 %v13423_v33 }
 0x676   : > { %9836 = vmatpush3.bf16.msra.mxu1 %v11782_v35  ;;  %4725 = vxpose.xlu0.c.b16.start.end [1/1] (short) (narrow) %v11801_v49, 16 }
 0x677   : > { %9837 = vmatprep.mubr.msk.bf16.mxu1 %vm10936_vm1, %v13388_v27  ;;  %9847 = vmatprep.subr.bf16.mxu1 %v13388_v27 }
 0x679   : > { %v4393_v46 = vpop.permute.xlu1 %4392 }
 0x67a   : > { %4395 = vxpose.xlu1.c.b16.start.end [1/1] (short) (narrow) %v4393_v46, 16  ;;  %v12004_v39 = vpop.f32.mrb[72].mxu0  ;;  %v12042_v46 = vpack.c.bf16 %v10646_v56, %v10645_v1 }
 0x67b   : > { %v9761_v34 = vpop.f32.mrb[73].mxu0 }
 0x67c   : > { %v2804_v0 = vpop.f32.mrb[74].mxu0  ;;  %13428 = vst [vmem:[#allocation26_spill] sm:$0xff] %v12042_v46  ;;  %v13429_v34 = vld [vmem:[#allocation31_spill] sm:$0xff] }
 0x67d   : > { %9838 = vmatmul.mubr.msk.bf16.vlgmr.msra.gmra.mrb[92].mxu1 %vm981_vm2, %v11955_v9  ;;  %v12010_v35 = vpop.permute.xlu1 %3949  ;;  %v9762_v49 = vpop.f32.mrb[75].mxu0  ;;  %v12028_v9 = vpack.c.bf16 %v10616_v28, %v10615_v57  ;;  %v10631_v0 = vunpack.i.h.bf16 %v13429_v34  ;;  %v10630_v5 = vunpack.i.l.bf16 %v13429_v34 }
 0x67e   : > { %9848 = vmatpush3.bf16.msra.mxu1 %v11786_v21  ;;  %9849 = vmatprep.mubr.msk.bf16.mxu1 %vm10936_vm1, %v13388_v27 }
 0x67f   : > { %4147 = vrot.lane.b32.xlu0 %v11899_v23, %s10934_s9  ;;  %9859 = vmatprep.subr.bf16.mxu1 %v13388_v27  ;;  %13424 = vst [vmem:[#allocation19_spill] sm:$0xff] %v12028_v9  ;;  %v12056_v49 = vpack.c.bf16 %v10631_v0, %v10630_v5 }
 0x681   : > { %v4525_v14 = vpop.permute.xlu1 %4524  ;;  %13430 = vst [vmem:[#allocation27_spill] sm:$0xff] %v12056_v49 }
 0x682   : > { %4527 = vxpose.xlu1.c.b16.start.end [1/1] (short) (narrow) %v4525_v14, 16  ;;  %v2474_v14 = vpop.f32.mrb[58].mxu1 }
 0x683   : > { %4854 = vrot.lane.b32.xlu0 %v12018_v50, %s10935_s10  ;;  %v9732_v33 = vpop.f32.mrb[59].mxu1 }
 0x684   : > { %v12060_v28 = vpop.f32.mrb[60].mxu1 }
 0x685   : > { %v12024_v21 = vpop.permute.xlu1 %4081  ;;  %v9743_v57 = vpop.f32.mrb[61].mxu1 }
 0x686   : > { %v2606_v59 = vpop.f32.mrb[62].mxu1 }
 0x687   : > { %4279 = vrot.lane.b32.xlu0 %v11907_v12, %s10934_s9  ;;  %v9744_v3 = vpop.f32.mrb[63].mxu1 }
 0x688   : > { %v12068_v56 = vpop.f32.mrb[64].mxu1 }
 0x689   : > { %v4657_v44 = vpop.permute.xlu1 %4656  ;;  %v9755_v1 = vpop.f32.mrb[65].mxu1 }
 0x68a   : > { %4659 = vxpose.xlu1.c.b16.start.end [1/1] (short) (narrow) %v4657_v44, 16  ;;  %v13431_v44 = vld [vmem:[#allocation32_spill] sm:$0xff]  ;;  %v2738_v0 = vpop.f32.mrb[66].mxu1 }
 0x68b   : > { %4986 = vrot.lane.b32.xlu0 %v12028_v9, %s10935_s10  ;;  %v10661_v25 = vunpack.i.h.bf16 %v13431_v44  ;;  %v10660_v2 = vunpack.i.l.bf16 %v13431_v44  ;;  %v9756_v5 = vpop.f32.mrb[67].mxu1 }
 0x68d   : > { %v12072_v34 = vpack.c.bf16 %v10661_v25, %v10660_v2 }
 0x68e   : > { %4213 = vrot.lane.b32.xlu1 %v11617_v63, %s10934_s9 }
 0x68f   : > { %4411 = vrot.lane.b32.xlu0 %v11917_v16, %s10934_s9  ;;  %13432 = vst [vmem:[#allocation28_spill] sm:$0xff] %v12072_v34 }
 0x692   : > { %4788 = vrot.lane.b32.xlu1 %v12040_v62, %s10935_s10 }
 0x693   : > { %5118 = vrot.lane.b32.xlu0 %v12042_v46, %s10935_s10 }
 0x696   : > { %4345 = vrot.lane.b32.xlu1 %v11625_v22, %s10934_s9 }
 0x697   : > { %4543 = vrot.lane.b32.xlu0 %v11925_v42, %s10934_s9 }
 0x69a   : > { %4920 = vrot.lane.b32.xlu1 %v12056_v49, %s10935_s10 }
 0x69b   : > { %4675 = vrot.lane.b32.xlu0 %v11933_v38, %s10934_s9 }
 0x69e   : > { %4477 = vrot.lane.b32.xlu1 %v11637_v60, %s10934_s9 }
 0x69f   : > { %4807 = vrot.lane.b32.xlu0 %v12040_v62, %s10934_s9 }
 0x6a2   : > { %5052 = vrot.lane.b32.xlu1 %v12072_v34, %s10935_s10 }
 0x6a3   : > { %4939 = vrot.lane.b32.xlu0 %v12056_v49, %s10934_s9 }
 0x6a6   : > { %4609 = vrot.lane.b32.xlu1 %v11651_v32, %s10934_s9 }
 0x6a7   : > { %5071 = vrot.lane.b32.xlu0 %v12072_v34, %s10934_s9 }
 0x6aa   : > { %4741 = vrot.lane.b32.xlu1 %v11665_v53, %s10934_s9 }
 0x6ae   : > { %4873 = vrot.lane.b32.xlu1 %v12018_v50, %s10934_s9 }
 0x6b2   : > { %5005 = vrot.lane.b32.xlu1 %v12028_v9, %s10934_s9 }
 0x6b4   : > { %v3413_v61 = vpop.trf.xlu0 }
 0x6b5   : > { %9820 = vmatmul.mubr.msk.bf16.vlgmr.msra.gmra.mrb[92].mxu0 %vm981_vm2, %v3413_v61 }
 0x6b6   : > { %9830 = vmatpush3.bf16.msra.mxu0 %v11979_v13  ;;  %5137 = vrot.lane.b32.xlu1 %v12042_v46, %s10934_s9 }
 0x6b7   : > { %9831 = vmatprep.mubr.msk.bf16.mxu0 %vm10936_vm1, %v13388_v27  ;;  %9841 = vmatprep.subr.bf16.mxu0 %v13388_v27 }
 0x6b8   : > { %v3743_v14 = vpop.trf.xlu1  ;;  %v3545_v33 = vpop.trf.xlu0 }
 0x6b9   : > { %9850 = vmatmul.mubr.msk.bf16.vlgmr.msra.gmra.mrb[96].mxu1 %vm981_vm2, %v3743_v14 }
 0x6ba   : > { %9860 = vmatpush3.bf16.msra.mxu1 %v11790_v37  ;;  %9861 = vmatprep.mubr.msk.bf16.mxu1 %vm10936_vm1, %v13388_v27 }
 0x6bb   : > { %9871 = vmatprep.subr.bf16.mxu1 %v13388_v27 }
 0x6bc   : > { %v3677_v13 = vpop.trf.xlu0 }
 0x6bd   : > { %9832 = vmatmul.mubr.msk.bf16.vlgmr.msra.gmra.mrb[96].mxu0 %vm981_vm2, %v3545_v33 }
 0x6be   : > { %9842 = vmatpush3.bf16.msra.mxu0 %v11988_v4  ;;  %9843 = vmatprep.mubr.msk.bf16.mxu0 %vm10936_vm1, %v13388_v27 }
 0x6bf   : > { %9853 = vmatprep.subr.bf16.mxu0 %v13388_v27 }
 0x6c0   : > { %v3875_v57 = vpop.trf.xlu1  ;;  %v3809_v37 = vpop.trf.xlu0 }
 0x6c1   : > { %9862 = vmatmul.mubr.msk.bf16.vlgmr.msra.gmra.mrb[100].mxu1 %vm981_vm2, %v3875_v57 }
 0x6c2   : > { %9872 = vmatpush3.bf16.msra.mxu1 %v11799_v40  ;;  %9873 = vmatprep.mubr.msk.bf16.mxu1 %vm10936_vm1, %v13388_v27 }
 0x6c3   : > { %9883 = vmatprep.subr.bf16.mxu1 %v13388_v27 }
 0x6c4   : > { %v3941_v4 = vpop.trf.xlu0 }
 0x6c5   : > { %9844 = vmatmul.mubr.msk.bf16.vlgmr.msra.gmra.mrb[100].mxu0 %vm981_vm2, %v3677_v13 }
 0x6c6   : > { %9854 = vmatpush3.bf16.msra.mxu0 %v11997_v15  ;;  %9855 = vmatprep.mubr.msk.bf16.mxu0 %vm10936_vm1, %v13388_v27 }
 0x6c7   : > { %9865 = vmatprep.subr.bf16.mxu0 %v13388_v27 }
 0x6c8   : > { %v4007_v44 = vpop.trf.xlu1  ;;  %v4073_v40 = vpop.trf.xlu0 }
 0x6c9   : > { %9874 = vmatmul.mubr.msk.bf16.vlgmr.msra.gmra.mrb[104].mxu1 %vm981_vm2, %v4007_v44 }
 0x6ca   : > { %9885 = vmatprep.mubr.msk.bf16.mxu1 %vm10936_vm1, %v13388_v27 }
 0x6cc   : > { %v4205_v15 = vpop.trf.xlu0 }
 0x6cd   : > { %9856 = vmatmul.mubr.msk.bf16.vlgmr.msra.gmra.mrb[104].mxu0 %vm981_vm2, %v3809_v37 }
 0x6ce   : > { %9866 = vmatpush3.bf16.msra.mxu0 %v12010_v35  ;;  %9867 = vmatprep.mubr.msk.bf16.mxu0 %vm10936_vm1, %v13388_v27 }
 0x6cf   : > { %9877 = vmatprep.subr.bf16.mxu0 %v13388_v27 }
 0x6d0   : > { %v4337_v25 = vpop.trf.xlu0  ;;  %v4139_v2 = vpop.trf.xlu1 }
 0x6d4   : > { %v4469_v35 = vpop.trf.xlu0 }
 0x6d5   : > { %9868 = vmatmul.mubr.msk.bf16.vlgmr.msra.gmra.mrb[108].mxu0 %vm981_vm2, %v3941_v4 }
 0x6d6   : > { %9878 = vmatpush3.bf16.msra.mxu0 %v12024_v21  ;;  %9879 = vmatprep.mubr.msk.bf16.mxu0 %vm10936_vm1, %v13388_v27 }
 0x6d7   : > { %9889 = vmatprep.subr.bf16.mxu0 %v13388_v27 }
 0x6d8   : > { %v12131_v59 = vpop.trf.xlu0  ;;  %v4271_v3 = vpop.trf.xlu1 }
 0x6dc   : > { %v12133_v1 = vpop.trf.xlu0 }
 0x6dd   : > { %9880 = vmatmul.mubr.msk.bf16.vlgmr.msra.gmra.mrb[112].mxu0 %vm981_vm2, %v4073_v40 }
 0x6de   : > { %9891 = vmatprep.mubr.msk.bf16.mxu0 %vm10936_vm1, %v13388_v27 }
 0x6e0   : > { %v4403_v0 = vpop.trf.xlu1 }
 0x6e8   : > { %v4535_v33 = vpop.trf.xlu1 }
 0x6f0   : > { %v4667_v4 = vpop.trf.xlu1 }
 0x6f1   : > { %v4148_v21 = vpop.permute.xlu0 %4147  ;;  %v12135_v5 = vpop.f32.mrb[76].mxu0 }
 0x6f2   : > { %9884 = vmatpush3.bf16.msra.mxu1 %v4148_v21  ;;  %v9773_v61 = vpop.f32.mrb[77].mxu0 }
 0x6f3   : > { %9895 = vmatprep.subr.bf16.mxu1 %v13388_v27  ;;  %v2936_v14 = vpop.f32.mrb[78].mxu0 }
 0x6f4   : > { %v9774_v13 = vpop.f32.mrb[79].mxu0 }
 0x6f5   : > { %v4855_v57 = vpop.permute.xlu0 %4854  ;;  %9886 = vmatmul.mubr.msk.bf16.vlgmr.msra.gmra.mrb[108].mxu1 %vm981_vm2, %v4139_v2 }
 0x6f6   : > { %4857 = vxpose.xlu0.c.b16.start.end [1/1] (short) (narrow) %v4855_v57, 16  ;;  %9897 = vmatprep.mubr.msk.bf16.mxu1 %vm10936_vm1, %v13388_v27 }
 0x6f9   : > { %v4280_v37 = vpop.permute.xlu0 %4279 }
 0x6fa   : > { %9896 = vmatpush3.bf16.msra.mxu1 %v4280_v37  ;;  %v12176_v37 = vpop.f32.mrb[80].mxu0 }
 0x6fb   : > { %9907 = vmatprep.subr.bf16.mxu1 %v13388_v27 }
 0x6fd   : > { %v4987_v44 = vpop.permute.xlu0 %4986  ;;  %9898 = vmatmul.mubr.msk.bf16.vlgmr.msra.gmra.mrb[112].mxu1 %vm981_vm2, %v4271_v3 }
 0x6fe   : > { %9909 = vmatprep.mubr.msk.bf16.mxu1 %vm10936_vm1, %v13388_v27 }
 0x700   : > { %v4214_v40 = vpop.permute.xlu1 %4213 }
 0x701   : > { %v4412_v21 = vpop.permute.xlu0 %4411  ;;  %9890 = vmatpush3.bf16.msra.mxu0 %v4214_v40 }
 0x702   : > { %9908 = vmatpush3.bf16.msra.mxu1 %v4412_v21  ;;  %9901 = vmatprep.subr.bf16.mxu0 %v13388_v27 }
 0x703   : > { %9919 = vmatprep.subr.bf16.mxu1 %v13388_v27 }
 0x704   : > { %9892 = vmatmul.mubr.msk.bf16.vlgmr.msra.gmra.mrb[116].mxu0 %vm981_vm2, %v4205_v15  ;;  %v4789_v2 = vpop.permute.xlu1 %4788 }
 0x705   : > { %v5119_v61 = vpop.permute.xlu0 %5118  ;;  %9910 = vmatmul.mubr.msk.bf16.vlgmr.msra.gmra.mrb[116].mxu1 %vm981_vm2, %v4403_v0  ;;  %4791 = vxpose.xlu1.c.b16.start.end [1/1] (short) (narrow) %v4789_v2, 16 }
 0x706   : > { %9903 = vmatprep.mubr.msk.bf16.mxu0 %vm10936_vm1, %v13388_v27  ;;  %9921 = vmatprep.mubr.msk.bf16.mxu1 %vm10936_vm1, %v13388_v27 }
 0x708   : > { %v4346_v3 = vpop.permute.xlu1 %4345 }
 0x709   : > { %v4544_v14 = vpop.permute.xlu0 %4543  ;;  %9902 = vmatpush3.bf16.msra.mxu0 %v4346_v3 }
 0x70a   : > { %9920 = vmatpush3.bf16.msra.mxu1 %v4544_v14  ;;  %9913 = vmatprep.subr.bf16.mxu0 %v13388_v27 }
 0x70b   : > { %9931 = vmatprep.subr.bf16.mxu1 %v13388_v27 }
 0x70c   : > { %9904 = vmatmul.mubr.msk.bf16.vlgmr.msra.gmra.mrb[120].mxu0 %vm981_vm2, %v4337_v25  ;;  %v4921_v15 = vpop.permute.xlu1 %4920 }
 0x70d   : > { %v4676_v13 = vpop.permute.xlu0 %4675  ;;  %9922 = vmatmul.mubr.msk.bf16.vlgmr.msra.gmra.mrb[120].mxu1 %vm981_vm2, %v4535_v33  ;;  %4923 = vxpose.xlu0.c.b16.start.end [1/1] (short) (narrow) %v4921_v15, 16 }
 0x70e   : > { %9932 = vmatpush3.bf16.msra.mxu1 %v4676_v13  ;;  %9915 = vmatprep.mubr.msk.bf16.mxu0 %vm10936_vm1, %v13388_v27 }
 0x70f   : > { %9933 = vmatprep.mubr.msk.bf16.mxu1 %vm10936_vm1, %v13388_v27  ;;  %9943 = vmatprep.subr.bf16.mxu1 %v13388_v27 }
 0x710   : > { %v4478_v0 = vpop.permute.xlu1 %4477 }
 0x711   : > { %4989 = vxpose.xlu0.c.b16.start.end [1/1] (short) (narrow) %v4987_v44, 16  ;;  %9914 = vmatpush3.bf16.msra.mxu0 %v4478_v0  ;;  %v4808_v57 = vpop.permute.xlu0 %4807 }
 0x712   : > { %9925 = vmatprep.subr.bf16.mxu0 %v13388_v27 }
 0x714   : > { %9916 = vmatmul.mubr.msk.bf16.vlgmr.msra.gmra.mrb[124].mxu0 %vm981_vm2, %v4469_v35  ;;  %v5053_v25 = vpop.permute.xlu1 %5052 }
 0x715   : > { %9934 = vmatmul.mubr.msk.bf16.vlgmr.msra.gmra.mrb[124].mxu1 %vm981_vm2, %v4667_v4  ;;  %5121 = vxpose.xlu0.c.b16.start.end [1/1] (short) (narrow) %v5119_v61, 16  ;;  %v9785_v4 = vpop.f32.mrb[81].mxu0 }
 0x716   : > { %9944 = vmatpush3.bf16.msra.mxu1 %v4808_v57  ;;  %5055 = vxpose.xlu1.c.b16.start.end [1/1] (short) (narrow) %v5053_v25, 16  ;;  %v3068_v21 = vpop.f32.mrb[82].mxu0 }
 0x717   : > { %9927 = vmatprep.mubr.msk.bf16.mxu0 %vm10936_vm1, %v13388_v27  ;;  %9945 = vmatprep.mubr.msk.bf16.mxu1 %vm10936_vm1, %v13388_v27  ;;  %v9786_v61 = vpop.f32.mrb[83].mxu0 }
 0x718   : > { %v4610_v33 = vpop.permute.xlu1 %4609  ;;  %9955 = vmatprep.subr.bf16.mxu1 %v13388_v27  ;;  %v12180_v14 = vpop.f32.mrb[84].mxu0 }
 0x719   : > { %9926 = vmatpush3.bf16.msra.mxu0 %v4610_v33  ;;  %v9797_v15 = vpop.f32.mrb[85].mxu0 }
 0x71a   : > { %9937 = vmatprep.subr.bf16.mxu0 %v13388_v27  ;;  %v3200_v13 = vpop.f32.mrb[86].mxu0 }
 0x71b   : > { %v9798_v0 = vpop.f32.mrb[87].mxu0 }
 0x71c   : > { %9928 = vmatmul.mubr.msk.bf16.vlgmr.msra.gmra.mrb[128].mxu0 %vm981_vm2, %v12131_v59  ;;  %v4742_v35 = vpop.permute.xlu1 %4741  ;;  %v12187_v25 = vpop.f32.mrb[88].mxu0 }
 0x71d   : > { %9938 = vmatpush3.bf16.msra.mxu0 %v4742_v35  ;;  %9939 = vmatprep.mubr.msk.bf16.mxu0 %vm10936_vm1, %v13388_v27  ;;  %v9809_v35 = vpop.f32.mrb[89].mxu0 }
 0x71e   : > { %9949 = vmatprep.subr.bf16.mxu0 %v13388_v27 }
 0x720   : > { %v12178_v44 = vpop.f32.mrb[68].mxu1  ;;  %v4874_v59 = vpop.permute.xlu1 %4873 }
 0x721   : > { %v9767_v40 = vpop.f32.mrb[69].mxu1 }
 0x722   : > { %v2870_v2 = vpop.f32.mrb[70].mxu1  ;;  %v3332_v40 = vpop.f32.mrb[90].mxu0 }
 0x723   : > { %v9768_v3 = vpop.f32.mrb[71].mxu1  ;;  %v9810_v2 = vpop.f32.mrb[91].mxu0 }
 0x724   : > { %9940 = vmatmul.mubr.msk.bf16.vlgmr.msra.gmra.mrb[132].mxu0 %vm981_vm2, %v12133_v1 }
 0x725   : > { %9950 = vmatpush3.bf16.msra.mxu0 %v4874_v59  ;;  %9951 = vmatprep.mubr.msk.bf16.mxu0 %vm10936_vm1, %v13388_v27 }
 0x726   : > { %9961 = vmatprep.subr.bf16.mxu0 %v13388_v27 }
 0x728   : > { %v12189_v57 = vpop.f32.mrb[72].mxu1 }
 0x729   : > { %v9779_v33 = vpop.f32.mrb[73].mxu1 }
 0x72a   : > { %v3002_v4 = vpop.f32.mrb[74].mxu1 }
 0x72b   : > { %v9780_v21 = vpop.f32.mrb[75].mxu1 }
 0x730   : > { %v12191_v1 = vpop.f32.mrb[76].mxu1 }
 0x731   : > { %v9791_v61 = vpop.f32.mrb[77].mxu1 }
 0x732   : > { %v3134_v3 = vpop.f32.mrb[78].mxu1 }
 0x733   : > { %v9792_v59 = vpop.f32.mrb[79].mxu1  ;;  %v4940_v3 = vpop.permute.xlu0 %4939 }
 0x737   : > { %v5072_v62 = vpop.permute.xlu0 %5071 }
 0x738   : > { %v12193_v15 = vpop.f32.mrb[80].mxu1 }
 0x739   : > { %v9803_v13 = vpop.f32.mrb[81].mxu1 }
 0x73a   : > { %v3266_v46 = vpop.f32.mrb[82].mxu1 }
 0x73b   : > { %v9804_v0 = vpop.f32.mrb[83].mxu1  ;;  %v5006_v46 = vpop.permute.xlu1 %5005 }
 0x740   : > { %v12195_v34 = vpop.f32.mrb[84].mxu1 }
 0x741   : > { %v9815_v9 = vpop.f32.mrb[85].mxu1 }
 0x742   : > { %v3398_v49 = vpop.f32.mrb[86].mxu1  ;;  %v5138_v9 = vpop.permute.xlu1 %5137 }
 0x743   : > { %v9816_v33 = vpop.f32.mrb[87].mxu1 }
 0x744   : > { %v5183_v33 = vpack.c.bf16 %v11688_v8, %v11688_v8 }
 0x748   : > { %v12197_v35 = vpop.f32.mrb[88].mxu1 }
 0x749   : > { %v9827_v4 = vpop.f32.mrb[89].mxu1 }
 0x74a   : > { %v3530_v40 = vpop.f32.mrb[90].mxu1 }
 0x74b   : > { %v9828_v21 = vpop.f32.mrb[91].mxu1  ;;  %v5253_v40 = vsel %vm5251_vm3, %v5183_v33, 0 }
 0x750   : > { %v12199_v2 = vpop.f32.mrb[92].mxu1 }
 0x751   : > { %v9839_v61 = vpop.f32.mrb[93].mxu1 }
 0x752   : > { %v3662_v59 = vpop.f32.mrb[94].mxu1  ;;  %v5185_v61 = vpack.c.bf16 %v11696_v55, %v11696_v55  ;;  %v13435_v55 = vld [vmem:[#allocation2_spill] sm:$0xff] }
 0x753   : > { %v9840_v50 = vpop.f32.mrb[95].mxu1  ;;  %v13434_v59 = vld [vmem:[#allocation3_spill] sm:$0xff] }
 0x75c   : > { %v4865_v13 = vpop.trf.xlu0 }
 0x75d   : > { %9952 = vmatmul.mubr.msk.bf16.vlgmr.msra.gmra.mrb[136].mxu0 %vm981_vm2, %v4865_v13  ;;  %v5347_v13 = vsel %vm5251_vm3, %v5185_v61, 0 }
 0x75e   : > { %9962 = vmatpush3.bf16.msra.mxu0 %v5006_v46  ;;  %9963 = vmatprep.mubr.msk.bf16.mxu0 %vm10936_vm1, %v13388_v27 }
 0x75f   : > { %9973 = vmatprep.subr.bf16.mxu0 %v13388_v27 }
 0x76b   : > { %v4799_v49 = vpop.trf.xlu1 }
 0x76c   : > { %9946 = vmatmul.mubr.msk.bf16.vlgmr.msra.gmra.mrb[128].mxu1 %vm981_vm2, %v4799_v49  ;;  %v13436_v49 = vld [vmem:[#allocation54_spill] sm:$0xff] }
 0x76d   : > { %9956 = vmatpush3.bf16.msra.mxu1 %v4940_v3  ;;  %9957 = vmatprep.mubr.msk.bf16.mxu1 %vm10936_vm1, %v13388_v27 }
 0x76e   : > { %9967 = vmatprep.subr.bf16.mxu1 %v13388_v27 }
 0x773   : > { %v4931_v50 = vpop.trf.xlu0 }
 0x774   : > { %9958 = vmatmul.mubr.msk.bf16.vlgmr.msra.gmra.mrb[132].mxu1 %vm981_vm2, %v4931_v50  ;;  %v5187_v50 = vpack.c.bf16 %v13436_v49, %v13436_v49  ;;  %v13440_v49 = vld [vmem:[#allocation57_spill] sm:$0xff] }
 0x775   : > { %9968 = vmatpush3.bf16.msra.mxu1 %v5072_v62  ;;  %9969 = vmatprep.mubr.msk.bf16.mxu1 %vm10936_vm1, %v13388_v27  ;;  %v5184_v62 = vpack.c.bf16 %v11694_v36, %v11694_v36  ;;  %v13433_v36 = vld [vmem:[#allocation53_spill] sm:$0xff] }
 0x776   : > { %9979 = vmatprep.subr.bf16.mxu1 %v13388_v27  ;;  %v5186_v3 = vpack.c.bf16 %v13433_v36, %v13433_v36  ;;  %v5441_v61 = vsel %vm5251_vm3, %v5187_v50, 0 }
 0x777   : > { %v4997_v0 = vpop.trf.xlu0  ;;  %v5300_v8 = vsel %vm5251_vm3, %v5184_v62, 0 }
 0x778   : > { %9964 = vmatmul.mubr.msk.bf16.vlgmr.msra.gmra.mrb[140].mxu0 %vm981_vm2, %v4997_v0  ;;  %v5394_v46 = vsel %vm5251_vm3, %v5186_v3, 0 }
 0x779   : > { %9974 = vmatpush3.bf16.msra.mxu0 %v5138_v9  ;;  %9975 = vmatprep.mubr.msk.bf16.mxu0 %vm10936_vm1, %v13388_v27 }
 0x77a   : > { %9985 = vmatprep.subr.bf16.mxu0 %v13388_v27 }
 0x77b   : > { %v5129_v21 = vpop.trf.xlu0 }
 0x77c   : > { %v5063_v4 = vpop.trf.xlu1 }
 0x77d   : > { %9970 = vmatmul.mubr.msk.bf16.vlgmr.msra.gmra.mrb[136].mxu1 %vm981_vm2, %v5063_v4  ;;  %v13437_v4 = vld [vmem:[#allocation55_spill] sm:$0xff] }
 0x77e   : > { %9980 = vmatpush3.bf16.msra.mxu1 %v5253_v40  ;;  %9981 = vmatprep.mubr.msk.bf16.mxu1 %vm10936_vm1, %v13388_v27  ;;  %v5188_v40 = vpack.c.bf16 %v13437_v4, %v13437_v4  ;;  %v13441_v4 = vld [vmem:[#allocation58_spill] sm:$0xff] }
 0x77f   : > { %9991 = vmatprep.subr.bf16.mxu1 %v13388_v27 }
 0x780   : > { %9976 = vmatmul.mubr.msk.bf16.vlgmr.msra.gmra.mrb[144].mxu0 %vm981_vm2, %v5129_v21 }
 0x781   : > { %9986 = vmatpush3.bf16.msra.mxu0 %v5300_v8  ;;  %9987 = vmatprep.mubr.msk.bf16.mxu0 %vm10936_vm1, %v13388_v27  ;;  %v13438_v8 = vld [vmem:[#allocation5_spill] sm:$0xff] }
 0x782   : > { %9997 = vmatprep.subr.bf16.mxu0 %v13388_v27 }
 0x785   : > { %9982 = vmatmul.mubr.msk.bf16.vlgmr.msra.gmra.mrb[140].mxu1 %vm5247_vm4, %v13434_v59 }
 0x786   : > { %9992 = vmatpush3.bf16.msra.mxu1 %v5347_v13  ;;  %9993 = vmatprep.mubr.msk.bf16.mxu1 %vm10936_vm1, %v13388_v27  ;;  %v13439_v13 = vld [vmem:[#allocation4_spill] sm:$0xff] }
 0x787   : > { %10003 = vmatprep.subr.bf16.mxu1 %v13388_v27 }
 0x788   : > { %9988 = vmatmul.mubr.msk.bf16.vlgmr.msra.gmra.mrb[148].mxu0 %vm5247_vm4, %v13435_v55  ;;  %v12244_v9 = vpop.f32.mrb[92].mxu0  ;;  %v5488_v55 = vsel %vm5251_vm3, %v5188_v40, 0  ;;  %v13442_v40 = vld [vmem:[#allocation7_spill] sm:$0xff] }
 0x789   : > { %9998 = vmatpush3.bf16.msra.mxu0 %v5394_v46  ;;  %9999 = vmatprep.mubr.msk.bf16.mxu0 %vm10936_vm1, %v13388_v27  ;;  %v9821_v0 = vpop.f32.mrb[93].mxu0 }
 0x78a   : > { %10009 = vmatprep.subr.bf16.mxu0 %v13388_v27  ;;  %v3464_v33 = vpop.f32.mrb[94].mxu0  ;;  %v5189_v0 = vpack.c.bf16 %v13440_v49, %v13440_v49 }
 0x78b   : > { %v9822_v62 = vpop.f32.mrb[95].mxu0 }
 0x78c   : > { %v12253_v21 = vpop.f32.mrb[96].mxu1 }
 0x78d   : > { %9994 = vmatmul.mubr.msk.bf16.vlgmr.msra.gmra.mrb[144].mxu1 %vm5247_vm4, %v13438_v8  ;;  %v9851_v36 = vpop.f32.mrb[97].mxu1  ;;  %v5190_v8 = vpack.c.bf16 %v13441_v4, %v13441_v4 }
 0x78e   : > { %10004 = vmatpush3.bf16.msra.mxu1 %v5441_v61  ;;  %10005 = vmatprep.mubr.msk.bf16.mxu1 %vm10936_vm1, %v13388_v27  ;;  %v3794_v3 = vpop.f32.mrb[98].mxu1  ;;  %v5535_v36 = vsel %vm5251_vm3, %v5189_v0, 0 }
 0x78f   : > { %10015 = vmatprep.subr.bf16.mxu1 %v13388_v27  ;;  %v9852_v59 = vpop.f32.mrb[99].mxu1  ;;  %v5582_v49 = vsel %vm5251_vm3, %v5190_v8, 0  ;;  %v13445_v8 = vld [vmem:[#allocation9_spill] sm:$0xff] }
 0x790   : > { %10000 = vmatmul.mubr.msk.bf16.vlgmr.msra.gmra.mrb[152].mxu0 %vm5247_vm4, %v13439_v13  ;;  %v12264_v46 = vpop.f32.mrb[96].mxu0 }
 0x791   : > { %10010 = vmatpush3.bf16.msra.mxu0 %v5488_v55  ;;  %10011 = vmatprep.mubr.msk.bf16.mxu0 %vm10936_vm1, %v13388_v27  ;;  %v9833_v50 = vpop.f32.mrb[97].mxu0  ;;  %v13443_v55 = vld [vmem:[#allocation6_spill] sm:$0xff] }
 0x792   : > { %10021 = vmatprep.subr.bf16.mxu0 %v13388_v27  ;;  %v3596_v33 = vpop.f32.mrb[98].mxu0 }
 0x793   : > { %v9834_v62 = vpop.f32.mrb[99].mxu0  ;;  %v5191_v33 = vpack.c.bf16 %v11858_v47, %v11858_v47 }
 0x794   : > { %v12273_v61 = vpop.f32.mrb[100].mxu1 }
 0x795   : > { %10006 = vmatmul.mubr.msk.bf16.vlgmr.msra.gmra.mrb[148].mxu1 %vm5247_vm4, %v13442_v40  ;;  %v9863_v3 = vpop.f32.mrb[101].mxu1  ;;  %v13444_v40 = vld [vmem:[#allocation51_spill] sm:$0xff] }
 0x796   : > { %10016 = vmatpush3.bf16.msra.mxu1 %v5535_v36  ;;  %10017 = vmatprep.mubr.msk.bf16.mxu1 %vm10936_vm1, %v13388_v27  ;;  %v3926_v59 = vpop.f32.mrb[102].mxu1  ;;  %v5192_v36 = vpack.c.bf16 %v13444_v40, %v13444_v40 }
 0x797   : > { %10027 = vmatprep.subr.bf16.mxu1 %v13388_v27  ;;  %v9864_v13 = vpop.f32.mrb[103].mxu1  ;;  %v5629_v59 = vsel %vm5251_vm3, %v5191_v33, 0 }
 0x798   : > { %10012 = vmatmul.mubr.msk.bf16.vlgmr.msra.gmra.mrb[156].mxu0 %vm5247_vm4, %v13443_v55  ;;  %v12284_v50 = vpop.f32.mrb[100].mxu0 }
 0x799   : > { %10022 = vmatpush3.bf16.msra.mxu0 %v5582_v49  ;;  %10023 = vmatprep.mubr.msk.bf16.mxu0 %vm10936_vm1, %v13388_v27  ;;  %v9845_v0 = vpop.f32.mrb[101].mxu0  ;;  %v5676_v49 = vsel %vm5251_vm3, %v5192_v36, 0 }
 0x79a   : > { %10033 = vmatprep.subr.bf16.mxu0 %v13388_v27  ;;  %v3728_v62 = vpop.f32.mrb[102].mxu0  ;;  %v13446_v0 = vld [vmem:[#allocation8_spill] sm:$0xff] }
 0x79b   : > { %v9846_v4 = vpop.f32.mrb[103].mxu0 }
 0x79c   : > { %v12293_v3 = vpop.f32.mrb[104].mxu1  ;;  %v5193_v4 = vpack.c.bf16 %v11862_v51, %v11862_v51 }
 0x79d   : > { %10018 = vmatmul.mubr.msk.bf16.vlgmr.msra.gmra.mrb[152].mxu1 %vm5247_vm4, %v13445_v8  ;;  %v9875_v47 = vpop.f32.mrb[105].mxu1 }
 0x79e   : > { %10028 = vmatpush3.bf16.msra.mxu1 %v5629_v59  ;;  %10029 = vmatprep.mubr.msk.bf16.mxu1 %vm10936_vm1, %v13388_v27  ;;  %v4058_v13 = vpop.f32.mrb[106].mxu1  ;;  %v13447_v59 = vld [vmem:[#allocation52_spill] sm:$0xff]  ;;  %v5723_v47 = vsel %vm5251_vm3, %v5193_v4, 0 }
 0x79f   : > { %10039 = vmatprep.subr.bf16.mxu1 %v13388_v27  ;;  %v9876_v55 = vpop.f32.mrb[107].mxu1  ;;  %v5194_v36 = vpack.c.bf16 %v13447_v59, %v13447_v59  ;;  %v13448_v13 = vld [vmem:[#allocation11_spill] sm:$0xff] }
 0x7a0   : > { %10024 = vmatmul.mubr.msk.bf16.vlgmr.msra.gmra.mrb[160].mxu0 %vm5247_vm4, %v13446_v0  ;;  %v12304_v62 = vpop.f32.mrb[104].mxu0  ;;  %v13449_v55 = vld [vmem:[#allocation10_spill] sm:$0xff]  ;;  %v5195_v0 = vpack.c.bf16 %v11865_v26, %v11865_v26 }
 0x7a1   : > { %10034 = vmatpush3.bf16.msra.mxu0 %v5676_v49  ;;  %10035 = vmatprep.mubr.msk.bf16.mxu0 %vm10936_vm1, %v13388_v27  ;;  %v9857_v33 = vpop.f32.mrb[105].mxu0  ;;  %v5770_v51 = vsel %vm5251_vm3, %v5194_v36, 0 }
 0x7a2   : > { %10045 = vmatprep.subr.bf16.mxu0 %v13388_v27  ;;  %v3860_v40 = vpop.f32.mrb[106].mxu0  ;;  %v5817_v36 = vsel %vm5251_vm3, %v5195_v0, 0 }
 0x7a3   : > { %v9858_v8 = vpop.f32.mrb[107].mxu0 }
 0x7a4   : > { %v13450_v8 = vld [vmem:[#allocation56_spill] sm:$0xff] }
 0x7a5   : > { %10030 = vmatmul.mubr.msk.bf16.vlgmr.msra.gmra.mrb[156].mxu1 %vm5247_vm4, %v13448_v13  ;;  %v5196_v59 = vpack.c.bf16 %v13450_v8, %v13450_v8  ;;  %v13452_v13 = vld [vmem:[#allocation12_spill] sm:$0xff] }
 0x7a6   : > { %10040 = vmatpush3.bf16.msra.mxu1 %v5723_v47  ;;  %10041 = vmatprep.mubr.msk.bf16.mxu1 %vm10936_vm1, %v13388_v27  ;;  %v13451_v47 = vld [vmem:[#allocation13_spill] sm:$0xff] }
 0x7a7   : > { %10051 = vmatprep.subr.bf16.mxu1 %v13388_v27  ;;  %v5864_v26 = vsel %vm5251_vm3, %v5196_v59, 0 }
 0x7a8   : > { %10036 = vmatmul.mubr.msk.bf16.vlgmr.msra.gmra.mrb[164].mxu0 %vm5247_vm4, %v13449_v55  ;;  %v12322_v49 = vpop.f32.mrb[108].mxu0  ;;  %v5197_v55 = vpack.c.bf16 %v11868_v17, %v11868_v17 }
 0x7a9   : > { %10046 = vmatpush3.bf16.msra.mxu0 %v5770_v51  ;;  %10047 = vmatprep.mubr.msk.bf16.mxu0 %vm10936_vm1, %v13388_v27  ;;  %v9869_v4 = vpop.f32.mrb[109].mxu0 }
 0x7aa   : > { %10057 = vmatprep.subr.bf16.mxu0 %v13388_v27  ;;  %v3992_v33 = vpop.f32.mrb[110].mxu0  ;;  %v5911_v59 = vsel %vm5251_vm3, %v5197_v55, 0 }
 0x7ab   : > { %v9870_v40 = vpop.f32.mrb[111].mxu0 }
 0x7ac   : > { %v13453_v40 = vld [vmem:[#allocation59_spill] sm:$0xff] }
 0x7ad   : > { %10042 = vmatmul.mubr.msk.bf16.vlgmr.msra.gmra.mrb[160].mxu1 %vm5247_vm4, %v13451_v47  ;;  %v5198_v8 = vpack.c.bf16 %v13453_v40, %v13453_v40  ;;  %v13455_v47 = vld [vmem:[#allocation14_spill] sm:$0xff]  ;;  %v5201_v40 = vpack.c.bf16 %v11879_v11, %v11879_v11 }
 0x7ae   : > { %10052 = vmatpush3.bf16.msra.mxu1 %v5817_v36  ;;  %10053 = vmatprep.mubr.msk.bf16.mxu1 %vm10936_vm1, %v13388_v27  ;;  %v13454_v36 = vld [vmem:[#allocation15_spill] sm:$0xff] }
 0x7af   : > { %10063 = vmatprep.subr.bf16.mxu1 %v13388_v27  ;;  %v5958_v17 = vsel %vm5251_vm3, %v5198_v8, 0  ;;  %v5202_v8 = vpack.c.bf16 %v11811_v31, %v11811_v31  ;;  %v5203_v31 = vpack.c.bf16 %v11885_v20, %v11885_v20 }
 0x7b0   : > { %10048 = vmatmul.mubr.msk.bf16.vlgmr.msra.gmra.mrb[168].mxu0 %vm5247_vm4, %v13452_v13  ;;  %v12340_v51 = vpop.f32.mrb[112].mxu0  ;;  %v13456_v13 = vld [vmem:[#allocation60_spill] sm:$0xff] }
 0x7b1   : > { %10058 = vmatpush3.bf16.msra.mxu0 %v5864_v26  ;;  %10059 = vmatprep.mubr.msk.bf16.mxu0 %vm10936_vm1, %v13388_v27  ;;  %v9881_v0 = vpop.f32.mrb[113].mxu0  ;;  %v5199_v26 = vpack.c.bf16 %v11873_v52, %v11873_v52  ;;  %v5200_v55 = vpack.c.bf16 %v13456_v13, %v13456_v13  ;;  %v6146_v11 = vsel %vm5251_vm3, %v5202_v8, 0 }
 0x7b2   : > { %10069 = vmatprep.subr.bf16.mxu0 %v13388_v27  ;;  %v4124_v4 = vpop.f32.mrb[114].mxu0 }
 0x7b3   : > { %v9882_v33 = vpop.f32.mrb[115].mxu0  ;;  %v6005_v0 = vsel %vm5251_vm3, %v5199_v26, 0  ;;  %v13457_v4 = vld [vmem:[#allocation17_spill] sm:$0xff]  ;;  %v6052_v52 = vsel %vm5251_vm3, %v5200_v55, 0 }
 0x7b4   : > { %v13458_v33 = vld [vmem:[#allocation16_spill] sm:$0xff] }
 0x7b5   : > { %10054 = vmatmul.mubr.msk.bf16.vlgmr.msra.gmra.mrb[164].mxu1 %vm5247_vm4, %v13454_v36  ;;  %v13459_v36 = vld [vmem:[#allocation20_spill] sm:$0xff] }
 0x7b6   : > { %10064 = vmatpush3.bf16.msra.mxu1 %v5911_v59  ;;  %10065 = vmatprep.mubr.msk.bf16.mxu1 %vm10936_vm1, %v13388_v27  ;;  %v6099_v59 = vsel %vm5251_vm3, %v5201_v40, 0  ;;  %v13462_v40 = vld [vmem:[#allocation24_spill] sm:$0xff] }
 0x7b7   : > { %10075 = vmatprep.subr.bf16.mxu1 %v13388_v27 }
 0x7b8   : > { %10060 = vmatmul.mubr.msk.bf16.vlgmr.msra.gmra.mrb[172].mxu0 %vm5247_vm4, %v13455_v47  ;;  %v13460_v47 = vld [vmem:[#allocation22_spill] sm:$0xff] }
 0x7b9   : > { %10070 = vmatpush3.bf16.msra.mxu0 %v5958_v17  ;;  %10071 = vmatprep.mubr.msk.bf16.mxu0 %vm10936_vm1, %v13388_v27 }
 0x7ba   : > { %10081 = vmatprep.subr.bf16.mxu0 %v13388_v27 }
 0x7bd   : > { %10066 = vmatmul.mubr.msk.bf16.vlgmr.msra.gmra.mrb[168].mxu1 %vm5247_vm4, %v13457_v4  ;;  %v6193_v4 = vsel %vm5251_vm3, %v5203_v31, 0  ;;  %v13463_v31 = vld [vmem:[#allocation25_spill] sm:$0xff] }
 0x7be   : > { %10076 = vmatpush3.bf16.msra.mxu1 %v6005_v0  ;;  %10077 = vmatprep.mubr.msk.bf16.mxu1 %vm10936_vm1, %v13388_v27  ;;  %v5204_v0 = vpack.c.bf16 %v11826_v29, %v11826_v29  ;;  %v5205_v29 = vpack.c.bf16 %v12052_v41, %v12052_v41 }
 0x7bf   : > { %10087 = vmatprep.subr.bf16.mxu1 %v13388_v27 }
 0x7c0   : > { %10072 = vmatmul.mubr.msk.bf16.vlgmr.msra.gmra.mrb[176].mxu0 %vm5247_vm4, %v13458_v33  ;;  %v6240_v20 = vsel %vm5251_vm3, %v5204_v0, 0  ;;  %v13464_v0 = vld [vmem:[#allocation34_spill] sm:$0xff] }
 0x7c1   : > { %10082 = vmatpush3.bf16.msra.mxu0 %v6052_v52  ;;  %10083 = vmatprep.mubr.msk.bf16.mxu0 %vm10936_vm1, %v13388_v27  ;;  %v13461_v52 = vld [vmem:[#allocation23_spill] sm:$0xff] }
 0x7c2   : > { %10093 = vmatprep.subr.bf16.mxu0 %v13388_v27 }
 0x7c5   : > { %10078 = vmatmul.mubr.msk.bf16.vlgmr.msra.gmra.mrb[172].mxu1 %vm5247_vm4, %v13459_v36 }
 0x7c6   : > { %10088 = vmatpush3.bf16.msra.mxu1 %v6099_v59  ;;  %10089 = vmatprep.mubr.msk.bf16.mxu1 %vm10936_vm1, %v13388_v27 }
 0x7c7   : > { %10099 = vmatprep.subr.bf16.mxu1 %v13388_v27 }
 0x7c8   : > { %v12388_v17 = vpop.f32.mrb[108].mxu1  ;;  %10084 = vmatmul.mubr.msk.bf16.vlgmr.msra.gmra.mrb[180].mxu0 %vm5247_vm4, %v13460_v47  ;;  %v6287_v47 = vsel %vm5251_vm3, %v5205_v29, 0 }
 0x7c9   : > { %10094 = vmatpush3.bf16.msra.mxu0 %v6146_v11  ;;  %v9887_v26 = vpop.f32.mrb[109].mxu1  ;;  %10095 = vmatprep.mubr.msk.bf16.mxu0 %vm10936_vm1, %v13388_v27  ;;  %v5206_v11 = vpack.c.bf16 %v11848_v7, %v11848_v7  ;;  %v5207_v7 = vpack.c.bf16 %v12060_v28, %v12060_v28 }
 0x7ca   : > { %v4190_v13 = vpop.f32.mrb[110].mxu1  ;;  %10105 = vmatprep.subr.bf16.mxu0 %v13388_v27 }
 0x7cb   : > { %v9888_v55 = vpop.f32.mrb[111].mxu1  ;;  %v6334_v26 = vsel %vm5251_vm3, %v5206_v11, 0 }
 0x7cd   : > { %10090 = vmatmul.mubr.msk.bf16.vlgmr.msra.gmra.mrb[176].mxu1 %vm5247_vm4, %v13461_v52 }
 0x7ce   : > { %10100 = vmatpush3.bf16.msra.mxu1 %v6193_v4  ;;  %10101 = vmatprep.mubr.msk.bf16.mxu1 %vm10936_vm1, %v13388_v27 }
 0x7cf   : > { %10111 = vmatprep.subr.bf16.mxu1 %v13388_v27 }
 0x7d0   : > { %v12406_v33 = vpop.f32.mrb[112].mxu1  ;;  %10096 = vmatmul.mubr.msk.bf16.vlgmr.msra.gmra.mrb[184].mxu0 %vm5247_vm4, %v13462_v40 }
 0x7d1   : > { %10106 = vmatpush3.bf16.msra.mxu0 %v6240_v20  ;;  %v9899_v8 = vpop.f32.mrb[113].mxu1  ;;  %10107 = vmatprep.mubr.msk.bf16.mxu0 %vm10936_vm1, %v13388_v27 }
 0x7d2   : > { %v4322_v59 = vpop.f32.mrb[114].mxu1  ;;  %10117 = vmatprep.subr.bf16.mxu0 %v13388_v27  ;;  %v5208_v8 = vpack.c.bf16 %v11911_v43, %v11911_v43  ;;  %v5209_v43 = vpack.c.bf16 %v12068_v56, %v12068_v56 }
 0x7d3   : > { %v9900_v36 = vpop.f32.mrb[115].mxu1  ;;  %v6381_v59 = vsel %vm5251_vm3, %v5207_v7, 0 }
 0x7d4   : > { %v13465_v36 = vld [vmem:[#allocation35_spill] sm:$0xff]  ;;  %v6428_v11 = vsel %vm5251_vm3, %v5208_v8, 0 }
 0x7d5   : > { %10102 = vmatmul.mubr.msk.bf16.vlgmr.msra.gmra.mrb[180].mxu1 %vm5247_vm4, %v13463_v31 }
 0x7d6   : > { %10112 = vmatpush3.bf16.msra.mxu1 %v6287_v47  ;;  %10113 = vmatprep.mubr.msk.bf16.mxu1 %vm10936_vm1, %v13388_v27 }
 0x7d7   : > { %v12422_v41 = vpop.f32.mrb[116].mxu0  ;;  %10123 = vmatprep.subr.bf16.mxu1 %v13388_v27 }
 0x7d8   : > { %v9893_v13 = vpop.f32.mrb[117].mxu0  ;;  %v12426_v55 = vpop.f32.mrb[116].mxu1  ;;  %10108 = vmatmul.mubr.msk.bf16.vlgmr.msra.gmra.mrb[188].mxu0 %vm5247_vm4, %v13464_v0 }
 0x7d9   : > { %10118 = vmatpush3.bf16.msra.mxu0 %v6334_v26  ;;  %v4256_v4 = vpop.f32.mrb[118].mxu0  ;;  %v9911_v52 = vpop.f32.mrb[117].mxu1  ;;  %10119 = vmatprep.mubr.msk.bf16.mxu0 %vm10936_vm1, %v13388_v27  ;;  %v13466_v26 = vld [vmem:[#allocation36_spill] sm:$0xff] }
 0x7da   : > { %v9894_v20 = vpop.f32.mrb[119].mxu0  ;;  %v4454_v40 = vpop.f32.mrb[118].mxu1  ;;  %10129 = vmatprep.subr.bf16.mxu0 %v13388_v27 }
 0x7db   : > { %v9912_v29 = vpop.f32.mrb[119].mxu1  ;;  %v5210_v20 = vpack.c.bf16 %v12004_v39, %v12004_v39  ;;  %v6475_v40 = vsel %vm5251_vm3, %v5209_v43, 0  ;;  %v5211_v39 = vpack.c.bf16 %v12178_v44, %v12178_v44 }
 0x7dd   : > { %10114 = vmatmul.mubr.msk.bf16.vlgmr.msra.gmra.mrb[184].mxu1 %vm5247_vm4, %v13465_v36  ;;  %v6522_v29 = vsel %vm5251_vm3, %v5210_v20, 0  ;;  %v13467_v36 = vld [vmem:[#allocation37_spill] sm:$0xff]  ;;  %v5214_v20 = vpack.c.bf16 %v12176_v37, %v12176_v37  ;;  %v5215_v37 = vpack.c.bf16 %v12191_v1, %v12191_v1 }
 0x7de   : > { %10124 = vmatpush3.bf16.msra.mxu1 %v6381_v59  ;;  %10125 = vmatprep.mubr.msk.bf16.mxu1 %vm10936_vm1, %v13388_v27 }
 0x7df   : > { %v12442_v28 = vpop.f32.mrb[120].mxu0  ;;  %10135 = vmatprep.subr.bf16.mxu1 %v13388_v27 }
 0x7e0   : > { %v9905_v47 = vpop.f32.mrb[121].mxu0  ;;  %v12446_v31 = vpop.f32.mrb[120].mxu1  ;;  %10120 = vmatmul.mubr.msk.bf16.vlgmr.msra.gmra.mrb[192].mxu0 %vm5247_vm4, %v13466_v26 }
 0x7e1   : > { %10130 = vmatpush3.bf16.msra.mxu0 %v6428_v11  ;;  %v4388_v13 = vpop.f32.mrb[122].mxu0  ;;  %v9923_v0 = vpop.f32.mrb[121].mxu1  ;;  %10131 = vmatprep.mubr.msk.bf16.mxu0 %vm10936_vm1, %v13388_v27 }
 0x7e2   : > { %v9906_v7 = vpop.f32.mrb[123].mxu0  ;;  %v4586_v4 = vpop.f32.mrb[122].mxu1  ;;  %10141 = vmatprep.subr.bf16.mxu0 %v13388_v27  ;;  %v5212_v13 = vpack.c.bf16 %v12135_v5, %v12135_v5  ;;  %v6569_v0 = vsel %vm5251_vm3, %v5211_v39, 0  ;;  %v5213_v5 = vpack.c.bf16 %v12189_v57, %v12189_v57  ;;  %v6710_v57 = vsel %vm5251_vm3, %v5214_v20, 0 }
 0x7e3   : > { %v9924_v52 = vpop.f32.mrb[123].mxu1  ;;  %v5216_v39 = vpack.c.bf16 %v12180_v14, %v12180_v14  ;;  %v5218_v14 = vpack.c.bf16 %v12187_v25, %v12187_v25  ;;  %v5220_v25 = vpack.c.bf16 %v12244_v9, %v12244_v9  ;;  %v5223_v20 = vpack.c.bf16 %v12199_v2, %v12199_v2 }
 0x7e4   : > { %v6616_v7 = vsel %vm5251_vm3, %v5212_v13, 0  ;;  %v13471_v13 = vld [vmem:[#allocation38_spill] sm:$0xff]  ;;  %v5225_v2 = vpack.c.bf16 %v12253_v21, %v12253_v21  ;;  %v5227_v21 = vpack.c.bf16 %v12273_v61, %v12273_v61 }
 0x7e5   : > { %10126 = vmatmul.mubr.msk.bf16.vlgmr.msra.gmra.mrb[188].mxu1 %vm5247_vm4, %v11430_v10  ;;  %v6804_v1 = vsel %vm5251_vm3, %v5216_v39, 0 }
 0x7e6   : > { %10136 = vmatpush3.bf16.msra.mxu1 %v6475_v40  ;;  %10137 = vmatprep.mubr.msk.bf16.mxu1 %vm10936_vm1, %v13388_v27  ;;  %v6663_v40 = vsel %vm5251_vm3, %v5213_v5, 0  ;;  %v13473_v5 = vld [vmem:[#allocation39_spill] sm:$0xff] }
 0x7e7   : > { %v12462_v56 = vpop.f32.mrb[124].mxu0  ;;  %10147 = vmatprep.subr.bf16.mxu1 %v13388_v27 }
 0x7e8   : > { %v9917_v8 = vpop.f32.mrb[125].mxu0  ;;  %v12466_v59 = vpop.f32.mrb[124].mxu1  ;;  %10132 = vmatmul.mubr.msk.bf16.vlgmr.msra.gmra.mrb[196].mxu0 %vm5247_vm4, %v13467_v36 }
 0x7e9   : > { %10142 = vmatpush3.bf16.msra.mxu0 %v6522_v29  ;;  %v4520_v10 = vpop.f32.mrb[126].mxu0  ;;  %v9935_v11 = vpop.f32.mrb[125].mxu1  ;;  %10143 = vmatprep.mubr.msk.bf16.mxu0 %vm10936_vm1, %v13388_v27  ;;  %v13468_v8 = vld [vmem:[#allocation41_spill] sm:$0xff] }
 0x7ea   : > { %v9918_v47 = vpop.f32.mrb[127].mxu0  ;;  %v4718_v26 = vpop.f32.mrb[126].mxu1  ;;  %10153 = vmatprep.subr.bf16.mxu0 %v13388_v27  ;;  %v6757_v10 = vsel %vm5251_vm3, %v5215_v37, 0  ;;  %v13469_v11 = vld [vmem:[#allocation43_spill] sm:$0xff]  ;;  %v7321_v37 = vsel %vm5251_vm3, %v5227_v21, 0 }
 0x7eb   : > { %v9936_v43 = vpop.f32.mrb[127].mxu1  ;;  %v13470_v47 = vld [vmem:[#allocation44_spill] sm:$0xff]  ;;  %v5217_v26 = vpack.c.bf16 %v12193_v15, %v12193_v15  ;;  %v6898_v15 = vsel %vm5251_vm3, %v5218_v14, 0  ;;  %v13479_v14 = vld [vmem:[#allocation50_spill] sm:$0xff] }
 0x7ed   : > { %10138 = vmatmul.mubr.msk.bf16.vlgmr.msra.gmra.mrb[192].mxu1 %vm5247_vm4, %v11447_v58  ;;  %v6851_v43 = vsel %vm5251_vm3, %v5217_v26, 0 }
 0x7ee   : > { %10148 = vmatpush3.bf16.msra.mxu1 %v6569_v0  ;;  %10149 = vmatprep.mubr.msk.bf16.mxu1 %vm10936_vm1, %v13388_v27  ;;  %v13472_v0 = vld [vmem:[#allocation46_spill] sm:$0xff] }
 0x7ef   : > { %v12482_v44 = vpop.f32.mrb[128].mxu0  ;;  %10159 = vmatprep.subr.bf16.mxu1 %v13388_v27 }
 0x7f0   : > { %v9929_v4 = vpop.f32.mrb[129].mxu0  ;;  %10144 = vmatmul.mubr.msk.bf16.vlgmr.msra.gmra.mrb[200].mxu0 %vm5247_vm4, %v11455_v54 }
 0x7f1   : > { %10154 = vmatpush3.bf16.msra.mxu0 %v6616_v7  ;;  %v4652_v52 = vpop.f32.mrb[130].mxu0  ;;  %10155 = vmatprep.mubr.msk.bf16.mxu0 %vm10936_vm1, %v13388_v27  ;;  %v5219_v7 = vpack.c.bf16 %v12195_v34, %v12195_v34  ;;  %v6992_v34 = vsel %vm5251_vm3, %v5220_v25, 0 }
 0x7f2   : > { %v9930_v58 = vpop.f32.mrb[131].mxu0  ;;  %10165 = vmatprep.subr.bf16.mxu0 %v13388_v27  ;;  %v5221_v52 = vpack.c.bf16 %v12197_v35, %v12197_v35 }
 0x7f3   : > { %v6945_v4 = vsel %vm5251_vm3, %v5219_v7, 0  ;;  %v13474_v58 = vld [vmem:[#allocation40_spill] sm:$0xff]  ;;  %v5234_v7 = vpack.c.bf16 %v12442_v28, %v12442_v28  ;;  %v5235_v28 = vpack.c.bf16 %v12426_v55, %v12426_v55 }
 0x7f4   : > { %v7039_v9 = vsel %vm5251_vm3, %v5221_v52, 0 }
 0x7f5   : > { %10150 = vmatmul.mubr.msk.bf16.vlgmr.msra.gmra.mrb[196].mxu1 %vm5247_vm4, %v11469_v30 }
 0x7f6   : > { %10160 = vmatpush3.bf16.msra.mxu1 %v6663_v40  ;;  %10161 = vmatprep.mubr.msk.bf16.mxu1 %vm10936_vm1, %v13388_v27  ;;  %v7133_v40 = vsel %vm5251_vm3, %v5223_v20, 0 }
 0x7f7   : > { %v12500_v54 = vpop.f32.mrb[132].mxu0  ;;  %10171 = vmatprep.subr.bf16.mxu1 %v13388_v27 }
 0x7f8   : > { %v9941_v29 = vpop.f32.mrb[133].mxu0  ;;  %10156 = vmatmul.mubr.msk.bf16.vlgmr.msra.gmra.mrb[204].mxu0 %vm5247_vm4, %v13468_v8  ;;  %v13476_v8 = vld [vmem:[#allocation45_spill] sm:$0xff] }
 0x7f9   : > { %10166 = vmatpush3.bf16.msra.mxu0 %v6710_v57  ;;  %v4784_v36 = vpop.f32.mrb[134].mxu0  ;;  %10167 = vmatprep.mubr.msk.bf16.mxu0 %vm10936_vm1, %v13388_v27  ;;  %v13475_v57 = vld [vmem:[#allocation42_spill] sm:$0xff]  ;;  %v7227_v29 = vsel %vm5251_vm3, %v5225_v2, 0 }
 0x7fa   : > { %v9942_v30 = vpop.f32.mrb[135].mxu0  ;;  %10177 = vmatprep.subr.bf16.mxu0 %v13388_v27  ;;  %v13477_v36 = vld [vmem:[#allocation48_spill] sm:$0xff] }
 0x7fd   : > { %10162 = vmatmul.mubr.msk.bf16.vlgmr.msra.gmra.mrb[200].mxu1 %vm5247_vm4, %v13469_v11  ;;  %v5230_v11 = vpack.c.bf16 %v12340_v51, %v12340_v51  ;;  %v5232_v51 = vpack.c.bf16 %v12422_v41, %v12422_v41  ;;  %v5233_v41 = vpack.c.bf16 %v12406_v33, %v12406_v33 }
 0x7fe   : > { %10172 = vmatpush3.bf16.msra.mxu1 %v6757_v10  ;;  %10173 = vmatprep.mubr.msk.bf16.mxu1 %vm10936_vm1, %v13388_v27 }
 0x7ff   : > { %10183 = vmatprep.subr.bf16.mxu1 %v13388_v27  ;;  %v7603_v25 = vsel %vm5251_vm3, %v5233_v41, 0  ;;  %v13481_v41 = vld [vmem:[#allocation21_spill] sm:$0xff] }
 0x800   : > { %10168 = vmatmul.mubr.msk.bf16.vlgmr.msra.gmra.mrb[208].mxu0 %vm5247_vm4, %v13470_v47  ;;  %v5231_v47 = vpack.c.bf16 %v12388_v17, %v12388_v17  ;;  %v7556_v17 = vsel %vm5251_vm3, %v5232_v51, 0 }
 0x801   : > { %10178 = vmatpush3.bf16.msra.mxu0 %v6804_v1  ;;  %10179 = vmatprep.mubr.msk.bf16.mxu0 %vm10936_vm1, %v13388_v27 }
 0x802   : > { %10189 = vmatprep.subr.bf16.mxu0 %v13388_v27  ;;  %v7509_v26 = vsel %vm5251_vm3, %v5231_v47, 0 }
 0x805   : > { %10174 = vmatmul.mubr.msk.bf16.vlgmr.msra.gmra.mrb[204].mxu1 %vm5247_vm4, %v13471_v13  ;;  %v13480_v13 = vld [vmem:[#allocation47_spill] sm:$0xff] }
 0x806   : > { %10184 = vmatpush3.bf16.msra.mxu1 %v6851_v43  ;;  %10185 = vmatprep.mubr.msk.bf16.mxu1 %vm10936_vm1, %v13388_v27 }
 0x807   : > { %10195 = vmatprep.subr.bf16.mxu1 %v13388_v27 }
 0x808   : > { %10180 = vmatmul.mubr.msk.bf16.vlgmr.msra.gmra.mrb[212].mxu0 %vm5247_vm4, %v13472_v0 }
 0x809   : > { %10190 = vmatpush3.bf16.msra.mxu0 %v6898_v15  ;;  %10191 = vmatprep.mubr.msk.bf16.mxu0 %vm10936_vm1, %v13388_v27 }
 0x80a   : > { %10201 = vmatprep.subr.bf16.mxu0 %v13388_v27 }
 0x80d   : > { %10186 = vmatmul.mubr.msk.bf16.vlgmr.msra.gmra.mrb[208].mxu1 %vm5247_vm4, %v11844_v24  ;;  %v5222_v24 = vpack.c.bf16 %v12264_v46, %v12264_v46  ;;  %v5224_v46 = vpack.c.bf16 %v12284_v50, %v12284_v50  ;;  %v5226_v50 = vpack.c.bf16 %v12304_v62, %v12304_v62  ;;  %v5228_v62 = vpack.c.bf16 %v12322_v49, %v12322_v49 }
 0x80e   : > { %10196 = vmatpush3.bf16.msra.mxu1 %v6945_v4  ;;  %10197 = vmatprep.mubr.msk.bf16.mxu1 %vm10936_vm1, %v13388_v27  ;;  %v5229_v49 = vpack.c.bf16 %v12293_v3, %v12293_v3  ;;  %v7462_v3 = vsel %vm5251_vm3, %v5230_v11, 0  ;;  %v7650_v4 = vsel %vm5251_vm3, %v5234_v7, 0 }
 0x80f   : > { %10207 = vmatprep.subr.bf16.mxu1 %v13388_v27  ;;  %v7086_v35 = vsel %vm5251_vm3, %v5222_v24, 0  ;;  %v5236_v24 = vpack.c.bf16 %v12462_v56, %v12462_v56  ;;  %v5237_v56 = vpack.c.bf16 %v12446_v31, %v12446_v31 }
 0x810   : > { %10192 = vmatmul.mubr.msk.bf16.vlgmr.msra.gmra.mrb[216].mxu0 %vm5247_vm4, %v13473_v5  ;;  %v7415_v1 = vsel %vm5251_vm3, %v5229_v49, 0 }
 0x811   : > { %10202 = vmatpush3.bf16.msra.mxu0 %v6992_v34  ;;  %10203 = vmatprep.mubr.msk.bf16.mxu0 %vm10936_vm1, %v13388_v27 }
 0x812   : > { %10213 = vmatprep.subr.bf16.mxu0 %v13388_v27 }
 0x815   : > { %10198 = vmatmul.mubr.msk.bf16.vlgmr.msra.gmra.mrb[212].mxu1 %vm5247_vm4, %v13474_v58  ;;  %v7697_v58 = vsel %vm5251_vm3, %v5235_v28, 0 }
 0x816   : > { %10208 = vmatpush3.bf16.msra.mxu1 %v7039_v9  ;;  %10209 = vmatprep.mubr.msk.bf16.mxu1 %vm10936_vm1, %v13388_v27 }
 0x817   : > { %10219 = vmatprep.subr.bf16.mxu1 %v13388_v27 }
 0x818   : > { %10204 = vmatmul.mubr.msk.bf16.vlgmr.msra.gmra.mrb[220].mxu0 %vm5247_vm4, %v11877_v45  ;;  %v7180_v45 = vsel %vm5251_vm3, %v5224_v46, 0 }
 0x819   : > { %10214 = vmatpush3.bf16.msra.mxu0 %v7086_v35  ;;  %10215 = vmatprep.mubr.msk.bf16.mxu0 %vm10936_vm1, %v13388_v27  ;;  %v7744_v35 = vsel %vm5251_vm3, %v5236_v24, 0 }
 0x81a   : > { %10225 = vmatprep.subr.bf16.mxu0 %v13388_v27 }
 0x81d   : > { %10210 = vmatmul.mubr.msk.bf16.vlgmr.msra.gmra.mrb[216].mxu1 %vm5247_vm4, %v13475_v57 }
 0x81e   : > { %10220 = vmatpush3.bf16.msra.mxu1 %v7133_v40  ;;  %10221 = vmatprep.mubr.msk.bf16.mxu1 %vm10936_vm1, %v13388_v27 }
 0x81f   : > { %10231 = vmatprep.subr.bf16.mxu1 %v13388_v27 }
 0x820   : > { %10216 = vmatmul.mubr.msk.bf16.vlgmr.msra.gmra.mrb[224].mxu0 %vm5247_vm4, %v11524_v6  ;;  %v7274_v6 = vsel %vm5251_vm3, %v5226_v50, 0 }
 0x821   : > { %10226 = vmatpush3.bf16.msra.mxu0 %v7180_v45  ;;  %10227 = vmatprep.mubr.msk.bf16.mxu0 %vm10936_vm1, %v13388_v27  ;;  %v5238_v45 = vpack.c.bf16 %v12482_v44, %v12482_v44  ;;  %v5239_v44 = vpack.c.bf16 %v12466_v59, %v12466_v59 }
 0x822   : > { %10237 = vmatprep.subr.bf16.mxu0 %v13388_v27 }
 0x825   : > { %10222 = vmatmul.mubr.msk.bf16.vlgmr.msra.gmra.mrb[220].mxu1 %vm5247_vm4, %v13476_v8 }
 0x826   : > { %10232 = vmatpush3.bf16.msra.mxu1 %v7227_v29  ;;  %10233 = vmatprep.mubr.msk.bf16.mxu1 %vm10936_vm1, %v13388_v27  ;;  %v7838_v29 = vsel %vm5251_vm3, %v5238_v45, 0 }
 0x827   : > { %10243 = vmatprep.subr.bf16.mxu1 %v13388_v27 }
 0x828   : > { %10228 = vmatmul.mubr.msk.bf16.vlgmr.msra.gmra.mrb[228].mxu0 %vm5247_vm4, %v11559_v18  ;;  %v7368_v18 = vsel %vm5251_vm3, %v5228_v62, 0 }
 0x829   : > { %10238 = vmatpush3.bf16.msra.mxu0 %v7274_v6  ;;  %10239 = vmatprep.mubr.msk.bf16.mxu0 %vm10936_vm1, %v13388_v27 }
 0x82a   : > { %10249 = vmatprep.subr.bf16.mxu0 %v13388_v27 }
 0x82d   : > { %10234 = vmatmul.mubr.msk.bf16.vlgmr.msra.gmra.mrb[224].mxu1 %vm5247_vm4, %v13477_v36 }
 0x82e   : > { %10244 = vmatpush3.bf16.msra.mxu1 %v7321_v37  ;;  %10245 = vmatprep.mubr.msk.bf16.mxu1 %vm10936_vm1, %v13388_v27  ;;  %v5240_v37 = vpack.c.bf16 %v12500_v54, %v12500_v54 }
 0x82f   : > { %10255 = vmatprep.subr.bf16.mxu1 %v13388_v27 }
 0x830   : > { %10240 = vmatmul.mubr.msk.bf16.vlgmr.msra.gmra.mrb[232].mxu0 %vm5247_vm4, %v11586_v19  ;;  %v12618_v61 = vpop.f32.mrb[136].mxu0  ;;  %v13478_v19 = vld [vmem:[#allocation49_spill] sm:$0xff]  ;;  %v7932_v49 = vsel %vm5251_vm3, %v5240_v37, 0 }
 0x831   : > { %10250 = vmatpush3.bf16.msra.mxu0 %v7368_v18  ;;  %10251 = vmatprep.mubr.msk.bf16.mxu0 %vm10936_vm1, %v13388_v27  ;;  %v9953_v30 = vpop.f32.mrb[137].mxu0 }
 0x832   : > { %10261 = vmatprep.subr.bf16.mxu0 %v13388_v27  ;;  %v4916_v39 = vpop.f32.mrb[138].mxu0 }
 0x833   : > { %v9954_v10 = vpop.f32.mrb[139].mxu0 }
 0x835   : > { %10246 = vmatmul.mubr.msk.bf16.vlgmr.msra.gmra.mrb[228].mxu1 %vm5247_vm4, %v13478_v19 }
 0x836   : > { %10256 = vmatpush3.bf16.msra.mxu1 %v7415_v1  ;;  %10257 = vmatprep.mubr.msk.bf16.mxu1 %vm10936_vm1, %v13388_v27  ;;  %v5242_v1 = vpack.c.bf16 %v12618_v61, %v12618_v61 }
 0x837   : > { %10267 = vmatprep.subr.bf16.mxu1 %v13388_v27 }
 0x838   : > { %10252 = vmatmul.mubr.msk.bf16.vlgmr.msra.gmra.mrb[236].mxu0 %vm5247_vm4, %v11598_v48  ;;  %v8026_v51 = vsel %vm5251_vm3, %v5242_v1, 0 }
 0x839   : > { %10262 = vmatpush3.bf16.msra.mxu0 %v7462_v3  ;;  %10263 = vmatprep.mubr.msk.bf16.mxu0 %vm10936_vm1, %v13388_v27 }
 0x83a   : > { %10273 = vmatprep.subr.bf16.mxu0 %v13388_v27 }
 0x83d   : > { %10258 = vmatmul.mubr.msk.bf16.vlgmr.msra.gmra.mrb[232].mxu1 %vm5247_vm4, %v13479_v14 }
 0x83e   : > { %10268 = vmatpush3.bf16.msra.mxu1 %v7509_v26  ;;  %10269 = vmatprep.mubr.msk.bf16.mxu1 %vm10936_vm1, %v13388_v27 }
 0x83f   : > { %v12648_v48 = vpop.f32.mrb[128].mxu1  ;;  %10279 = vmatprep.subr.bf16.mxu1 %v13388_v27 }
 0x840   : > { %v9947_v43 = vpop.f32.mrb[129].mxu1  ;;  %10264 = vmatmul.mubr.msk.bf16.vlgmr.msra.gmra.mrb[240].mxu0 %vm5247_vm4, %v13480_v13  ;;  %v5241_v54 = vpack.c.bf16 %v12648_v48, %v12648_v48 }
 0x841   : > { %10274 = vmatpush3.bf16.msra.mxu0 %v7556_v17  ;;  %v4850_v15 = vpop.f32.mrb[130].mxu1  ;;  %10275 = vmatprep.mubr.msk.bf16.mxu0 %vm10936_vm1, %v13388_v27 }
 0x842   : > { %v9948_v0 = vpop.f32.mrb[131].mxu1  ;;  %10285 = vmatprep.subr.bf16.mxu0 %v13388_v27 }
 0x845   : > { %10270 = vmatmul.mubr.msk.bf16.vlgmr.msra.gmra.mrb[236].mxu1 %vm5247_vm4, %v11899_v23 }
 0x846   : > { %10280 = vmatpush3.bf16.msra.mxu1 %v7603_v25  ;;  %10281 = vmatprep.mubr.msk.bf16.mxu1 %vm10936_vm1, %v13388_v27 }
 0x847   : > { %v12666_v33 = vpop.f32.mrb[132].mxu1  ;;  %10291 = vmatprep.subr.bf16.mxu1 %v13388_v27 }
 0x848   : > { %v9959_v34 = vpop.f32.mrb[133].mxu1  ;;  %10276 = vmatmul.mubr.msk.bf16.vlgmr.msra.gmra.mrb[244].mxu0 %vm5247_vm4, %v11617_v63  ;;  %v5243_v61 = vpack.c.bf16 %v12666_v33, %v12666_v33  ;;  %v13482_v33 = vld [vmem:[#allocation18_spill] sm:$0xff] }
 0x849   : > { %10286 = vmatpush3.bf16.msra.mxu0 %v7650_v4  ;;  %v4982_v5 = vpop.f32.mrb[134].mxu1  ;;  %10287 = vmatprep.mubr.msk.bf16.mxu0 %vm10936_vm1, %v13388_v27 }
 0x84a   : > { %v9960_v23 = vpop.f32.mrb[135].mxu1  ;;  %10297 = vmatprep.subr.bf16.mxu0 %v13388_v27 }
 0x84b   : > { %v12677_v52 = vpop.f32.mrb[140].mxu0 }
 0x84c   : > { %v9965_v9 = vpop.f32.mrb[141].mxu0  ;;  %v5244_v43 = vpack.c.bf16 %v12677_v52, %v12677_v52 }
 0x84d   : > { %10282 = vmatmul.mubr.msk.bf16.vlgmr.msra.gmra.mrb[240].mxu1 %vm5247_vm4, %v11907_v12  ;;  %v5048_v63 = vpop.f32.mrb[142].mxu0 }
 0x84e   : > { %10292 = vmatpush3.bf16.msra.mxu1 %v7697_v58  ;;  %v9966_v55 = vpop.f32.mrb[143].mxu0  ;;  %10293 = vmatprep.mubr.msk.bf16.mxu1 %vm10936_vm1, %v13388_v27  ;;  %v8120_v7 = vsel %vm5251_vm3, %v5244_v43, 0  ;;  %v13483_v58 = vld [vmem:[#allocation27_spill] sm:$0xff] }
 0x84f   : > { %10303 = vmatprep.subr.bf16.mxu1 %v13388_v27 }
 0x850   : > { %v12688_v20 = vpop.f32.mrb[136].mxu1  ;;  %10288 = vmatmul.mubr.msk.bf16.vlgmr.msra.gmra.mrb[248].mxu0 %vm5247_vm4, %v11625_v22  ;;  %v7791_v22 = vsel %vm5251_vm3, %v5237_v56, 0  ;;  %v13484_v56 = vld [vmem:[#allocation19_spill] sm:$0xff] }
 0x851   : > { %v9971_v46 = vpop.f32.mrb[137].mxu1  ;;  %10298 = vmatpush3.bf16.msra.mxu0 %v7744_v35  ;;  %10299 = vmatprep.mubr.msk.bf16.mxu0 %vm10936_vm1, %v13388_v27  ;;  %v5245_v4 = vpack.c.bf16 %v12688_v20, %v12688_v20 }
 0x852   : > { %v5114_v12 = vpop.f32.mrb[138].mxu1  ;;  %10309 = vmatprep.subr.bf16.mxu0 %v13388_v27 }
 0x853   : > { %v9972_v40 = vpop.f32.mrb[139].mxu1  ;;  %v12697_v57 = vpop.f32.mrb[144].mxu0  ;;  %v8167_v9 = vsel %vm5251_vm3, %v5245_v4, 0 }
 0x854   : > { %v9977_v2 = vpop.f32.mrb[145].mxu0  ;;  %v5246_v52 = vpack.c.bf16 %v12697_v57, %v12697_v57 }
 0x855   : > { %10294 = vmatmul.mubr.msk.bf16.vlgmr.msra.gmra.mrb[244].mxu1 %vm5247_vm4, %v11917_v16  ;;  %v5180_v31 = vpop.f32.mrb[146].mxu0  ;;  %v13485_v2 = vld [vmem:[#allocation28_spill] sm:$0xff] }
 0x856   : > { %10304 = vmatpush3.bf16.msra.mxu1 %v7791_v22  ;;  %v9978_v50 = vpop.f32.mrb[147].mxu0  ;;  %10305 = vmatprep.mubr.msk.bf16.mxu1 %vm10936_vm1, %v13388_v27  ;;  %v8214_v35 = vsel %vm5251_vm3, %v5246_v52, 0 }
 0x857   : > { %10315 = vmatprep.subr.bf16.mxu1 %v13388_v27 }
 0x858   : > { %v12708_v8 = vpop.f32.mrb[140].mxu1  ;;  %10300 = vmatmul.mubr.msk.bf16.vlgmr.msra.gmra.mrb[252].mxu0 %vm5247_vm4, %v11637_v60  ;;  %v7885_v60 = vsel %vm5251_vm3, %v5239_v44, 0 }
 0x859   : > { %v9983_v6 = vpop.f32.mrb[141].mxu1  ;;  %10310 = vmatpush3.bf16.msra.mxu0 %v7838_v29  ;;  %10311 = vmatprep.mubr.msk.bf16.mxu0 %vm10936_vm1, %v13388_v27  ;;  %v13486_v29 = vld [vmem:[#allocation26_spill] sm:$0xff] }
 0x85a   : > { %v12716_v16 = vpop.f32.mrb[142].mxu1  ;;  %10321 = vmatprep.subr.bf16.mxu0 %v13388_v27 }
 0x85b   : > { %v9984_v21 = vpop.f32.mrb[143].mxu1  ;;  %v12719_v62 = vpop.f32.mrb[148].mxu0 }
 0x85c   : > { %v9989_v36 = vpop.f32.mrb[149].mxu0 }
 0x85d   : > { %10306 = vmatmul.mubr.msk.bf16.vlgmr.msra.gmra.mrb[248].mxu1 %vm5247_vm4, %v11925_v42  ;;  %v12726_v59 = vpop.f32.mrb[150].mxu0 }
 0x85e   : > { %10316 = vmatpush3.bf16.msra.mxu1 %v7885_v60  ;;  %v9990_v18 = vpop.f32.mrb[151].mxu0  ;;  %10317 = vmatprep.mubr.msk.bf16.mxu1 %vm10936_vm1, %v13388_v27 }
 0x85f   : > { %10327 = vmatprep.subr.bf16.mxu1 %v13388_v27 }
 0x860   : > { %v12732_v30 = vpop.f32.mrb[144].mxu1  ;;  %10312 = vmatmul.mubr.msk.bf16.vlgmr.msra.gmra.mrb[0].mxu0 %vm5247_vm4, %v11651_v32  ;;  %v7979_v32 = vsel %vm5251_vm3, %v5241_v54, 0 }
 0x861   : > { %v9995_v42 = vpop.f32.mrb[145].mxu1  ;;  %10322 = vmatpush3.bf16.msra.mxu0 %v7932_v49  ;;  %10323 = vmatprep.mubr.msk.bf16.mxu0 %vm10936_vm1, %v13388_v27 }
 0x862   : > { %v12740_v39 = vpop.f32.mrb[146].mxu1  ;;  %10333 = vmatprep.subr.bf16.mxu0 %v13388_v27 }
 0x863   : > { %v9996_v10 = vpop.f32.mrb[147].mxu1  ;;  %v12743_v11 = vpop.f32.mrb[152].mxu0 }
 0x864   : > { %v10001_v19 = vpop.f32.mrb[153].mxu0 }
 0x865   : > { %10318 = vmatmul.mubr.msk.bf16.vlgmr.msra.gmra.mrb[252].mxu1 %vm5247_vm4, %v11933_v38  ;;  %v12750_v3 = vpop.f32.mrb[154].mxu0 }
 0x866   : > { %10328 = vmatpush3.bf16.msra.mxu1 %v7979_v32  ;;  %v10002_v47 = vpop.f32.mrb[155].mxu0  ;;  %10329 = vmatprep.mubr.msk.bf16.mxu1 %vm10936_vm1, %v13388_v27 }
 0x867   : > { %10339 = vmatprep.subr.bf16.mxu1 %v13388_v27 }
 0x868   : > { %v12756_v26 = vpop.f32.mrb[148].mxu1  ;;  %10324 = vmatmul.mubr.msk.bf16.vlgmr.msra.gmra.mrb[4].mxu0 %vm5247_vm4, %v11665_v53  ;;  %v8073_v53 = vsel %vm5251_vm3, %v5243_v61, 0 }
 0x869   : > { %v10007_v38 = vpop.f32.mrb[149].mxu1  ;;  %10334 = vmatpush3.bf16.msra.mxu0 %v8026_v51  ;;  %10335 = vmatprep.mubr.msk.bf16.mxu0 %vm10936_vm1, %v13388_v27 }
 0x86a   : > { %v12764_v14 = vpop.f32.mrb[150].mxu1  ;;  %10345 = vmatprep.subr.bf16.mxu0 %v13388_v27 }
 0x86b   : > { %v10008_v48 = vpop.f32.mrb[151].mxu1  ;;  %v12767_v17 = vpop.f32.mrb[156].mxu0 }
 0x86c   : > { %v10013_v13 = vpop.f32.mrb[157].mxu0 }
 0x86d   : > { %10330 = vmatmul.mubr.msk.bf16.vlgmr.msra.gmra.mrb[0].mxu1 %vm5247_vm4, %v13481_v41  ;;  %v12774_v15 = vpop.f32.mrb[158].mxu0 }
 0x86e   : > { %10340 = vmatpush3.bf16.msra.mxu1 %v8073_v53  ;;  %v10014_v0 = vpop.f32.mrb[159].mxu0  ;;  %10341 = vmatprep.mubr.msk.bf16.mxu1 %vm10936_vm1, %v13388_v27 }
 0x86f   : > { %10351 = vmatprep.subr.bf16.mxu1 %v13388_v27 }
 0x870   : > { %v12780_v25 = vpop.f32.mrb[152].mxu1  ;;  %10336 = vmatmul.mubr.msk.bf16.vlgmr.msra.gmra.mrb[8].mxu0 %vm5247_vm4, %v13482_v33 }
 0x871   : > { %v10019_v34 = vpop.f32.mrb[153].mxu1  ;;  %10346 = vmatpush3.bf16.msra.mxu0 %v8120_v7  ;;  %10347 = vmatprep.mubr.msk.bf16.mxu0 %vm10936_vm1, %v13388_v27 }
 0x872   : > { %v12788_v28 = vpop.f32.mrb[154].mxu1  ;;  %10357 = vmatprep.subr.bf16.mxu0 %v13388_v27 }
 0x873   : > { %v10020_v5 = vpop.f32.mrb[155].mxu1  ;;  %v12791_v23 = vpop.f32.mrb[160].mxu0 }
 0x874   : > { %v10025_v24 = vpop.f32.mrb[161].mxu0 }
 0x875   : > { %10342 = vmatmul.mubr.msk.bf16.vlgmr.msra.gmra.mrb[4].mxu1 %vm5247_vm4, %v13483_v58  ;;  %v12798_v63 = vpop.f32.mrb[162].mxu0 }
 0x876   : > { %10352 = vmatpush3.bf16.msra.mxu1 %v8167_v9  ;;  %v10026_v55 = vpop.f32.mrb[163].mxu0  ;;  %10353 = vmatprep.mubr.msk.bf16.mxu1 %vm10936_vm1, %v13388_v27 }
 0x878   : > { %v12803_v20 = vpop.f32.mrb[156].mxu1  ;;  %10348 = vmatmul.mubr.msk.bf16.vlgmr.msra.gmra.mrb[12].mxu0 %vm5247_vm4, %v13484_v56 }
 0x879   : > { %v10031_v46 = vpop.f32.mrb[157].mxu1  ;;  %10358 = vmatpush3.bf16.msra.mxu0 %v8214_v35  ;;  %10359 = vmatprep.mubr.msk.bf16.mxu0 %vm10936_vm1, %v13388_v27 }
 0x87a   : > { %v12809_v12 = vpop.f32.mrb[158].mxu1 }
 0x87b   : > { %v10032_v40 = vpop.f32.mrb[159].mxu1  ;;  %v12811_v57 = vpop.f32.mrb[164].mxu0 }
 0x87c   : > { %v10037_v45 = vpop.f32.mrb[165].mxu0 }
 0x87d   : > { %10354 = vmatmul.mubr.msk.bf16.vlgmr.msra.gmra.mrb[8].mxu1 %vm5247_vm4, %v13485_v2  ;;  %v12815_v22 = vpop.f32.mrb[166].mxu0 }
 0x87e   : > { %v10038_v31 = vpop.f32.mrb[167].mxu0 }
 0x880   : > { %v12817_v50 = vpop.f32.mrb[160].mxu1  ;;  %10360 = vmatmul.mubr.msk.bf16.vlgmr.msra.gmra.mrb[16].mxu0 %vm5247_vm4, %v13486_v29 }
 0x881   : > { %v10043_v44 = vpop.f32.mrb[161].mxu1 }
 0x882   : > { %v12821_v6 = vpop.f32.mrb[162].mxu1 }
 0x883   : > { %v10044_v27 = vpop.f32.mrb[163].mxu1  ;;  %v12823_v21 = vpop.f32.mrb[168].mxu0 }
 0x884   : > { %v10049_v37 = vpop.f32.mrb[169].mxu0 }
 0x885   : > { %v12825_v36 = vpop.f32.mrb[170].mxu0 }
 0x886   : > { %v10050_v60 = vpop.f32.mrb[171].mxu0 }
 0x888   : > { %v12827_v18 = vpop.f32.mrb[164].mxu1 }
 0x889   : > { %v10055_v49 = vpop.f32.mrb[165].mxu1 }
 0x88a   : > { %v12829_v54 = vpop.f32.mrb[166].mxu1 }
 0x88b   : > { %v10056_v42 = vpop.f32.mrb[167].mxu1  ;;  %v12831_v10 = vpop.f32.mrb[172].mxu0 }
 0x88c   : > { %v10061_v1 = vpop.f32.mrb[173].mxu0 }
 0x88d   : > { %v12833_v19 = vpop.f32.mrb[174].mxu0 }
 0x88e   : > { %v10062_v32 = vpop.f32.mrb[175].mxu0 }
 0x890   : > { %v12835_v47 = vpop.f32.mrb[168].mxu1 }
 0x891   : > { %v10067_v51 = vpop.f32.mrb[169].mxu1 }
 0x892   : > { %v12837_v61 = vpop.f32.mrb[170].mxu1 }
 0x893   : > { %v10068_v38 = vpop.f32.mrb[171].mxu1  ;;  %v12839_v48 = vpop.f32.mrb[176].mxu0 }
 0x894   : > { %v10073_v43 = vpop.f32.mrb[177].mxu0 }
 0x895   : > { %v12841_v13 = vpop.f32.mrb[178].mxu0 }
 0x896   : > { %v10074_v53 = vpop.f32.mrb[179].mxu0 }
 0x898   : > { %v6041_v41 = vpop.f32.mrb[172].mxu1 }
 0x899   : > { %v10079_v0 = vpop.f32.mrb[173].mxu1 }
 0x89a   : > { %v6044_v7 = vpop.f32.mrb[174].mxu1 }
 0x89b   : > { %v10662_v33 = vpack.i.bf16 %v6044_v7, %v6041_v41  ;;  %v10080_v4 = vpop.f32.mrb[175].mxu1  ;;  %v6088_v34 = vpop.f32.mrb[180].mxu0 }
 0x89c   : > { %v10085_v5 = vpop.f32.mrb[181].mxu0 }
 0x89d   : > { %10663 = vrot.lane.b32.xlu1 %v10662_v33, %s10937_s11  ;;  %v6091_v52 = vpop.f32.mrb[182].mxu0 }
 0x89e   : > { %v10667_v24 = vpack.i.bf16 %v6091_v52, %v6088_v34  ;;  %v10086_v9 = vpop.f32.mrb[183].mxu0 }
 0x8a0   : > { %v6135_v58 = vpop.f32.mrb[176].mxu1  ;;  %10668 = vrot.lane.b32.xlu0 %v10667_v24, %s10937_s11 }
 0x8a1   : > { %v10091_v55 = vpop.f32.mrb[177].mxu1 }
 0x8a2   : > { %v6138_v35 = vpop.f32.mrb[178].mxu1 }
 0x8a3   : > { %v10672_v56 = vpack.i.bf16 %v6138_v35, %v6135_v58  ;;  %v10092_v46 = vpop.f32.mrb[179].mxu1  ;;  %v6182_v40 = vpop.f32.mrb[184].mxu0 }
 0x8a4   : > { %v10097_v45 = vpop.f32.mrb[185].mxu0 }
 0x8a5   : > { %10673 = vrot.lane.b32.xlu1 %v10672_v56, %s10937_s11  ;;  %v6185_v2 = vpop.f32.mrb[186].mxu0 }
 0x8a6   : > { %v10677_v31 = vpack.i.bf16 %v6185_v2, %v6182_v40  ;;  %v10098_v29 = vpop.f32.mrb[187].mxu0 }
 0x8a8   : > { %v6229_v44 = vpop.f32.mrb[180].mxu1 }
 0x8a9   : > { %10678 = vrot.lane.b32.xlu1 %v10677_v31, %s10937_s11  ;;  %v10103_v27 = vpop.f32.mrb[181].mxu1 }
 0x8aa   : > { %v6232_v37 = vpop.f32.mrb[182].mxu1 }
 0x8ab   : > { %v10682_v60 = vpack.i.bf16 %v6232_v37, %v6229_v44  ;;  %v10104_v49 = vpop.f32.mrb[183].mxu1  ;;  %v6276_v42 = vpop.f32.mrb[188].mxu0 }
 0x8ac   : > { %v10109_v1 = vpop.f32.mrb[189].mxu0 }
 0x8ad   : > { %10683 = vrot.lane.b32.xlu1 %v10682_v60, %s10937_s11  ;;  %v6279_v32 = vpop.f32.mrb[190].mxu0 }
 0x8ae   : > { %v10687_v51 = vpack.i.bf16 %v6279_v32, %v6276_v42  ;;  %v10110_v38 = vpop.f32.mrb[191].mxu0 }
 0x8b0   : > { %v6323_v43 = vpop.f32.mrb[184].mxu1  ;;  %10688 = vrot.lane.b32.xlu0 %v10687_v51, %s10937_s11 }
 0x8b1   : > { %v10115_v53 = vpop.f32.mrb[185].mxu1 }
 0x8b2   : > { %v6326_v41 = vpop.f32.mrb[186].mxu1 }
 0x8b3   : > { %v10692_v0 = vpack.i.bf16 %v6326_v41, %v6323_v43  ;;  %v10116_v7 = vpop.f32.mrb[187].mxu1  ;;  %v6370_v33 = vpop.f32.mrb[192].mxu0 }
 0x8b4   : > { %v10121_v4 = vpop.f32.mrb[193].mxu0 }
 0x8b5   : > { %10693 = vrot.lane.b32.xlu1 %v10692_v0, %s10937_s11  ;;  %v6373_v34 = vpop.f32.mrb[194].mxu0 }
 0x8b6   : > { %v10697_v5 = vpack.i.bf16 %v6373_v34, %v6370_v33  ;;  %v10122_v52 = vpop.f32.mrb[195].mxu0 }
 0x8b8   : > { %v6417_v24 = vpop.f32.mrb[188].mxu1  ;;  %10698 = vrot.lane.b32.xlu0 %v10697_v5, %s10937_s11 }
 0x8b9   : > { %v10127_v9 = vpop.f32.mrb[189].mxu1 }
 0x8ba   : > { %v6420_v58 = vpop.f32.mrb[190].mxu1 }
 0x8bb   : > { %v10702_v55 = vpack.i.bf16 %v6420_v58, %v6417_v24  ;;  %v10128_v35 = vpop.f32.mrb[191].mxu1  ;;  %v6464_v56 = vpop.f32.mrb[196].mxu0 }
 0x8bc   : > { %v10133_v46 = vpop.f32.mrb[197].mxu0 }
 0x8bd   : > { %10703 = vrot.lane.b32.xlu1 %v10702_v55, %s10937_s11  ;;  %v6467_v40 = vpop.f32.mrb[198].mxu0 }
 0x8be   : > { %v10707_v45 = vpack.i.bf16 %v6467_v40, %v6464_v56  ;;  %v10134_v2 = vpop.f32.mrb[199].mxu0 }
 0x8c0   : > { %v6511_v31 = vpop.f32.mrb[192].mxu1  ;;  %10708 = vrot.lane.b32.xlu0 %v10707_v45, %s10937_s11 }
 0x8c1   : > { %v10139_v29 = vpop.f32.mrb[193].mxu1 }
 0x8c2   : > { %v6514_v44 = vpop.f32.mrb[194].mxu1 }
 0x8c3   : > { %v10712_v27 = vpack.i.bf16 %v6514_v44, %v6511_v31  ;;  %v10140_v37 = vpop.f32.mrb[195].mxu1  ;;  %v6558_v60 = vpop.f32.mrb[200].mxu0 }
 0x8c4   : > { %v10145_v49 = vpop.f32.mrb[201].mxu0 }
 0x8c5   : > { %10713 = vrot.lane.b32.xlu1 %v10712_v27, %s10937_s11  ;;  %v6561_v42 = vpop.f32.mrb[202].mxu0 }
 0x8c6   : > { %v10717_v1 = vpack.i.bf16 %v6561_v42, %v6558_v60  ;;  %v10146_v32 = vpop.f32.mrb[203].mxu0 }
 0x8c8   : > { %v6605_v51 = vpop.f32.mrb[196].mxu1  ;;  %10718 = vrot.lane.b32.xlu0 %v10717_v1, %s10937_s11 }
 0x8c9   : > { %v10151_v38 = vpop.f32.mrb[197].mxu1 }
 0x8ca   : > { %v6608_v43 = vpop.f32.mrb[198].mxu1 }
 0x8cb   : > { %v10722_v53 = vpack.i.bf16 %v6608_v43, %v6605_v51  ;;  %v10152_v41 = vpop.f32.mrb[199].mxu1  ;;  %v6652_v0 = vpop.f32.mrb[204].mxu0 }
 0x8cc   : > { %v10157_v7 = vpop.f32.mrb[205].mxu0 }
 0x8cd   : > { %10723 = vrot.lane.b32.xlu1 %v10722_v53, %s10937_s11  ;;  %v6655_v33 = vpop.f32.mrb[206].mxu0 }
 0x8ce   : > { %v10727_v4 = vpack.i.bf16 %v6655_v33, %v6652_v0  ;;  %v10158_v34 = vpop.f32.mrb[207].mxu0 }
 0x8d0   : > { %v6699_v5 = vpop.f32.mrb[200].mxu1  ;;  %10728 = vrot.lane.b32.xlu0 %v10727_v4, %s10937_s11 }
 0x8d1   : > { %v10163_v52 = vpop.f32.mrb[201].mxu1 }
 0x8d2   : > { %v6702_v24 = vpop.f32.mrb[202].mxu1 }
 0x8d3   : > { %v10732_v9 = vpack.i.bf16 %v6702_v24, %v6699_v5  ;;  %v10164_v58 = vpop.f32.mrb[203].mxu1  ;;  %v6746_v55 = vpop.f32.mrb[208].mxu0 }
 0x8d4   : > { %v10169_v35 = vpop.f32.mrb[209].mxu0 }
 0x8d5   : > { %10733 = vrot.lane.b32.xlu1 %v10732_v9, %s10937_s11  ;;  %v6749_v56 = vpop.f32.mrb[210].mxu0 }
 0x8d6   : > { %v10737_v46 = vpack.i.bf16 %v6749_v56, %v6746_v55  ;;  %v10170_v40 = vpop.f32.mrb[211].mxu0 }
 0x8d8   : > { %v6793_v45 = vpop.f32.mrb[204].mxu1  ;;  %10738 = vrot.lane.b32.xlu0 %v10737_v46, %s10937_s11 }
 0x8d9   : > { %v10175_v2 = vpop.f32.mrb[205].mxu1 }
 0x8da   : > { %v6796_v31 = vpop.f32.mrb[206].mxu1 }
 0x8db   : > { %v10742_v29 = vpack.i.bf16 %v6796_v31, %v6793_v45  ;;  %v10176_v44 = vpop.f32.mrb[207].mxu1  ;;  %v6840_v27 = vpop.f32.mrb[212].mxu0 }
 0x8dc   : > { %v10181_v37 = vpop.f32.mrb[213].mxu0 }
 0x8dd   : > { %10743 = vrot.lane.b32.xlu1 %v10742_v29, %s10938_s12  ;;  %v6843_v60 = vpop.f32.mrb[214].mxu0 }
 0x8de   : > { %v10747_v49 = vpack.i.bf16 %v6843_v60, %v6840_v27  ;;  %v10182_v42 = vpop.f32.mrb[215].mxu0 }
 0x8e0   : > { %v6887_v1 = vpop.f32.mrb[208].mxu1  ;;  %10748 = vrot.lane.b32.xlu0 %v10747_v49, %s10938_s12 }
 0x8e1   : > { %v10187_v32 = vpop.f32.mrb[209].mxu1 }
 0x8e2   : > { %v6890_v51 = vpop.f32.mrb[210].mxu1 }
 0x8e3   : > { %v10752_v38 = vpack.i.bf16 %v6890_v51, %v6887_v1  ;;  %v10188_v43 = vpop.f32.mrb[211].mxu1  ;;  %v6934_v53 = vpop.f32.mrb[216].mxu0 }
 0x8e4   : > { %v10193_v41 = vpop.f32.mrb[217].mxu0 }
 0x8e5   : > { %10753 = vrot.lane.b32.xlu1 %v10752_v38, %s10938_s12  ;;  %v6937_v0 = vpop.f32.mrb[218].mxu0 }
 0x8e6   : > { %v10757_v7 = vpack.i.bf16 %v6937_v0, %v6934_v53  ;;  %v10194_v33 = vpop.f32.mrb[219].mxu0 }
 0x8e8   : > { %v6981_v4 = vpop.f32.mrb[212].mxu1  ;;  %10758 = vrot.lane.b32.xlu0 %v10757_v7, %s10938_s12 }
 0x8e9   : > { %v10199_v34 = vpop.f32.mrb[213].mxu1 }
 0x8ea   : > { %v6984_v5 = vpop.f32.mrb[214].mxu1 }
 0x8eb   : > { %v10762_v52 = vpack.i.bf16 %v6984_v5, %v6981_v4  ;;  %v10200_v24 = vpop.f32.mrb[215].mxu1  ;;  %v7028_v9 = vpop.f32.mrb[220].mxu0 }
 0x8ec   : > { %v10205_v58 = vpop.f32.mrb[221].mxu0 }
 0x8ed   : > { %10763 = vrot.lane.b32.xlu1 %v10762_v52, %s10938_s12  ;;  %v7031_v55 = vpop.f32.mrb[222].mxu0 }
 0x8ee   : > { %v10767_v35 = vpack.i.bf16 %v7031_v55, %v7028_v9  ;;  %v10206_v56 = vpop.f32.mrb[223].mxu0 }
 0x8f0   : > { %v7075_v46 = vpop.f32.mrb[216].mxu1  ;;  %10768 = vrot.lane.b32.xlu0 %v10767_v35, %s10938_s12 }
 0x8f1   : > { %v10211_v40 = vpop.f32.mrb[217].mxu1 }
 0x8f2   : > { %v7078_v45 = vpop.f32.mrb[218].mxu1 }
 0x8f3   : > { %v10772_v2 = vpack.i.bf16 %v7078_v45, %v7075_v46  ;;  %v10212_v31 = vpop.f32.mrb[219].mxu1  ;;  %v7122_v29 = vpop.f32.mrb[224].mxu0 }
 0x8f4   : > { %v10217_v44 = vpop.f32.mrb[225].mxu0 }
 0x8f5   : > { %10773 = vrot.lane.b32.xlu1 %v10772_v2, %s10938_s12  ;;  %v7125_v27 = vpop.f32.mrb[226].mxu0 }
 0x8f6   : > { %v10777_v37 = vpack.i.bf16 %v7125_v27, %v7122_v29  ;;  %v10218_v60 = vpop.f32.mrb[227].mxu0 }
 0x8f8   : > { %v7169_v49 = vpop.f32.mrb[220].mxu1  ;;  %10778 = vrot.lane.b32.xlu0 %v10777_v37, %s10938_s12 }
 0x8f9   : > { %v10223_v42 = vpop.f32.mrb[221].mxu1 }
 0x8fa   : > { %v7172_v1 = vpop.f32.mrb[222].mxu1 }
 0x8fb   : > { %v10782_v32 = vpack.i.bf16 %v7172_v1, %v7169_v49  ;;  %v10224_v51 = vpop.f32.mrb[223].mxu1  ;;  %v7216_v38 = vpop.f32.mrb[228].mxu0  ;;  %v10920_v1 = vld [vmem:[%s13296_s3] sm:$0xff]  }
 0x8fc   : > { %v10229_v43 = vpop.f32.mrb[229].mxu0  ;;  %10363 = vmatprep.subr.bf16.mxu0 %v10920_v1  ;;  %10399 = vmatprep.subr.bf16.mxu1 %v10920_v1 }
 0x8fd   : > { %10783 = vrot.lane.b32.xlu1 %v10782_v32, %s10938_s12  ;;  %v7219_v53 = vpop.f32.mrb[230].mxu0  ;;  %10364 = vmatpush3.bf16.msra.mxu0 %v10920_v1 }
 0x8fe   : > { %v10787_v41 = vpack.i.bf16 %v7219_v53, %v7216_v38  ;;  %v10230_v0 = vpop.f32.mrb[231].mxu0  ;;  %10401 = vmatpush3.bf16.msra.mxu1 %v10920_v1 }
 0x900   : > { %v7263_v7 = vpop.f32.mrb[224].mxu1  ;;  %10788 = vrot.lane.b32.xlu0 %v10787_v41, %s10938_s12 }
 0x901   : > { %v10235_v33 = vpop.f32.mrb[225].mxu1 }
 0x902   : > { %v7266_v4 = vpop.f32.mrb[226].mxu1  ;;  %v10921_v33 = vld [vmem:[%s13296_s3 + $0x8] sm:$0xff]  }
 0x903   : > { %v10792_v34 = vpack.i.bf16 %v7266_v4, %v7263_v7  ;;  %v10236_v5 = vpop.f32.mrb[227].mxu1  ;;  %v7310_v52 = vpop.f32.mrb[232].mxu0  ;;  %10365 = vmatprep.subr.bf16.mxu0 %v10921_v33  ;;  %10400 = vmatprep.subr.bf16.mxu1 %v10921_v33 }
 0x904   : > { %v10241_v24 = vpop.f32.mrb[233].mxu0  ;;  %10366 = vmatpush3.bf16.msra.mxu0 %v10921_v33  ;;  %10402 = vmatpush3.bf16.msra.mxu1 %v10921_v33 }
 0x905   : > { %10793 = vrot.lane.b32.xlu1 %v10792_v34, %s10938_s12  ;;  %v7313_v9 = vpop.f32.mrb[234].mxu0 }
 0x906   : > { %v10797_v58 = vpack.i.bf16 %v7313_v9, %v7310_v52  ;;  %v10242_v55 = vpop.f32.mrb[235].mxu0 }
 0x908   : > { %v7357_v35 = vpop.f32.mrb[228].mxu1  ;;  %10798 = vrot.lane.b32.xlu0 %v10797_v58, %s10938_s12 }
 0x909   : > { %v10247_v56 = vpop.f32.mrb[229].mxu1 }
 0x90a   : > { %v7360_v46 = vpop.f32.mrb[230].mxu1 }
 0x90b   : > { %v10802_v40 = vpack.i.bf16 %v7360_v46, %v7357_v35  ;;  %v10248_v45 = vpop.f32.mrb[231].mxu1  ;;  %v7404_v2 = vpop.f32.mrb[236].mxu0 }
 0x90c   : > { %v10253_v31 = vpop.f32.mrb[237].mxu0 }
 0x90d   : > { %10803 = vrot.lane.b32.xlu1 %v10802_v40, %s10938_s12  ;;  %v7407_v29 = vpop.f32.mrb[238].mxu0 }
 0x90e   : > { %v10807_v44 = vpack.i.bf16 %v7407_v29, %v7404_v2  ;;  %v10254_v27 = vpop.f32.mrb[239].mxu0 }
 0x90f   : > { %v10664_v37 = vpop.permute.xlu1 %10663 }
 0x910   : > { %v10666_v60 = vunpack.i.h.bf16 %v10664_v37  ;;  %v10665_v49 = vunpack.i.l.bf16 %v10664_v37  ;;  %v7451_v42 = vpop.f32.mrb[232].mxu1  ;;  %10808 = vrot.lane.b32.xlu0 %v10807_v44, %s10938_s12 }
 0x911   : > { %v10259_v32 = vpop.f32.mrb[233].mxu1 }
 0x912   : > { %v12878_v51 = vsel %vm5247_vm4, %v12716_v16, %v10666_v60  ;;  %v12882_v38 = vsel %vm5247_vm4, %v12708_v8, %v10665_v49  ;;  %v7454_v43 = vpop.f32.mrb[234].mxu1  ;;  %v12898_v44 = vpop.permute.xlu0 %10668 }
 0x913   : > { %v10812_v53 = vpack.i.bf16 %v7454_v43, %v7451_v42  ;;  %v10260_v41 = vpop.f32.mrb[235].mxu1  ;;  %v7498_v0 = vpop.f32.mrb[240].mxu0 }
 0x914   : > { %v10265_v7 = vpop.f32.mrb[241].mxu0 }
 0x915   : > { %10813 = vrot.lane.b32.xlu1 %v10812_v53, %s10938_s12  ;;  %v7501_v16 = vpop.f32.mrb[242].mxu0 }
 0x916   : > { %v10817_v4 = vpack.i.bf16 %v7501_v16, %v7498_v0  ;;  %v10266_v34 = vpop.f32.mrb[243].mxu0 }
 0x917   : > { %v10674_v8 = vpop.permute.xlu1 %10673 }
 0x918   : > { %v10676_v5 = vunpack.i.h.bf16 %v10674_v8  ;;  %v10675_v52 = vunpack.i.l.bf16 %v10674_v8  ;;  %v7545_v24 = vpop.f32.mrb[236].mxu1  ;;  %10818 = vrot.lane.b32.xlu0 %v10817_v4, %s10938_s12 }
 0x919   : > { %v10271_v9 = vpop.f32.mrb[237].mxu1 }
 0x91a   : > { %v12891_v58 = vsel %vm5247_vm4, %v12740_v39, %v10676_v5  ;;  %v12895_v55 = vsel %vm5247_vm4, %v12732_v30, %v10675_v52  ;;  %v7548_v35 = vpop.f32.mrb[238].mxu1 }
 0x91b   : > { %v10822_v56 = vpack.i.bf16 %v7548_v35, %v7545_v24  ;;  %v10679_v46 = vpop.permute.xlu1 %10678  ;;  %v10272_v40 = vpop.f32.mrb[239].mxu1 }
 0x91c   : > { %v10681_v45 = vunpack.i.h.bf16 %v10679_v46  ;;  %v10680_v2 = vunpack.i.l.bf16 %v10679_v46  ;;  %v7592_v31 = vpop.f32.mrb[244].mxu0 }
 0x91d   : > { %v10277_v29 = vpop.f32.mrb[245].mxu0  ;;  %10823 = vrot.lane.b32.xlu1 %v10822_v56, %s10939_s17 }
 0x91e   : > { %v12902_v39 = vsel %vm5247_vm4, %v12750_v3, %v10681_v45  ;;  %v12906_v30 = vsel %vm5247_vm4, %v12743_v11, %v10680_v2  ;;  %v7595_v27 = vpop.f32.mrb[246].mxu0 }
 0x91f   : > { %v10827_v37 = vpack.i.bf16 %v7595_v27, %v7592_v31  ;;  %v10278_v60 = vpop.f32.mrb[247].mxu0  ;;  %v10684_v49 = vpop.permute.xlu1 %10683 }
 0x920   : > { %v10686_v42 = vunpack.i.h.bf16 %v10684_v49  ;;  %v10685_v1 = vunpack.i.l.bf16 %v10684_v49  ;;  %v7639_v32 = vpop.f32.mrb[240].mxu1 }
 0x921   : > { %10828 = vrot.lane.b32.xlu0 %v10827_v37, %s10939_s17  ;;  %v10283_v43 = vpop.f32.mrb[241].mxu1 }
 0x922   : > { %v12911_v53 = vsel %vm5247_vm4, %v12764_v14, %v10686_v42  ;;  %v12915_v3 = vsel %vm5247_vm4, %v12756_v26, %v10685_v1  ;;  %v7642_v11 = vpop.f32.mrb[242].mxu1  ;;  %v10689_v41 = vpop.permute.xlu0 %10688 }
 0x923   : > { %v10832_v0 = vpack.i.bf16 %v7642_v11, %v7639_v32  ;;  %v10691_v7 = vunpack.i.h.bf16 %v10689_v41  ;;  %v10690_v33 = vunpack.i.l.bf16 %v10689_v41  ;;  %v10284_v16 = vpop.f32.mrb[243].mxu1  ;;  %v7686_v4 = vpop.f32.mrb[248].mxu0 }
 0x924   : > { %v10289_v34 = vpop.f32.mrb[249].mxu0 }
 0x925   : > { %v12919_v8 = vsel %vm5247_vm4, %v12774_v15, %v10691_v7  ;;  %v12923_v14 = vsel %vm5247_vm4, %v12767_v17, %v10690_v33  ;;  %10833 = vrot.lane.b32.xlu1 %v10832_v0, %s10939_s17  ;;  %v7689_v26 = vpop.f32.mrb[250].mxu0 }
 0x926   : > { %v10837_v5 = vpack.i.bf16 %v7689_v26, %v7686_v4  ;;  %v10290_v52 = vpop.f32.mrb[251].mxu0 }
 0x927   : > { %v10694_v24 = vpop.permute.xlu1 %10693 }
 0x928   : > { %v10696_v9 = vunpack.i.h.bf16 %v10694_v24  ;;  %v10695_v35 = vunpack.i.l.bf16 %v10694_v24  ;;  %v7733_v56 = vpop.f32.mrb[244].mxu1  ;;  %10838 = vrot.lane.b32.xlu0 %v10837_v5, %s10939_s17 }
 0x929   : > { %v10295_v46 = vpop.f32.mrb[245].mxu1 }
 0x92a   : > { %v12929_v15 = vsel %vm5247_vm4, %v12788_v28, %v10696_v9  ;;  %v12933_v17 = vsel %vm5247_vm4, %v12780_v25, %v10695_v35  ;;  %v7736_v40 = vpop.f32.mrb[246].mxu1  ;;  %v10699_v45 = vpop.permute.xlu0 %10698 }
 0x92b   : > { %v10842_v2 = vpack.i.bf16 %v7736_v40, %v7733_v56  ;;  %v10701_v31 = vunpack.i.h.bf16 %v10699_v45  ;;  %v10700_v29 = vunpack.i.l.bf16 %v10699_v45  ;;  %v10296_v27 = vpop.f32.mrb[247].mxu1  ;;  %v7780_v37 = vpop.f32.mrb[252].mxu0 }
 0x92c   : > { %v10301_v60 = vpop.f32.mrb[253].mxu0 }
 0x92d   : > { %v12937_v49 = vsel %vm5247_vm4, %v12798_v63, %v10701_v31  ;;  %v12941_v28 = vsel %vm5247_vm4, %v12791_v23, %v10700_v29  ;;  %10843 = vrot.lane.b32.xlu1 %v10842_v2, %s10939_s17  ;;  %v7783_v25 = vpop.f32.mrb[254].mxu0 }
 0x92e   : > { %v10847_v42 = vpack.i.bf16 %v7783_v25, %v7780_v37  ;;  %v10302_v1 = vpop.f32.mrb[255].mxu0 }
 0x92f   : > { %v10704_v32 = vpop.permute.xlu1 %10703 }
 0x930   : > { %v10706_v43 = vunpack.i.h.bf16 %v10704_v32  ;;  %v10705_v11 = vunpack.i.l.bf16 %v10704_v32  ;;  %v7827_v41 = vpop.f32.mrb[248].mxu1  ;;  %10848 = vrot.lane.b32.xlu0 %v10847_v42, %s10939_s17 }
 0x931   : > { %v10307_v0 = vpop.f32.mrb[249].mxu1 }
 0x932   : > { %v12947_v63 = vsel %vm5247_vm4, %v12809_v12, %v10706_v43  ;;  %v12951_v23 = vsel %vm5247_vm4, %v12803_v20, %v10705_v11  ;;  %v7830_v7 = vpop.f32.mrb[250].mxu1  ;;  %v10709_v33 = vpop.permute.xlu0 %10708 }
 0x933   : > { %v10852_v16 = vpack.i.bf16 %v7830_v7, %v7827_v41  ;;  %v10711_v4 = vunpack.i.h.bf16 %v10709_v33  ;;  %v10710_v34 = vunpack.i.l.bf16 %v10709_v33  ;;  %v10308_v26 = vpop.f32.mrb[251].mxu1  ;;  %v7874_v5 = vpop.f32.mrb[0].mxu0 }
 0x934   : > { %v10313_v52 = vpop.f32.mrb[1].mxu0 }
 0x935   : > { %v12955_v24 = vsel %vm5247_vm4, %v12815_v22, %v10711_v4  ;;  %v12959_v12 = vsel %vm5247_vm4, %v12811_v57, %v10710_v34  ;;  %10853 = vrot.lane.b32.xlu1 %v10852_v16, %s10939_s17  ;;  %v7877_v20 = vpop.f32.mrb[2].mxu0 }
 0x936   : > { %v10857_v9 = vpack.i.bf16 %v7877_v20, %v7874_v5  ;;  %v10314_v35 = vpop.f32.mrb[3].mxu0 }
 0x937   : > { %v10714_v56 = vpop.permute.xlu1 %10713 }
 0x938   : > { %v10716_v46 = vunpack.i.h.bf16 %v10714_v56  ;;  %v10715_v40 = vunpack.i.l.bf16 %v10714_v56  ;;  %v7921_v45 = vpop.f32.mrb[252].mxu1  ;;  %10858 = vrot.lane.b32.xlu0 %v10857_v9, %s10939_s17 }
 0x939   : > { %v10319_v2 = vpop.f32.mrb[253].mxu1 }
 0x93a   : > { %v12965_v22 = vsel %vm5247_vm4, %v12821_v6, %v10716_v46  ;;  %v12969_v57 = vsel %vm5247_vm4, %v12817_v50, %v10715_v40  ;;  %v7924_v31 = vpop.f32.mrb[254].mxu1  ;;  %v10719_v29 = vpop.permute.xlu0 %10718 }
 0x93b   : > { %v10862_v27 = vpack.i.bf16 %v7924_v31, %v7921_v45  ;;  %v10721_v37 = vunpack.i.h.bf16 %v10719_v29  ;;  %v10720_v60 = vunpack.i.l.bf16 %v10719_v29  ;;  %v10320_v25 = vpop.f32.mrb[255].mxu1  ;;  %v7968_v42 = vpop.f32.mrb[4].mxu0 }
 0x93c   : > { %v10325_v1 = vpop.f32.mrb[5].mxu0 }
 0x93d   : > { %v12973_v32 = vsel %vm5247_vm4, %v12825_v36, %v10721_v37  ;;  %v12977_v6 = vsel %vm5247_vm4, %v12823_v21, %v10720_v60  ;;  %10863 = vrot.lane.b32.xlu1 %v10862_v27, %s10939_s17  ;;  %v7971_v50 = vpop.f32.mrb[6].mxu0 }
 0x93e   : > { %v10867_v43 = vpack.i.bf16 %v7971_v50, %v7968_v42  ;;  %v10326_v11 = vpop.f32.mrb[7].mxu0 }
 0x93f   : > { %v10724_v41 = vpop.permute.xlu1 %10723 }
 0x940   : > { %v10726_v0 = vunpack.i.h.bf16 %v10724_v41  ;;  %v10725_v7 = vunpack.i.l.bf16 %v10724_v41  ;;  %v8015_v33 = vpop.f32.mrb[0].mxu1  ;;  %10868 = vrot.lane.b32.xlu0 %v10867_v43, %s10939_s17 }
 0x941   : > { %v10331_v16 = vpop.f32.mrb[1].mxu1 }
 0x942   : > { %v12983_v36 = vsel %vm5247_vm4, %v12829_v54, %v10726_v0  ;;  %v12987_v21 = vsel %vm5247_vm4, %v12827_v18, %v10725_v7  ;;  %v8018_v4 = vpop.f32.mrb[2].mxu1  ;;  %v10729_v34 = vpop.permute.xlu0 %10728 }
 0x943   : > { %v10872_v26 = vpack.i.bf16 %v8018_v4, %v8015_v33  ;;  %v10731_v5 = vunpack.i.h.bf16 %v10729_v34  ;;  %v10730_v52 = vunpack.i.l.bf16 %v10729_v34  ;;  %v10332_v20 = vpop.f32.mrb[3].mxu1  ;;  %v8062_v9 = vpop.f32.mrb[8].mxu0 }
 0x944   : > { %v10337_v35 = vpop.f32.mrb[9].mxu0 }
 0x945   : > { %v12991_v56 = vsel %vm5247_vm4, %v12833_v19, %v10731_v5  ;;  %v12995_v54 = vsel %vm5247_vm4, %v12831_v10, %v10730_v52  ;;  %10873 = vrot.lane.b32.xlu1 %v10872_v26, %s10939_s17  ;;  %v8065_v18 = vpop.f32.mrb[10].mxu0 }
 0x946   : > { %v10877_v46 = vpack.i.bf16 %v8065_v18, %v8062_v9  ;;  %v10338_v40 = vpop.f32.mrb[11].mxu0 }
 0x947   : > { %v10734_v45 = vpop.permute.xlu1 %10733 }
 0x948   : > { %v10736_v2 = vunpack.i.h.bf16 %v10734_v45  ;;  %v10735_v31 = vunpack.i.l.bf16 %v10734_v45  ;;  %v8109_v29 = vpop.f32.mrb[4].mxu1  ;;  %10878 = vrot.lane.b32.xlu0 %v10877_v46, %s10939_s17 }
 0x949   : > { %v10343_v27 = vpop.f32.mrb[5].mxu1 }
 0x94a   : > { %v13001_v19 = vsel %vm5247_vm4, %v12837_v61, %v10736_v2  ;;  %v13005_v10 = vsel %vm5247_vm4, %v12835_v47, %v10735_v31  ;;  %v8112_v37 = vpop.f32.mrb[6].mxu1  ;;  %v10739_v60 = vpop.permute.xlu0 %10738 }
 0x94b   : > { %v10882_v25 = vpack.i.bf16 %v8112_v37, %v8109_v29  ;;  %v10741_v42 = vunpack.i.h.bf16 %v10739_v60  ;;  %v10740_v1 = vunpack.i.l.bf16 %v10739_v60  ;;  %v10344_v50 = vpop.f32.mrb[7].mxu1  ;;  %v8156_v43 = vpop.f32.mrb[12].mxu0 }
 0x94c   : > { %v10349_v11 = vpop.f32.mrb[13].mxu0 }
 0x94d   : > { %v13009_v41 = vsel %vm5247_vm4, %v12841_v13, %v10741_v42  ;;  %v13013_v61 = vsel %vm5247_vm4, %v12839_v48, %v10740_v1  ;;  %10883 = vrot.lane.b32.xlu1 %v10882_v25, %s10939_s17  ;;  %v8159_v47 = vpop.f32.mrb[14].mxu0 }
 0x94e   : > { %13487 = vst [vmem:[#allocation30_spill] sm:$0xff] %v13013_v61  ;;  %v10887_v0 = vpack.i.bf16 %v8159_v47, %v8156_v43  ;;  %v10350_v7 = vpop.f32.mrb[15].mxu0 }
 0x94f   : > { %v10744_v9 = vpop.permute.xlu1 %10743  ;;  %v10670_v7 = vunpack.i.l.bf16 %v12898_v44 }
 0x950   : > { %v8203_v33 = vpop.f32.mrb[8].mxu1  ;;  %10888 = vrot.lane.b32.xlu0 %v10887_v0, %s10939_s17  ;;  %v10746_v50 = vunpack.i.h.bf16 %v10744_v9  ;;  %v10745_v43 = vunpack.i.l.bf16 %v10744_v9  ;;  %v10671_v0 = vunpack.i.h.bf16 %v12898_v44 }
 0x951   : > { %v10355_v16 = vpop.f32.mrb[9].mxu1  ;;  %v8643_v44 = vsel %vm5247_vm4, %v12719_v62, %v10670_v7 }
 0x952   : > { %v8206_v4 = vpop.f32.mrb[10].mxu1  ;;  %v10749_v35 = vpop.permute.xlu0 %10748  ;;  %v8644_v9 = vsel %vm5247_vm4, %v12726_v59, %v10671_v0 }
 0x953   : > { %v10892_v34 = vpack.i.bf16 %v8206_v4, %v8203_v33  ;;  %v10356_v26 = vpop.f32.mrb[11].mxu1  ;;  %v8250_v5 = vpop.f32.mrb[16].mxu0  ;;  %v8674_v4 = vsel %vm981_vm2, %v12878_v51, %v10746_v50 }
 0x954   : > { %v10361_v52 = vpop.f32.mrb[17].mxu0  ;;  %v10751_v26 = vunpack.i.h.bf16 %v10749_v35 }
 0x955   : > { %10893 = vrot.lane.b32.xlu1 %v10892_v34, %s10939_s17  ;;  %v8253_v13 = vpop.f32.mrb[18].mxu0  ;;  %v8673_v34 = vsel %vm981_vm2, %v12882_v38, %v10745_v43 }
 0x956   : > { %v10897_v20 = vpack.i.bf16 %v8253_v13, %v8250_v5  ;;  %v10362_v48 = vpop.f32.mrb[19].mxu0  ;;  %v10750_v5 = vunpack.i.l.bf16 %v10749_v35  ;;  %v8676_v51 = vsel %vm981_vm2, %v8644_v9, %v10751_v26 }
 0x957   : > { %v10754_v18 = vpop.permute.xlu1 %10753 }
 0x958   : > { %10898 = vrot.lane.b32.xlu0 %v10897_v20, %s10939_s17  ;;  %v8675_v38 = vsel %vm981_vm2, %v8643_v44, %v10750_v5  ;;  %v10756_v50 = vunpack.i.h.bf16 %v10754_v18  ;;  %v10755_v35 = vunpack.i.l.bf16 %v10754_v18 }
 0x95a   : > { %v10759_v46 = vpop.permute.xlu0 %10758  ;;  %v8678_v7 = vsel %vm981_vm2, %v12891_v58, %v10756_v50  ;;  %v8677_v26 = vsel %vm981_vm2, %v12895_v55, %v10755_v35 }
 0x95b   : > { %v10761_v59 = vunpack.i.h.bf16 %v10759_v46  ;;  %v10760_v0 = vunpack.i.l.bf16 %v10759_v46 }
 0x95d   : > { %v8679_v46 = vsel %vm981_vm2, %v12906_v30, %v10760_v0 }
 0x95f   : > { %v13019_v40 = vpop.permute.xlu1 %10763 }
 0x960   : > { %v10766_v58 = vunpack.i.h.bf16 %v13019_v40  ;;  %v10765_v55 = vunpack.i.l.bf16 %v13019_v40 }
 0x962   : > { %v13021_v45 = vpop.permute.xlu0 %10768  ;;  %v8681_v40 = vsel %vm981_vm2, %v12915_v3, %v10765_v55 }
 0x963   : > { %v10770_v50 = vunpack.i.l.bf16 %v13021_v45 }
 0x967   : > { %v13023_v2 = vpop.permute.xlu1 %10773 }
 0x968   : > { %v10775_v3 = vunpack.i.l.bf16 %v13023_v2 }
 0x96a   : > { %v13025_v31 = vpop.permute.xlu0 %10778 }
 0x96f   : > { %v13027_v29 = vpop.permute.xlu1 %10783 }
 0x972   : > { %v13029_v27 = vpop.permute.xlu0 %10788 }
 0x977   : > { %v13031_v37 = vpop.permute.xlu1 %10793 }
 0x97a   : > { %v13033_v60 = vpop.permute.xlu0 %10798 }
 0x97f   : > { %v13035_v25 = vpop.permute.xlu1 %10803 }
 0x982   : > { %v13037_v42 = vpop.permute.xlu0 %10808 }
 0x987   : > { %v13039_v1 = vpop.permute.xlu1 %10813 }
 0x98a   : > { %v13041_v11 = vpop.permute.xlu0 %10818 }
 0x98f   : > { %v10824_v47 = vpop.permute.xlu1 %10823 }
 0x990   : > { %v10826_v33 = vunpack.i.h.bf16 %v10824_v47  ;;  %v10825_v16 = vunpack.i.l.bf16 %v10824_v47 }
 0x992   : > { %v8707_v52 = vsel %vm8705_vm5, %v8674_v4, %v10826_v33  ;;  %v8706_v13 = vsel %vm8705_vm5, %v8673_v34, %v10825_v16 }
 0x993   : > { %v8738_v20 = vpack.c.bf16 %v8707_v52, %v8706_v13  ;;  %v10829_v48 = vpop.permute.xlu0 %10828 }
 0x994   : > { %v10831_v47 = vunpack.i.h.bf16 %v10829_v48  ;;  %v10830_v61 = vunpack.i.l.bf16 %v10829_v48  ;;  %v8680_v48 = vsel %vm981_vm2, %v12902_v39, %v10761_v59  ;;  %v8682_v39 = vsel %vm981_vm2, %v12911_v53, %v10766_v58 }
 0x995   : > { %10367 = vmatprep.mubr.msk.bf16.mxu0 %vm364_vm0, %v8738_v20  ;;  %v10776_v53 = vunpack.i.h.bf16 %v13023_v2  ;;  %v8685_v2 = vsel %vm981_vm2, %v12933_v17, %v10775_v3  ;;  %v10785_v17 = vunpack.i.l.bf16 %v13027_v29  ;;  %v10801_v3 = vunpack.i.h.bf16 %v13033_v60 }
 0x996   : > { %v8709_v43 = vsel %vm8705_vm5, %v8676_v51, %v10831_v47  ;;  %v8708_v33 = vsel %vm8705_vm5, %v8675_v38, %v10830_v61  ;;  %v10771_v38 = vunpack.i.h.bf16 %v13021_v45 }
 0x997   : > { %v8739_v16 = vpack.c.bf16 %v8709_v43, %v8708_v33  ;;  %v10834_v4 = vpop.permute.xlu1 %10833 }
 0x998   : > { %v10836_v34 = vunpack.i.h.bf16 %v10834_v4  ;;  %v10835_v62 = vunpack.i.l.bf16 %v10834_v4  ;;  %v8684_v45 = vsel %vm981_vm2, %v12919_v8, %v10771_v38 }
 0x999   : > { %10368 = vmatmul.mubr.msk.bf16.vlgmr.msra.gmra.mrb[20].mxu0 %vm364_vm0, %v8739_v16 }
 0x99a   : > { %v8711_v18 = vsel %vm8705_vm5, %v8678_v7, %v10836_v34  ;;  %v8710_v5 = vsel %vm8705_vm5, %v8677_v26, %v10835_v62  ;;  %v10839_v52 = vpop.permute.xlu0 %10838  ;;  %v8683_v34 = vsel %vm981_vm2, %v12923_v14, %v10770_v50  ;;  %v8686_v14 = vsel %vm981_vm2, %v12929_v15, %v10776_v53 }
 0x99b   : > { %v8740_v61 = vpack.c.bf16 %v8711_v18, %v8710_v5  ;;  %v10841_v13 = vunpack.i.h.bf16 %v10839_v52  ;;  %v10840_v20 = vunpack.i.l.bf16 %v10839_v52  ;;  %v10781_v5 = vunpack.i.h.bf16 %v13025_v31 }
 0x99c   : > { %v10780_v52 = vunpack.i.l.bf16 %v13025_v31  ;;  %v10786_v15 = vunpack.i.h.bf16 %v13027_v29  ;;  %v10791_v50 = vunpack.i.h.bf16 %v13029_v27  ;;  %v8689_v29 = vsel %vm981_vm2, %v12951_v23, %v10785_v17 }
 0x99d   : > { %v8712_v9 = vsel %vm8705_vm5, %v8679_v46, %v10840_v20  ;;  %v8713_v44 = vsel %vm8705_vm5, %v8680_v48, %v10841_v13  ;;  %10371 = vmatprep.mubr.msk.bf16.mxu0 %vm364_vm0, %v8740_v61  ;;  %v8688_v31 = vsel %vm981_vm2, %v12937_v49, %v10781_v5 }
 0x99e   : > { %v8741_v47 = vpack.c.bf16 %v8713_v44, %v8712_v9  ;;  %v8687_v9 = vsel %vm981_vm2, %v12941_v28, %v10780_v52  ;;  %v8690_v28 = vsel %vm981_vm2, %v12947_v63, %v10786_v15  ;;  %v10795_v63 = vunpack.i.l.bf16 %v13031_v37 }
 0x99f   : > { %v10844_v51 = vpop.permute.xlu1 %10843 }
 0x9a0   : > { %v10846_v30 = vunpack.i.h.bf16 %v10844_v51  ;;  %v10845_v35 = vunpack.i.l.bf16 %v10844_v51 }
 0x9a1   : > { %10372 = vmatmul.mubr.msk.bf16.gmra.mrb[24].mxu0 %vm364_vm0, %v8741_v47 }
 0x9a2   : > { %v8715_v43 = vsel %vm8705_vm5, %v8682_v39, %v10846_v30  ;;  %v8714_v33 = vsel %vm8705_vm5, %v8681_v40, %v10845_v35  ;;  %v10849_v16 = vpop.permute.xlu0 %10848  ;;  %v10790_v30 = vunpack.i.l.bf16 %v13029_v27  ;;  %v8692_v27 = vsel %vm981_vm2, %v12955_v24, %v10791_v50 }
 0x9a3   : > { %v8742_v4 = vpack.c.bf16 %v8715_v43, %v8714_v33  ;;  %v10851_v59 = vunpack.i.h.bf16 %v10849_v16  ;;  %v10850_v0 = vunpack.i.l.bf16 %v10849_v16 }
 0x9a5   : > { %v8717_v62 = vsel %vm8705_vm5, %v8684_v45, %v10851_v59  ;;  %v8716_v7 = vsel %vm8705_vm5, %v8683_v34, %v10850_v0  ;;  %10375 = vmatprep.mubr.msk.bf16.mxu0 %vm364_vm0, %v8742_v4  ;;  %v8691_v59 = vsel %vm981_vm2, %v12959_v12, %v10790_v30  ;;  %v10796_v0 = vunpack.i.h.bf16 %v13031_v37 }
 0x9a6   : > { %v8743_v26 = vpack.c.bf16 %v8717_v62, %v8716_v7  ;;  %v10800_v62 = vunpack.i.l.bf16 %v13033_v60  ;;  %v8693_v37 = vsel %vm981_vm2, %v12969_v57, %v10795_v63  ;;  %v8696_v60 = vsel %vm981_vm2, %v12973_v32, %v10801_v3  ;;  %v13187_v63 = vld [vmem:[%s13297_s4] ss:$0 sm:$0xff] }
 0x9a7   : > { %v10854_v18 = vpop.permute.xlu1 %10853  ;;  %v8694_v12 = vsel %vm981_vm2, %v12965_v22, %v10796_v0  ;;  %v10805_v22 = vunpack.i.l.bf16 %v13035_v25 }
 0x9a8   : > { %v10856_v8 = vunpack.i.h.bf16 %v10854_v18  ;;  %v10855_v61 = vunpack.i.l.bf16 %v10854_v18 }
 0x9a9   : > { %10376 = vmatmul.mubr.msk.bf16.gmra.mrb[28].mxu0 %vm364_vm0, %v8743_v26 }
 0x9aa   : > { %v8719_v13 = vsel %vm8705_vm5, %v8686_v14, %v10856_v8  ;;  %v8718_v20 = vsel %vm8705_vm5, %v8685_v2, %v10855_v61  ;;  %v10859_v46 = vpop.permute.xlu0 %10858  ;;  %v8695_v14 = vsel %vm981_vm2, %v12977_v6, %v10800_v62  ;;  %v10806_v2 = vunpack.i.h.bf16 %v13035_v25 }
 0x9ab   : > { %v8744_v48 = vpack.c.bf16 %v8719_v13, %v8718_v20  ;;  %v10861_v58 = vunpack.i.h.bf16 %v10859_v46  ;;  %v10860_v55 = vunpack.i.l.bf16 %v10859_v46  ;;  %v8697_v25 = vsel %vm981_vm2, %v12987_v21, %v10805_v22 }
 0x9ac   : > { %v8698_v6 = vsel %vm981_vm2, %v12983_v36, %v10806_v2  ;;  %v10815_v36 = vunpack.i.l.bf16 %v13039_v1 }
 0x9ad   : > { %v8721_v44 = vsel %vm8705_vm5, %v8688_v31, %v10861_v58  ;;  %v8720_v47 = vsel %vm8705_vm5, %v8687_v9, %v10860_v55  ;;  %10379 = vmatprep.mubr.msk.bf16.mxu1 %vm364_vm0, %v8744_v48  ;;  %v10811_v48 = vunpack.i.h.bf16 %v13037_v42  ;;  %v10810_v58 = vunpack.i.l.bf16 %v13037_v42 }
 0x9ae   : > { %v8745_v51 = vpack.c.bf16 %v8721_v44, %v8720_v47 }
 0x9af   : > { %v10864_v38 = vpop.permute.xlu1 %10863  ;;  %v8700_v42 = vsel %vm981_vm2, %v12991_v56, %v10811_v48 }
 0x9b0   : > { %v10866_v49 = vunpack.i.h.bf16 %v10864_v38  ;;  %v10865_v35 = vunpack.i.l.bf16 %v10864_v38  ;;  %10380 = vmatmul.mubr.msk.bf16.vlgmr.msra.gmra.mrb[12].mxu1 %vm364_vm0, %v8745_v51  ;;  %v8699_v51 = vsel %vm981_vm2, %v12995_v54, %v10810_v58  ;;  %v10816_v38 = vunpack.i.h.bf16 %v13039_v1 }
 0x9b1   : > { %v8701_v1 = vsel %vm981_vm2, %v13005_v10, %v10815_v36 }
 0x9b2   : > { %v8723_v39 = vsel %vm8705_vm5, %v8690_v28, %v10866_v49  ;;  %v8722_v40 = vsel %vm8705_vm5, %v8689_v29, %v10865_v35  ;;  %v10869_v43 = vpop.permute.xlu0 %10868  ;;  %v10821_v35 = vunpack.i.h.bf16 %v13041_v11  ;;  %v10820_v28 = vunpack.i.l.bf16 %v13041_v11 }
 0x9b3   : > { %v8746_v33 = vpack.c.bf16 %v8723_v39, %v8722_v40  ;;  %v10871_v16 = vunpack.i.h.bf16 %v10869_v43  ;;  %v10870_v4 = vunpack.i.l.bf16 %v10869_v43  ;;  %v8702_v54 = vsel %vm981_vm2, %v13001_v19, %v10816_v38 }
 0x9b4   : > { %v8704_v11 = vsel %vm981_vm2, %v13009_v41, %v10821_v35 }
 0x9b5   : > { %v8725_v23 = vsel %vm8705_vm5, %v8692_v27, %v10871_v16  ;;  %v8724_v45 = vsel %vm8705_vm5, %v8691_v59, %v10870_v4  ;;  %10383 = vmatprep.mubr.msk.bf16.mxu1 %vm364_vm0, %v8746_v33  ;;  %v13488_v27 = vld [vmem:[#allocation30_spill] sm:$0xff] }
 0x9b6   : > { %v8747_v34 = vpack.c.bf16 %v8725_v23, %v8724_v45  ;;  %v8703_v59 = vsel %vm981_vm2, %v13488_v27, %v10820_v28 }
 0x9b7   : > { %v10874_v53 = vpop.permute.xlu1 %10873 }
 0x9b8   : > { %v10876_v24 = vunpack.i.h.bf16 %v10874_v53  ;;  %v10875_v7 = vunpack.i.l.bf16 %v10874_v53  ;;  %10384 = vmatmul.mubr.msk.bf16.gmra.mrb[16].mxu1 %vm364_vm0, %v8747_v34 }
 0x9ba   : > { %v8727_v26 = vsel %vm8705_vm5, %v8694_v12, %v10876_v24  ;;  %v8726_v18 = vsel %vm8705_vm5, %v8693_v37, %v10875_v7  ;;  %v10879_v5 = vpop.permute.xlu0 %10878 }
 0x9bb   : > { %v8748_v52 = vpack.c.bf16 %v8727_v26, %v8726_v18  ;;  %v10881_v8 = vunpack.i.h.bf16 %v10879_v5  ;;  %v10880_v61 = vunpack.i.l.bf16 %v10879_v5 }
 0x9bd   : > { %v8729_v57 = vsel %vm8705_vm5, %v8696_v60, %v10881_v8  ;;  %v8728_v13 = vsel %vm8705_vm5, %v8695_v14, %v10880_v61  ;;  %10387 = vmatprep.mubr.msk.bf16.mxu1 %vm364_vm0, %v8748_v52 }
 0x9be   : > { %v8749_v20 = vpack.c.bf16 %v8729_v57, %v8728_v13 }
 0x9bf   : > { %v10884_v46 = vpop.permute.xlu1 %10883 }
 0x9c0   : > { %v10886_v32 = vunpack.i.h.bf16 %v10884_v46  ;;  %v10885_v55 = vunpack.i.l.bf16 %v10884_v46  ;;  %10388 = vmatmul.mubr.msk.bf16.gmra.mrb[20].mxu1 %vm364_vm0, %v8749_v20 }
 0x9c2   : > { %v8731_v31 = vsel %vm8705_vm5, %v8698_v6, %v10886_v32  ;;  %v8730_v9 = vsel %vm8705_vm5, %v8697_v25, %v10885_v55  ;;  %v10889_v15 = vpop.permute.xlu0 %10888 }
 0x9c3   : > { %v8750_v17 = vpack.c.bf16 %v8731_v31, %v8730_v9  ;;  %v10891_v44 = vunpack.i.h.bf16 %v10889_v15  ;;  %v10890_v47 = vunpack.i.l.bf16 %v10889_v15 }
 0x9c5   : > { %v8733_v21 = vsel %vm8705_vm5, %v8700_v42, %v10891_v44  ;;  %v8732_v50 = vsel %vm8705_vm5, %v8699_v51, %v10890_v47  ;;  %10391 = vmatprep.mubr.msk.bf16.mxu1 %vm364_vm0, %v8750_v17 }
 0x9c6   : > { %v8751_v30 = vpack.c.bf16 %v8733_v21, %v8732_v50 }
 0x9c7   : > { %v10894_v49 = vpop.permute.xlu1 %10893 }
 0x9c8   : > { %v10896_v56 = vunpack.i.h.bf16 %v10894_v49  ;;  %v10895_v29 = vunpack.i.l.bf16 %v10894_v49  ;;  %10392 = vmatmul.mubr.msk.bf16.gmra.mrb[24].mxu1 %vm364_vm0, %v8751_v30 }
 0x9ca   : > { %v8735_v39 = vsel %vm8705_vm5, %v8702_v54, %v10896_v56  ;;  %v8734_v40 = vsel %vm8705_vm5, %v8701_v1, %v10895_v29  ;;  %v10899_v43 = vpop.permute.xlu0 %10898 }
 0x9cb   : > { %v8752_v33 = vpack.c.bf16 %v8735_v39, %v8734_v40  ;;  %v10901_v16 = vunpack.i.h.bf16 %v10899_v43  ;;  %v10900_v4 = vunpack.i.l.bf16 %v10899_v43 }
 0x9cd   : > { %v8737_v0 = vsel %vm8705_vm5, %v8704_v11, %v10901_v16  ;;  %v8736_v19 = vsel %vm8705_vm5, %v8703_v59, %v10900_v4  ;;  %10395 = vmatprep.mubr.msk.bf16.mxu1 %vm364_vm0, %v8752_v33 }
 0x9ce   : > { %v8753_v10 = vpack.c.bf16 %v8737_v0, %v8736_v19 }
 0x9d0   : > { %10396 = vmatmul.mubr.msk.bf16.gmra.mrb[28].mxu1 %vm364_vm0, %v8753_v10 }
 0xa6c   : > { %v10369_v41 = vpop.f32.mrb[20].mxu0 }
 0xa6d   : > { %v8868_v23 = vadd.f32 %v10369_v41, %v13187_v63  ;;  %v8859_v45 = vpop.f32.mrb[21].mxu0 }
 0xa6e   : > { %v8860_v34 = vadd.f32 %v13187_v63, %v8859_v45  ;;  %v10370_v53 = vpop.f32.mrb[22].mxu0 }
 0xa6f   : > { %8988 = vst.msk [vmem:[%s13192_s25 + $0x10] sm:$0xff] %vm364_vm0, %v8868_v23  ;;  %v8871_v3 = vadd.f32 %v10370_v53, %v13187_v63  ;;  %v8862_v62 = vpop.f32.mrb[23].mxu0 }
 0xa70   : > { %8986 = vst.msk [vmem:[%s13192_s25] sm:$0xff] %vm364_vm0, %v8860_v34  ;;  %v8863_v24 = vadd.f32 %v13187_v63, %v8862_v62 }
 0xa71   : > { %8989 = vst.msk [vmem:[%s13192_s25 + $0x18] sm:$0xff] %vm364_vm0, %v8871_v3 }
 0xa72   : > { %8987 = vst.msk [vmem:[%s13192_s25 + $0x8] sm:$0xff] %vm364_vm0, %v8863_v24 }
 0xa74   : > { %v10373_v7 = vpop.f32.mrb[24].mxu0 }
 0xa75   : > { %v8884_v12 = vadd.f32 %v10373_v7, %v13187_v63  ;;  %v8875_v37 = vpop.f32.mrb[25].mxu0 }
 0xa76   : > { %v8876_v26 = vadd.f32 %v13187_v63, %v8875_v37  ;;  %v10374_v18 = vpop.f32.mrb[26].mxu0 }
 0xa77   : > { %8992 = vst.msk [vmem:[%s13192_s25 + $0x30] sm:$0xff] %vm364_vm0, %v8884_v12  ;;  %v8887_v5 = vadd.f32 %v10374_v18, %v13187_v63  ;;  %v8878_v52 = vpop.f32.mrb[27].mxu0 }
 0xa78   : > { %8990 = vst.msk [vmem:[%s13192_s25 + $0x20] sm:$0xff] %vm364_vm0, %v8876_v26  ;;  %v8879_v8 = vadd.f32 %v13187_v63, %v8878_v52 }
 0xa79   : > { %8993 = vst.msk [vmem:[%s13192_s25 + $0x38] sm:$0xff] %vm364_vm0, %v8887_v5 }
 0xa7a   : > { %8991 = vst.msk [vmem:[%s13192_s25 + $0x28] sm:$0xff] %vm364_vm0, %v8879_v8 }
 0xa7c   : > { %v10377_v61 = vpop.f32.mrb[28].mxu0 }
 0xa7d   : > { %v8900_v60 = vadd.f32 %v10377_v61, %v13187_v63  ;;  %v8891_v14 = vpop.f32.mrb[29].mxu0 }
 0xa7e   : > { %v8892_v2 = vadd.f32 %v13187_v63, %v8891_v14  ;;  %v10378_v22 = vpop.f32.mrb[30].mxu0 }
 0xa7f   : > { %8996 = vst.msk [vmem:[%s13192_s25 + $0x50] sm:$0xff] %vm364_vm0, %v8900_v60  ;;  %v8903_v57 = vadd.f32 %v10378_v22, %v13187_v63  ;;  %v8894_v13 = vpop.f32.mrb[31].mxu0 }
 0xa80   : > { %8994 = vst.msk [vmem:[%s13192_s25 + $0x40] sm:$0xff] %vm364_vm0, %v8892_v2  ;;  %v8895_v20 = vadd.f32 %v13187_v63, %v8894_v13 }
 0xa81   : > { %8997 = vst.msk [vmem:[%s13192_s25 + $0x58] sm:$0xff] %vm364_vm0, %v8903_v57 }
 0xa82   : > { %8995 = vst.msk [vmem:[%s13192_s25 + $0x48] sm:$0xff] %vm364_vm0, %v8895_v20 }
 0xa83   : > { %v10381_v46 = vpop.f32.mrb[12].mxu1 }
 0xa84   : > { %v8916_v48 = vadd.f32 %v10381_v46, %v13187_v63  ;;  %v8907_v58 = vpop.f32.mrb[13].mxu1 }
 0xa85   : > { %v8908_v32 = vadd.f32 %v13187_v63, %v8907_v58  ;;  %v10382_v55 = vpop.f32.mrb[14].mxu1 }
 0xa86   : > { %9000 = vst.msk [vmem:[%s13192_s25 + $0x70] sm:$0xff] %vm364_vm0, %v8916_v48  ;;  %v8919_v6 = vadd.f32 %v10382_v55, %v13187_v63  ;;  %v8910_v25 = vpop.f32.mrb[15].mxu1 }
 0xa87   : > { %8998 = vst.msk [vmem:[%s13192_s25 + $0x60] sm:$0xff] %vm364_vm0, %v8908_v32  ;;  %v8911_v31 = vadd.f32 %v13187_v63, %v8910_v25 }
 0xa88   : > { %9001 = vst.msk [vmem:[%s13192_s25 + $0x78] sm:$0xff] %vm364_vm0, %v8919_v6 }
 0xa89   : > { %8999 = vst.msk [vmem:[%s13192_s25 + $0x68] sm:$0xff] %vm364_vm0, %v8911_v31 }
 0xa8b   : > { %v10385_v9 = vpop.f32.mrb[16].mxu1 }
 0xa8c   : > { %v8932_v15 = vadd.f32 %v10385_v9, %v13187_v63  ;;  %v8923_v17 = vpop.f32.mrb[17].mxu1 }
 0xa8d   : > { %v8924_v44 = vadd.f32 %v13187_v63, %v8923_v17  ;;  %v10386_v47 = vpop.f32.mrb[18].mxu1 }
 0xa8e   : > { %9004 = vst.msk [vmem:[%s13192_s25 + $0x90] sm:$0xff] %vm364_vm0, %v8932_v15  ;;  %v8935_v42 = vadd.f32 %v10386_v47, %v13187_v63  ;;  %v8926_v51 = vpop.f32.mrb[19].mxu1 }
 0xa8f   : > { %9002 = vst.msk [vmem:[%s13192_s25 + $0x80] sm:$0xff] %vm364_vm0, %v8924_v44  ;;  %v8927_v38 = vadd.f32 %v13187_v63, %v8926_v51 }
 0xa90   : > { %9005 = vst.msk [vmem:[%s13192_s25 + $0x98] sm:$0xff] %vm364_vm0, %v8935_v42 }
 0xa91   : > { %9003 = vst.msk [vmem:[%s13192_s25 + $0x88] sm:$0xff] %vm364_vm0, %v8927_v38 }
 0xa93   : > { %v10389_v36 = vpop.f32.mrb[20].mxu1 }
 0xa94   : > { %v8948_v21 = vadd.f32 %v10389_v36, %v13187_v63  ;;  %v8939_v50 = vpop.f32.mrb[21].mxu1 }
 0xa95   : > { %v8940_v30 = vadd.f32 %v13187_v63, %v8939_v50  ;;  %v10390_v49 = vpop.f32.mrb[22].mxu1 }
 0xa96   : > { %9008 = vst.msk [vmem:[%s13192_s25 + $0xb0] sm:$0xff] %vm364_vm0, %v8948_v21  ;;  %v8951_v35 = vadd.f32 %v10390_v49, %v13187_v63  ;;  %v8942_v28 = vpop.f32.mrb[23].mxu1 }
 0xa97   : > { %9006 = vst.msk [vmem:[%s13192_s25 + $0xa0] sm:$0xff] %vm364_vm0, %v8940_v30  ;;  %v8943_v56 = vadd.f32 %v13187_v63, %v8942_v28 }
 0xa98   : > { %9009 = vst.msk [vmem:[%s13192_s25 + $0xb8] sm:$0xff] %vm364_vm0, %v8951_v35 }
 0xa99   : > { %9007 = vst.msk [vmem:[%s13192_s25 + $0xa8] sm:$0xff] %vm364_vm0, %v8943_v56 }
 0xa9b   : > { %v10393_v29 = vpop.f32.mrb[24].mxu1 }
 0xa9c   : > { %v8964_v54 = vadd.f32 %v10393_v29, %v13187_v63  ;;  %v8955_v1 = vpop.f32.mrb[25].mxu1 }
 0xa9d   : > { %v8956_v39 = vadd.f32 %v13187_v63, %v8955_v1  ;;  %v10394_v40 = vpop.f32.mrb[26].mxu1 }
 0xa9e   : > { %9012 = vst.msk [vmem:[%s13192_s25 + $0xd0] sm:$0xff] %vm364_vm0, %v8964_v54  ;;  %v8967_v43 = vadd.f32 %v10394_v40, %v13187_v63  ;;  %v8958_v33 = vpop.f32.mrb[27].mxu1 }
 0xa9f   : > { %9010 = vst.msk [vmem:[%s13192_s25 + $0xc0] sm:$0xff] %vm364_vm0, %v8956_v39  ;;  %v8959_v16 = vadd.f32 %v13187_v63, %v8958_v33 }
 0xaa0   : > { %9013 = vst.msk [vmem:[%s13192_s25 + $0xd8] sm:$0xff] %vm364_vm0, %v8967_v43 }
 0xaa1   : > { %9011 = vst.msk [vmem:[%s13192_s25 + $0xc8] sm:$0xff] %vm364_vm0, %v8959_v16 }
 0xaa3   : > { %v10397_v4 = vpop.f32.mrb[28].mxu1 }
 0xaa4   : > { %v8980_v11 = vadd.f32 %v10397_v4, %v13187_v63  ;;  %v8971_v27 = vpop.f32.mrb[29].mxu1 }
 0xaa5   : > { %v8972_v59 = vadd.f32 %v13187_v63, %v8971_v27  ;;  %v10398_v0 = vpop.f32.mrb[30].mxu1 }
 0xaa6   : > { %9016 = vst.msk [vmem:[%s13192_s25 + $0xf0] sm:$0xff] %vm364_vm0, %v8980_v11  ;;  %v8983_v19 = vadd.f32 %v10398_v0, %v13187_v63  ;;  %v8974_v10 = vpop.f32.mrb[31].mxu1 }
 0xaa7   : > { %9014 = vst.msk [vmem:[%s13192_s25 + $0xe0] sm:$0xff] %vm364_vm0, %v8972_v59  ;;  %v8975_v41 = vadd.f32 %v13187_v63, %v8974_v10 }
 0xaa8   : > { %9017 = vst.msk [vmem:[%s13192_s25 + $0xf8] sm:$0xff] %vm364_vm0, %v8983_v19 }
 0xaa9   : > { %9015 = vst.msk [vmem:[%s13192_s25 + $0xe8] sm:$0xff] %vm364_vm0, %v8975_v41 }
 0xaaa PF: > { %s15_s18 = sadd.s32 1, %s10928_s18  }
 0xaab   : > { %p12_p4 = scmp.ge.s32.totalorder %s15_s18, 6  }
 0xaad   :  { %14 = sbr.rel (!%p12_p4) target bundleno = 1 (0x1), region = 70 }

</bundles_post_ra>
